<compile_context>
chip_gen: v6e
topology: v6e:2x2x1
jax: 0.10.0
libtpu: 0.0.40
codegen_flags: <defaults>
</compile_context>

<pallas_src>
import jax
import jax.numpy as jnp
from jax import lax
from jax.experimental import pallas as pl
from jax.experimental.pallas import tpu as pltpu

H = W = 10            # spatial size (must satisfy 5 * ((H - 2) // 3) == H)
CIN = 86              # conv1 in_channels
C1 = 32               # conv1 out_channels
C2 = 64               # added_conv out_channels
CCAT = CIN + C1       # 118 = added_conv in_channels
NPOOL = ((H - 2) - 3) // 3 + 1   # 2  (maxpool output size per spatial dim)
USED = 3 * NPOOL                 # 6  (region of conv1 output consumed by the pool)
TILE = H // NPOOL                # 5  (repeat_interleave factor)
TAPW = 128                       # lane width of one tap group in the wide weights


def _pool_and_inject_kernel(x_ref, w1_ref, b1_ref, w2x_ref, w2t_ref, b2_ref,
                            o_ref, padx_ref, padt_ref):
    # x_ref   : (1, H, W, 86)
    # w1_ref  : (86, 9*128)  [ci, tap*128 + co], zero-padded for co >= 32
    # w2x_ref : (86, 9*128)  input-channel part of added_conv, zero pad co >= 64
    # w2t_ref : (32, 9*128)  pooled-channel part of added_conv, zero pad co >= 64
    # b1_ref  : (1, 32)   b2_ref : (1, 64)
    # o_ref   : (1, H, W, 64)
    # padx_ref: (H+2, W+2, 86) VMEM scratch;  padt_ref: (H+2, W+2, 32) VMEM scratch
    x = x_ref[0]                                                   # (10, 10, 86)

    # ---- conv1 (3x3, valid, 86->32): one wide matmul + 9 aligned shifted adds
    p1 = jnp.dot(x.reshape(H * W, CIN), w1_ref[...],
                 preferred_element_type=jnp.float32).reshape(H, W, 9 * TAPW)
    acc1 = p1[0:USED, 0:USED, 0:TAPW]
    for tap in range(1, 9):
        dy, dx = tap // 3, tap % 3
        acc1 = acc1 + p1[dy:dy + USED, dx:dx + USED,
                         tap * TAPW:(tap + 1) * TAPW]
    a = acc1[:, :, :C1] + b1_ref[...].reshape(1, 1, C1)            # (6, 6, 32)

    # ---- maxpool 3x3 / stride 3 -> 2x2 cells (NPOOL == 2 hard-coded below)
    r0 = jnp.maximum(jnp.maximum(a[0], a[1]), a[2])                # (6, 32)
    r1 = jnp.maximum(jnp.maximum(a[3], a[4]), a[5])                # (6, 32)
    c00 = jnp.max(r0[0:3], axis=0, keepdims=True)                  # (1, 32)
    c01 = jnp.max(r0[3:6], axis=0, keepdims=True)
    c10 = jnp.max(r1[0:3], axis=0, keepdims=True)
    c11 = jnp.max(r1[3:6], axis=0, keepdims=True)

    # ---- zero-padded buffers for the 'same' conv; the 5x5 nearest tiling of the
    #      pooled cells and the channel concat are realized directly as stores.
    padx_ref[...] = jnp.zeros_like(padx_ref)
    padt_ref[...] = jnp.zeros_like(padt_ref)
    padx_ref[1:H + 1, 1:W + 1, :] = x
    padt_ref[1:1 + TILE, 1:1 + TILE, :] = jnp.broadcast_to(
        c00.reshape(1, 1, C1), (TILE, TILE, C1))
    padt_ref[1:1 + TILE, 1 + TILE:1 + 2 * TILE, :] = jnp.broadcast_to(
        c01.reshape(1, 1, C1), (TILE, TILE, C1))
    padt_ref[1 + TILE:1 + 2 * TILE, 1:1 + TILE, :] = jnp.broadcast_to(
        c10.reshape(1, 1, C1), (TILE, TILE, C1))
    padt_ref[1 + TILE:1 + 2 * TILE, 1 + TILE:1 + 2 * TILE, :] = jnp.broadcast_to(
        c11.reshape(1, 1, C1), (TILE, TILE, C1))

    # ---- added_conv (3x3, pad=1, 118->64) on the implicit concat [x, t]:
    #      two wide matmuls (split by channel group) + 9 aligned shifted adds
    hp, wp = H + 2, W + 2
    p2 = (jnp.dot(padx_ref[...].reshape(hp * wp, CIN), w2x_ref[...],
                  preferred_element_type=jnp.float32) +
          jnp.dot(padt_ref[...].reshape(hp * wp, C1), w2t_ref[...],
                  preferred_element_type=jnp.float32)).reshape(hp, wp, 9 * TAPW)
    acc2 = p2[0:H, 0:W, 0:TAPW]
    for tap in range(1, 9):
        dy, dx = tap // 3, tap % 3
        acc2 = acc2 + p2[dy:dy + H, dx:dx + W,
                         tap * TAPW:(tap + 1) * TAPW]
    o_ref[0] = acc2[:, :, :C2] + b2_ref[...].reshape(1, 1, C2)     # (10, 10, 64)


def _widen_taps(w_hwio, tapw=TAPW):
    """(3, 3, Cin, Cout) -> (Cin, 9*tapw) with each 3x3 tap in its own
    128-lane-aligned column group (zero padded beyond Cout)."""
    kh, kw, ci, co = w_hwio.shape
    w = jnp.pad(w_hwio, ((0, 0), (0, 0), (0, 0), (0, tapw - co)))
    return jnp.transpose(w, (2, 0, 1, 3)).reshape(ci, kh * kw * tapw)


def prepare_params(w1_oihw, b1, w2_oihw, b2):
    """Convert PyTorch-layout conv weights into the wide, tap-grouped layout the
    kernel consumes.  Do this once at model-load time."""
    w1_hwio = jnp.transpose(w1_oihw, (2, 3, 1, 0))        # (3, 3, 86, 32)
    w2_hwio = jnp.transpose(w2_oihw, (2, 3, 1, 0))        # (3, 3, 118, 64)
    w1w = _widen_taps(w1_hwio)                            # (86, 1152)
    w2xw = _widen_taps(w2_hwio[:, :, :CIN, :])            # (86, 1152)
    w2tw = _widen_taps(w2_hwio[:, :, CIN:, :])            # (32, 1152)
    return (w1w, b1.reshape(1, C1), w2xw, w2tw, b2.reshape(1, C2))


def pool_and_inject_nhwc(x_nhwc, wide_params):
    """Fused Pool_and_Inject on channels-last input: (N, H, W, 86) -> (N, H, W, 64)."""
    w1w, b1, w2xw, w2tw, b2 = wide_params
    n = x_nhwc.shape[0]
    return pl.pallas_call(
        _pool_and_inject_kernel,
        out_shape=jax.ShapeDtypeStruct((n, H, W, C2), jnp.float32),
        grid_spec=pltpu.PrefetchScalarGridSpec(
            num_scalar_prefetch=0,
            grid=(n,),
            in_specs=[
                pl.BlockSpec((1, H, W, CIN), lambda i: (i, 0, 0, 0)),
                pl.BlockSpec((CIN, 9 * TAPW), lambda i: (0, 0)),
                pl.BlockSpec((1, C1), lambda i: (0, 0)),
                pl.BlockSpec((CIN, 9 * TAPW), lambda i: (0, 0)),
                pl.BlockSpec((C1, 9 * TAPW), lambda i: (0, 0)),
                pl.BlockSpec((1, C2), lambda i: (0, 0)),
            ],
            out_specs=pl.BlockSpec((1, H, W, C2), lambda i: (i, 0, 0, 0)),
            scratch_shapes=[
                pltpu.VMEM((H + 2, W + 2, CIN), jnp.float32),
                pltpu.VMEM((H + 2, W + 2, C1), jnp.float32),
            ],
        ),
        compiler_params=pltpu.CompilerParams(
            dimension_semantics=("parallel",)),
    )(x_nhwc, w1w, b1, w2xw, w2tw, b2)


@jax.jit
def pool_and_inject(x_nchw, params):
    """PyTorch-parity entry point: NCHW in, NCHW out.  The NCHW<->NHWC transposes
    (and per-call weight widening) exist only for parity with the original module;
    a channels-last model should call pool_and_inject_nhwc with pre-widened weights."""
    w1, b1, w2, b2 = params
    wide = prepare_params(w1, b1, w2, b2)
    x_nhwc = jnp.transpose(x_nchw, (0, 2, 3, 1))
    y_nhwc = pool_and_inject_nhwc(x_nhwc, wide)
    return jnp.transpose(y_nhwc, (0, 3, 1, 2))


def reference(x_nchw, params):
    """Pure-JAX/XLA replica of the PyTorch module, used only for validation."""
    w1, b1, w2, b2 = params
    dn = ('NCHW', 'OIHW', 'NCHW')
    a = lax.conv_general_dilated(x_nchw, w1, (1, 1), 'VALID',
                                 dimension_numbers=dn) + b1[None, :, None, None]
    p = lax.reduce_window(a, -jnp.inf, lax.max,
                          (1, 1, 3, 3), (1, 1, 3, 3), 'VALID')
    t = jnp.repeat(jnp.repeat(p, TILE, axis=2), TILE, axis=3)
    cat = jnp.concatenate([x_nchw, t], axis=1)
    y = lax.conv_general_dilated(cat, w2, (1, 1), [(1, 1), (1, 1)],
                                 dimension_numbers=dn) + b2[None, :, None, None]
    return y


def init_params(key):
    # Deterministic synthetic weights (shapes from the module's __init__), OIHW.
    ks = jax.random.split(key, 4)
    w1 = jax.random.normal(ks[0], (C1, CIN, 3, 3), jnp.float32) * 0.05
    b1 = jax.random.normal(ks[1], (C1,), jnp.float32) * 0.05
    w2 = jax.random.normal(ks[2], (C2, CCAT, 3, 3), jnp.float32) * 0.05
    b2 = jax.random.normal(ks[3], (C2,), jnp.float32) * 0.05
    return (w1, b1, w2, b2)


if __name__ == "__main__":
    key = jax.random.PRNGKey(0)
    k_p, k_x = jax.random.split(key)
    params = init_params(k_p)

    N = 2
    x = jax.random.normal(k_x, (N, CIN, H, W), jnp.float32)   # NCHW, like PyTorch

    out = jax.block_until_ready(pool_and_inject(x, params))
    assert out.shape == (N, C2, H, W), out.shape

    ref = jax.block_until_ready(reference(x, params))
    assert jnp.allclose(out, ref, atol=5e-2, rtol=5e-2), \
        f"max abs diff {jnp.max(jnp.abs(out - ref))}"

    print("KERNEL_OK")
</pallas_src>

<mosaic_0001>
module attributes {stable_mosaic.version = 11 : i64} {
  func.func @_pool_and_inject_kernel(%arg0: i32, %arg1: memref<1x10x10x86xf32, #tpu.memory_space<vmem>>, %arg2: memref<86x1152xf32, #tpu.memory_space<vmem>>, %arg3: memref<1x32xf32, #tpu.memory_space<vmem>>, %arg4: memref<86x1152xf32, #tpu.memory_space<vmem>>, %arg5: memref<32x1152xf32, #tpu.memory_space<vmem>>, %arg6: memref<1x64xf32, #tpu.memory_space<vmem>>, %arg7: memref<1x10x10x64xf32, #tpu.memory_space<vmem>>, %arg8: memref<12x12x86xf32, #tpu.memory_space<vmem>>, %arg9: memref<12x12x32xf32, #tpu.memory_space<vmem>>) attributes {dimension_semantics = [#tpu.dimension_semantics<parallel>], iteration_bounds = array<i64: 2>, scalar_prefetch = 0 : i64, scratch_operands = 2 : i64, tpu.core_type = #tpu.core_type<tc>, window_params = [{transform_indices = @transform_0, window_bounds = array<i64: 1, 10, 10, 86>}, {pipeline_mode = #tpu.pipeline_mode<synchronous>, transform_indices = @transform_1, window_bounds = array<i64: 86, 1152>}, {pipeline_mode = #tpu.pipeline_mode<synchronous>, transform_indices = @transform_2, window_bounds = array<i64: 1, 32>}, {pipeline_mode = #tpu.pipeline_mode<synchronous>, transform_indices = @transform_3, window_bounds = array<i64: 86, 1152>}, {pipeline_mode = #tpu.pipeline_mode<synchronous>, transform_indices = @transform_4, window_bounds = array<i64: 32, 1152>}, {pipeline_mode = #tpu.pipeline_mode<synchronous>, transform_indices = @transform_5, window_bounds = array<i64: 1, 64>}, {transform_indices = @transform_6, window_bounds = array<i64: 1, 10, 10, 64>}]} {
    %c0 = arith.constant 0 : index
    %c0_0 = arith.constant 0 : index
    %c0_1 = arith.constant 0 : index
    %c0_2 = arith.constant 0 : index
    %0 = vector.load %arg1[%c0, %c0_0, %c0_1, %c0_2] : memref<1x10x10x86xf32, #tpu.memory_space<vmem>>, vector<1x10x10x86xf32>
    %1 = vector.shape_cast %0 : vector<1x10x10x86xf32> to vector<10x10x86xf32>
    %2 = vector.shape_cast %1 : vector<10x10x86xf32> to vector<100x86xf32>
    %c0_3 = arith.constant 0 : index
    %c0_4 = arith.constant 0 : index
    %3 = vector.load %arg2[%c0_3, %c0_4] : memref<86x1152xf32, #tpu.memory_space<vmem>>, vector<86x1152xf32>
    %cst = arith.constant dense<0.000000e+00> : vector<100x1152xf32>
    %4 = tpu.matmul %2, %3, %cst {dimension_numbers = #tpu.dot_dimension_numbers<[1], [0], [0], [1], [0, 0, 1, 1], [], []>} : vector<100x86xf32>, vector<86x1152xf32>, vector<100x1152xf32> -> vector<100x1152xf32>
    %5 = vector.shape_cast %4 : vector<100x1152xf32> to vector<10x10x1152xf32>
    %6 = vector.extract_strided_slice %5 {offsets = [0, 0, 0], sizes = [6, 6, 128], strides = [1, 1, 1]} : vector<10x10x1152xf32> to vector<6x6x128xf32>
    %7 = vector.extract_strided_slice %5 {offsets = [0, 1, 128], sizes = [6, 6, 128], strides = [1, 1, 1]} : vector<10x10x1152xf32> to vector<6x6x128xf32>
    %8 = arith.addf %6, %7 : vector<6x6x128xf32>
    %9 = vector.extract_strided_slice %5 {offsets = [0, 2, 256], sizes = [6, 6, 128], strides = [1, 1, 1]} : vector<10x10x1152xf32> to vector<6x6x128xf32>
    %10 = arith.addf %8, %9 : vector<6x6x128xf32>
    %11 = vector.extract_strided_slice %5 {offsets = [1, 0, 384], sizes = [6, 6, 128], strides = [1, 1, 1]} : vector<10x10x1152xf32> to vector<6x6x128xf32>
    %12 = arith.addf %10, %11 : vector<6x6x128xf32>
    %13 = vector.extract_strided_slice %5 {offsets = [1, 1, 512], sizes = [6, 6, 128], strides = [1, 1, 1]} : vector<10x10x1152xf32> to vector<6x6x128xf32>
    %14 = arith.addf %12, %13 : vector<6x6x128xf32>
    %15 = vector.extract_strided_slice %5 {offsets = [1, 2, 640], sizes = [6, 6, 128], strides = [1, 1, 1]} : vector<10x10x1152xf32> to vector<6x6x128xf32>
    %16 = arith.addf %14, %15 : vector<6x6x128xf32>
    %17 = vector.extract_strided_slice %5 {offsets = [2, 0, 768], sizes = [6, 6, 128], strides = [1, 1, 1]} : vector<10x10x1152xf32> to vector<6x6x128xf32>
    %18 = arith.addf %16, %17 : vector<6x6x128xf32>
    %19 = vector.extract_strided_slice %5 {offsets = [2, 1, 896], sizes = [6, 6, 128], strides = [1, 1, 1]} : vector<10x10x1152xf32> to vector<6x6x128xf32>
    %20 = arith.addf %18, %19 : vector<6x6x128xf32>
    %21 = vector.extract_strided_slice %5 {offsets = [2, 2, 1024], sizes = [6, 6, 128], strides = [1, 1, 1]} : vector<10x10x1152xf32> to vector<6x6x128xf32>
    %22 = arith.addf %20, %21 : vector<6x6x128xf32>
    %23 = vector.extract_strided_slice %22 {offsets = [0, 0, 0], sizes = [6, 6, 32], strides = [1, 1, 1]} : vector<6x6x128xf32> to vector<6x6x32xf32>
    %c0_5 = arith.constant 0 : index
    %c0_6 = arith.constant 0 : index
    %24 = vector.load %arg3[%c0_5, %c0_6] : memref<1x32xf32, #tpu.memory_space<vmem>>, vector<1x32xf32>
    %25 = vector.shape_cast %24 : vector<1x32xf32> to vector<1x1x32xf32>
    %26 = vector.broadcast %25 : vector<1x1x32xf32> to vector<6x6x32xf32>
    %27 = arith.addf %23, %26 : vector<6x6x32xf32>
    %28 = vector.extract_strided_slice %27 {offsets = [0, 0, 0], sizes = [1, 6, 32], strides = [1, 1, 1]} : vector<6x6x32xf32> to vector<1x6x32xf32>
    %29 = vector.shape_cast %28 : vector<1x6x32xf32> to vector<6x32xf32>
    %30 = vector.extract_strided_slice %27 {offsets = [1, 0, 0], sizes = [1, 6, 32], strides = [1, 1, 1]} : vector<6x6x32xf32> to vector<1x6x32xf32>
    %31 = vector.shape_cast %30 : vector<1x6x32xf32> to vector<6x32xf32>
    %32 = arith.maximumf %29, %31 : vector<6x32xf32>
    %33 = vector.extract_strided_slice %27 {offsets = [2, 0, 0], sizes = [1, 6, 32], strides = [1, 1, 1]} : vector<6x6x32xf32> to vector<1x6x32xf32>
    %34 = vector.shape_cast %33 : vector<1x6x32xf32> to vector<6x32xf32>
    %35 = arith.maximumf %32, %34 : vector<6x32xf32>
    %36 = vector.extract_strided_slice %27 {offsets = [3, 0, 0], sizes = [1, 6, 32], strides = [1, 1, 1]} : vector<6x6x32xf32> to vector<1x6x32xf32>
    %37 = vector.shape_cast %36 : vector<1x6x32xf32> to vector<6x32xf32>
    %38 = vector.extract_strided_slice %27 {offsets = [4, 0, 0], sizes = [1, 6, 32], strides = [1, 1, 1]} : vector<6x6x32xf32> to vector<1x6x32xf32>
    %39 = vector.shape_cast %38 : vector<1x6x32xf32> to vector<6x32xf32>
    %40 = arith.maximumf %37, %39 : vector<6x32xf32>
    %41 = vector.extract_strided_slice %27 {offsets = [5, 0, 0], sizes = [1, 6, 32], strides = [1, 1, 1]} : vector<6x6x32xf32> to vector<1x6x32xf32>
    %42 = vector.shape_cast %41 : vector<1x6x32xf32> to vector<6x32xf32>
    %43 = arith.maximumf %40, %42 : vector<6x32xf32>
    %44 = vector.extract_strided_slice %35 {offsets = [0, 0], sizes = [3, 32], strides = [1, 1]} : vector<6x32xf32> to vector<3x32xf32>
    %cst_7 = arith.constant dense<0xFF800000> : vector<32xf32>
    %45 = vector.multi_reduction <maximumf>, %44, %cst_7 [0] : vector<3x32xf32> to vector<32xf32>
    %46 = vector.shape_cast %45 : vector<32xf32> to vector<1x32xf32>
    %47 = vector.extract_strided_slice %35 {offsets = [3, 0], sizes = [3, 32], strides = [1, 1]} : vector<6x32xf32> to vector<3x32xf32>
    %cst_8 = arith.constant dense<0xFF800000> : vector<32xf32>
    %48 = vector.multi_reduction <maximumf>, %47, %cst_8 [0] : vector<3x32xf32> to vector<32xf32>
    %49 = vector.shape_cast %48 : vector<32xf32> to vector<1x32xf32>
    %50 = vector.extract_strided_slice %43 {offsets = [0, 0], sizes = [3, 32], strides = [1, 1]} : vector<6x32xf32> to vector<3x32xf32>
    %cst_9 = arith.constant dense<0xFF800000> : vector<32xf32>
    %51 = vector.multi_reduction <maximumf>, %50, %cst_9 [0] : vector<3x32xf32> to vector<32xf32>
    %52 = vector.shape_cast %51 : vector<32xf32> to vector<1x32xf32>
    %53 = vector.extract_strided_slice %43 {offsets = [3, 0], sizes = [3, 32], strides = [1, 1]} : vector<6x32xf32> to vector<3x32xf32>
    %cst_10 = arith.constant dense<0xFF800000> : vector<32xf32>
    %54 = vector.multi_reduction <maximumf>, %53, %cst_10 [0] : vector<3x32xf32> to vector<32xf32>
    %55 = vector.shape_cast %54 : vector<32xf32> to vector<1x32xf32>
    %cst_11 = arith.constant 0.000000e+00 : f32
    %56 = vector.broadcast %cst_11 : f32 to vector<12x12x86xf32>
    %c0_12 = arith.constant 0 : index
    %c0_13 = arith.constant 0 : index
    %c0_14 = arith.constant 0 : index
    %57 = vector.load %arg8[%c0_12, %c0_13, %c0_14] : memref<12x12x86xf32, #tpu.memory_space<vmem>>, vector<12x12x86xf32>
    tpu.vector_store %arg8[%c0_12, %c0_13, %c0_14], %56 {strides = array<i32>} : memref<12x12x86xf32, #tpu.memory_space<vmem>>, vector<12x12x86xf32>,
    %cst_15 = arith.constant 0.000000e+00 : f32
    %58 = vector.broadcast %cst_15 : f32 to vector<12x12x32xf32>
    %c0_16 = arith.constant 0 : index
    %c0_17 = arith.constant 0 : index
    %c0_18 = arith.constant 0 : index
    %59 = vector.load %arg9[%c0_16, %c0_17, %c0_18] : memref<12x12x32xf32, #tpu.memory_space<vmem>>, vector<12x12x32xf32>
    tpu.vector_store %arg9[%c0_16, %c0_17, %c0_18], %58 {strides = array<i32>} : memref<12x12x32xf32, #tpu.memory_space<vmem>>, vector<12x12x32xf32>,
    %c1 = arith.constant 1 : index
    %c1_19 = arith.constant 1 : index
    %c0_20 = arith.constant 0 : index
    %60 = vector.load %arg8[%c1, %c1_19, %c0_20] : memref<12x12x86xf32, #tpu.memory_space<vmem>>, vector<10x10x86xf32>
    tpu.vector_store %arg8[%c1, %c1_19, %c0_20], %1 {strides = array<i32>} : memref<12x12x86xf32, #tpu.memory_space<vmem>>, vector<10x10x86xf32>,
    %61 = vector.shape_cast %46 : vector<1x32xf32> to vector<1x1x32xf32>
    %62 = vector.shape_cast %61 : vector<1x1x32xf32> to vector<1x1x32xf32>
    %63 = vector.broadcast %62 : vector<1x1x32xf32> to vector<5x5x32xf32>
    %c1_21 = arith.constant 1 : index
    %c1_22 = arith.constant 1 : index
    %c0_23 = arith.constant 0 : index
    %64 = vector.load %arg9[%c1_21, %c1_22, %c0_23] : memref<12x12x32xf32, #tpu.memory_space<vmem>>, vector<5x5x32xf32>
    tpu.vector_store %arg9[%c1_21, %c1_22, %c0_23], %63 {strides = array<i32>} : memref<12x12x32xf32, #tpu.memory_space<vmem>>, vector<5x5x32xf32>,
    %65 = vector.shape_cast %49 : vector<1x32xf32> to vector<1x1x32xf32>
    %66 = vector.shape_cast %65 : vector<1x1x32xf32> to vector<1x1x32xf32>
    %67 = vector.broadcast %66 : vector<1x1x32xf32> to vector<5x5x32xf32>
    %c1_24 = arith.constant 1 : index
    %c6 = arith.constant 6 : index
    %c0_25 = arith.constant 0 : index
    %68 = vector.load %arg9[%c1_24, %c6, %c0_25] : memref<12x12x32xf32, #tpu.memory_space<vmem>>, vector<5x5x32xf32>
    tpu.vector_store %arg9[%c1_24, %c6, %c0_25], %67 {strides = array<i32>} : memref<12x12x32xf32, #tpu.memory_space<vmem>>, vector<5x5x32xf32>,
    %69 = vector.shape_cast %52 : vector<1x32xf32> to vector<1x1x32xf32>
    %70 = vector.shape_cast %69 : vector<1x1x32xf32> to vector<1x1x32xf32>
    %71 = vector.broadcast %70 : vector<1x1x32xf32> to vector<5x5x32xf32>
    %c6_26 = arith.constant 6 : index
    %c1_27 = arith.constant 1 : index
    %c0_28 = arith.constant 0 : index
    %72 = vector.load %arg9[%c6_26, %c1_27, %c0_28] : memref<12x12x32xf32, #tpu.memory_space<vmem>>, vector<5x5x32xf32>
    tpu.vector_store %arg9[%c6_26, %c1_27, %c0_28], %71 {strides = array<i32>} : memref<12x12x32xf32, #tpu.memory_space<vmem>>, vector<5x5x32xf32>,
    %73 = vector.shape_cast %55 : vector<1x32xf32> to vector<1x1x32xf32>
    %74 = vector.shape_cast %73 : vector<1x1x32xf32> to vector<1x1x32xf32>
    %75 = vector.broadcast %74 : vector<1x1x32xf32> to vector<5x5x32xf32>
    %c6_29 = arith.constant 6 : index
    %c6_30 = arith.constant 6 : index
    %c0_31 = arith.constant 0 : index
    %76 = vector.load %arg9[%c6_29, %c6_30, %c0_31] : memref<12x12x32xf32, #tpu.memory_space<vmem>>, vector<5x5x32xf32>
    tpu.vector_store %arg9[%c6_29, %c6_30, %c0_31], %75 {strides = array<i32>} : memref<12x12x32xf32, #tpu.memory_space<vmem>>, vector<5x5x32xf32>,
    %c0_32 = arith.constant 0 : index
    %c0_33 = arith.constant 0 : index
    %c0_34 = arith.constant 0 : index
    %77 = vector.load %arg8[%c0_32, %c0_33, %c0_34] : memref<12x12x86xf32, #tpu.memory_space<vmem>>, vector<12x12x86xf32>
    %78 = vector.shape_cast %77 : vector<12x12x86xf32> to vector<144x86xf32>
    %c0_35 = arith.constant 0 : index
    %c0_36 = arith.constant 0 : index
    %79 = vector.load %arg4[%c0_35, %c0_36] : memref<86x1152xf32, #tpu.memory_space<vmem>>, vector<86x1152xf32>
    %cst_37 = arith.constant dense<0.000000e+00> : vector<144x1152xf32>
    %80 = tpu.matmul %78, %79, %cst_37 {dimension_numbers = #tpu.dot_dimension_numbers<[1], [0], [0], [1], [0, 0, 1, 1], [], []>} : vector<144x86xf32>, vector<86x1152xf32>, vector<144x1152xf32> -> vector<144x1152xf32>
    %c0_38 = arith.constant 0 : index
    %c0_39 = arith.constant 0 : index
    %c0_40 = arith.constant 0 : index
    %81 = vector.load %arg9[%c0_38, %c0_39, %c0_40] : memref<12x12x32xf32, #tpu.memory_space<vmem>>, vector<12x12x32xf32>
    %82 = vector.shape_cast %81 : vector<12x12x32xf32> to vector<144x32xf32>
    %c0_41 = arith.constant 0 : index
    %c0_42 = arith.constant 0 : index
    %83 = vector.load %arg5[%c0_41, %c0_42] : memref<32x1152xf32, #tpu.memory_space<vmem>>, vector<32x1152xf32>
    %cst_43 = arith.constant dense<0.000000e+00> : vector<144x1152xf32>
    %84 = tpu.matmul %82, %83, %cst_43 {dimension_numbers = #tpu.dot_dimension_numbers<[1], [0], [0], [1], [0, 0, 1, 1], [], []>} : vector<144x32xf32>, vector<32x1152xf32>, vector<144x1152xf32> -> vector<144x1152xf32>
    %85 = arith.addf %80, %84 : vector<144x1152xf32>
    %86 = vector.shape_cast %85 : vector<144x1152xf32> to vector<12x12x1152xf32>
    %87 = vector.extract_strided_slice %86 {offsets = [0, 0, 0], sizes = [10, 10, 128], strides = [1, 1, 1]} : vector<12x12x1152xf32> to vector<10x10x128xf32>
    %88 = vector.extract_strided_slice %86 {offsets = [0, 1, 128], sizes = [10, 10, 128], strides = [1, 1, 1]} : vector<12x12x1152xf32> to vector<10x10x128xf32>
    %89 = arith.addf %87, %88 : vector<10x10x128xf32>
    %90 = vector.extract_strided_slice %86 {offsets = [0, 2, 256], sizes = [10, 10, 128], strides = [1, 1, 1]} : vector<12x12x1152xf32> to vector<10x10x128xf32>
    %91 = arith.addf %89, %90 : vector<10x10x128xf32>
    %92 = vector.extract_strided_slice %86 {offsets = [1, 0, 384], sizes = [10, 10, 128], strides = [1, 1, 1]} : vector<12x12x1152xf32> to vector<10x10x128xf32>
    %93 = arith.addf %91, %92 : vector<10x10x128xf32>
    %94 = vector.extract_strided_slice %86 {offsets = [1, 1, 512], sizes = [10, 10, 128], strides = [1, 1, 1]} : vector<12x12x1152xf32> to vector<10x10x128xf32>
    %95 = arith.addf %93, %94 : vector<10x10x128xf32>
    %96 = vector.extract_strided_slice %86 {offsets = [1, 2, 640], sizes = [10, 10, 128], strides = [1, 1, 1]} : vector<12x12x1152xf32> to vector<10x10x128xf32>
    %97 = arith.addf %95, %96 : vector<10x10x128xf32>
    %98 = vector.extract_strided_slice %86 {offsets = [2, 0, 768], sizes = [10, 10, 128], strides = [1, 1, 1]} : vector<12x12x1152xf32> to vector<10x10x128xf32>
    %99 = arith.addf %97, %98 : vector<10x10x128xf32>
    %100 = vector.extract_strided_slice %86 {offsets = [2, 1, 896], sizes = [10, 10, 128], strides = [1, 1, 1]} : vector<12x12x1152xf32> to vector<10x10x128xf32>
    %101 = arith.addf %99, %100 : vector<10x10x128xf32>
    %102 = vector.extract_strided_slice %86 {offsets = [2, 2, 1024], sizes = [10, 10, 128], strides = [1, 1, 1]} : vector<12x12x1152xf32> to vector<10x10x128xf32>
    %103 = arith.addf %101, %102 : vector<10x10x128xf32>
    %104 = vector.extract_strided_slice %103 {offsets = [0, 0, 0], sizes = [10, 10, 64], strides = [1, 1, 1]} : vector<10x10x128xf32> to vector<10x10x64xf32>
    %c0_44 = arith.constant 0 : index
    %c0_45 = arith.constant 0 : index
    %105 = vector.load %arg6[%c0_44, %c0_45] : memref<1x64xf32, #tpu.memory_space<vmem>>, vector<1x64xf32>
    %106 = vector.shape_cast %105 : vector<1x64xf32> to vector<1x1x64xf32>
    %107 = vector.broadcast %106 : vector<1x1x64xf32> to vector<10x10x64xf32>
    %108 = arith.addf %104, %107 : vector<10x10x64xf32>
    %c0_46 = arith.constant 0 : index
    %c0_47 = arith.constant 0 : index
    %c0_48 = arith.constant 0 : index
    %c0_49 = arith.constant 0 : index
    %109 = vector.load %arg7[%c0_46, %c0_47, %c0_48, %c0_49] : memref<1x10x10x64xf32, #tpu.memory_space<vmem>>, vector<1x10x10x64xf32>
    %110 = vector.shape_cast %109 : vector<1x10x10x64xf32> to vector<10x10x64xf32>
    %111 = vector.shape_cast %108 : vector<10x10x64xf32> to vector<1x10x10x64xf32>
    tpu.vector_store %arg7[%c0_46, %c0_47, %c0_48, %c0_49], %111 {strides = array<i32>} : memref<1x10x10x64xf32, #tpu.memory_space<vmem>>, vector<1x10x10x64xf32>,
    return
  }
  func.func @transform_0(%arg0: i32) -> (i32, i32, i32, i32) {
    %c0_i32 = arith.constant 0 : i32
    %c0_i32_0 = arith.constant 0 : i32
    %c0_i32_1 = arith.constant 0 : i32
    %c0_i32_2 = arith.constant 0 : i32
    return %arg0, %c0_i32, %c0_i32_0, %c0_i32_1 : i32, i32, i32, i32
  }
  func.func @transform_1(%arg0: i32) -> (i32, i32) {
    %c0_i32 = arith.constant 0 : i32
    %c0_i32_0 = arith.constant 0 : i32
    %c0_i32_1 = arith.constant 0 : i32
    return %c0_i32, %c0_i32_0 : i32, i32
  }
  func.func @transform_2(%arg0: i32) -> (i32, i32) {
    %c0_i32 = arith.constant 0 : i32
    %c0_i32_0 = arith.constant 0 : i32
    %c0_i32_1 = arith.constant 0 : i32
    return %c0_i32, %c0_i32_0 : i32, i32
  }
  func.func @transform_3(%arg0: i32) -> (i32, i32) {
    %c0_i32 = arith.constant 0 : i32
    %c0_i32_0 = arith.constant 0 : i32
    %c0_i32_1 = arith.constant 0 : i32
    return %c0_i32, %c0_i32_0 : i32, i32
  }
  func.func @transform_4(%arg0: i32) -> (i32, i32) {
    %c0_i32 = arith.constant 0 : i32
    %c0_i32_0 = arith.constant 0 : i32
    %c0_i32_1 = arith.constant 0 : i32
    return %c0_i32, %c0_i32_0 : i32, i32
  }
  func.func @transform_5(%arg0: i32) -> (i32, i32) {
    %c0_i32 = arith.constant 0 : i32
    %c0_i32_0 = arith.constant 0 : i32
    %c0_i32_1 = arith.constant 0 : i32
    return %c0_i32, %c0_i32_0 : i32, i32
  }
  func.func @transform_6(%arg0: i32) -> (i32, i32, i32, i32) {
    %c0_i32 = arith.constant 0 : i32
    %c0_i32_0 = arith.constant 0 : i32
    %c0_i32_1 = arith.constant 0 : i32
    %c0_i32_2 = arith.constant 0 : i32
    return %arg0, %c0_i32, %c0_i32_0, %c0_i32_1 : i32, i32, i32, i32
  }
}

</mosaic_0001>

<bundles_post_ra>
// kernel: pool_and_inject.1
= control target key start
LH: loop header
LB: loop body
LE: loop exit
PB: predicated region body
PF: predicated region fallthrough
CT: control target
= control target key end

     0   :  { %s7429_s21 = smov 0   ;;  %s11876_s0 = inlined_call_operand.vmem [shape: f32[2,10,10,86], index: 0, kind: input, shape index: {}]   ;;  %s11877_s1 = inlined_call_operand.vmem [shape: f32[86,1152], index: 1, kind: input, shape index: {}]   ;;  %s11878_s2 = inlined_call_operand.vmem [shape: f32[1,32], index: 2, kind: input, shape index: {}]   ;;  %s11879_s3 = inlined_call_operand.vmem [shape: f32[86,1152], index: 3, kind: input, shape index: {}]   ;;  %s11880_s4 = inlined_call_operand.vmem [shape: f32[32,1152], index: 4, kind: input, shape index: {}]   ;;  %s11881_s5 = inlined_call_operand.vmem [shape: f32[1,64], index: 5, kind: input, shape index: {}]   ;;  %s11882_s6 = inlined_call_operand.vmem [shape: f32[2,10,10,64], index: 6, kind: output, shape index: {}]  }
   0x1 LB: > { %s6724_s22 = sadd.s32 4294967295, %s7389_s21   ;;  %p6728_p0 = scmp.ge.s32.totalorder %s7389_s21, 1  ;;  %s7389_s21 = sphi %s7429_s21, %s16_s21  }
   0x2   : > { %p212_p1 = scmp.lt.s32.totalorder %s7389_s21, 3 }
   0x4   : > { %p213_p2 = pnand %p6728_p0, %p212_p1 }
   0x6   : > { %216 = sbr.rel (%p213_p2) target bundleno = 1043 (0x413), region = 44 }
   0xb   : > { %v623_v0 = vld [vmem:[%s11877_s1 + $0x2d8] sm:$0x3f]  ;;  %vm870_vm0 = vcmask 1045504   ;;  %v625_v1 = vld [vmem:[%s11877_s1 + $0x2e8] sm:$0x3f]  ;;  %v614_v2 = vld [vmem:[%s11877_s1 + $0x290] sm:$0xff]  ;;  %v296_v9 = vlaneseq }
   0xc   : > { %6731 = vmatprep.subr.msk.mxu0 %vm870_vm0, %v623_v0  ;;  %6746 = vmatprep.subr.msk.mxu1 %vm870_vm0, %v625_v1  ;;  %v622_v3 = vld [vmem:[%s11877_s1 + $0x2d0] sm:$0x3f]  ;;  %v624_v4 = vld [vmem:[%s11877_s1 + $0x2e0] sm:$0x3f]  ;;  %v613_v6 = vld [vmem:[%s11877_s1 + $0x288] sm:$0xff]  ;;  %p7470_p3 = scmp.lt.s32.totalorder %s6724_s22, 1 }
   0xd   : > { %v616_v5 = vld [vmem:[%s11877_s1 + $0x2a0] sm:$0xff]  ;;  %6732 = vmatpush1.msk.msra.mxu0 %vm870_vm0, %v622_v3  ;;  %6747 = vmatpush1.msk.msra.mxu1 %vm870_vm0, %v624_v4  ;;  %v615_v7 = vld [vmem:[%s11877_s1 + $0x298] sm:$0xff]  ;;  %v605_v8 = vld [vmem:[%s11877_s1 + $0x248] sm:$0xff]  ;;  %v7391_v13 = vmov 1983009808   ;;  %vm843_vm1 = vcmask 703488  }
   0xe   : > { %910 = vmatprep.subr.mxu0 %v614_v2  ;;  %1045 = vmatprep.subr.mxu1 %v616_v5  ;;  %v607_v10 = vld [vmem:[%s11877_s1 + $0x258] sm:$0xff]  ;;  %v604_v11 = vld [vmem:[%s11877_s1 + $0x240] sm:$0xff]  ;;  %v606_v12 = vld [vmem:[%s11877_s1 + $0x250] sm:$0xff]  ;;  %v7483_v14 = vunpack.c.l.s4 %v7391_v13  ;;  %vm3036_vm2 = vcmask 699392   ;;  %s12535_s22 = smov (!%p7470_p3, %s6724_s22), 1  ;;  %v11883_v17 = vmov 0.0  }
   0xf   : > { %911 = vmatpush1.msra.mxu0 %v613_v6  ;;  %1046 = vmatpush1.msra.mxu1 %v615_v7  ;;  %v596_v15 = vld [vmem:[%s11877_s1 + $0x200] sm:$0xff]  ;;  %v598_v16 = vld [vmem:[%s11877_s1 + $0x210] sm:$0xff]  ;;  %3035 = vst.msk [vmem:[#allocation2] sm:$0xff] %vm843_vm1, %v11883_v17  ;;  %3038 = vst.msk [vmem:[#allocation2 + $0x10] sm:$0xff] %vm843_vm1, %v11883_v17  ;;  %s7329_s18 = smul.u32 160, %s12535_s22  ;;  %v297_v25 = vshrl.u32 %v296_v9, 7 }
  0x10   : > { %3040 = vst.msk [vmem:[#allocation2 + $0x20] sm:$0xff] %vm843_vm1, %v11883_v17  ;;  %3042 = vst.msk [vmem:[#allocation2 + $0x30] sm:$0xff] %vm843_vm1, %v11883_v17  ;;  %912 = vmatprep.subr.mxu0 %v605_v8  ;;  %1047 = vmatprep.subr.mxu1 %v607_v10  ;;  %v595_v18 = vld [vmem:[%s11877_s1 + $0x1f8] sm:$0xff]  ;;  %v597_v19 = vld [vmem:[%s11877_s1 + $0x208] sm:$0xff]  ;;  %v295_v24 = vunpack.c.0.s8 %v7483_v14  ;;  %vm3088_vm3 = vcmask 697344   ;;  %vm7393_vm4 = vmmov 0  }
  0x11   : > { %3044 = vst.msk [vmem:[#allocation2 + $0x40] sm:$0xff] %vm843_vm1, %v11883_v17  ;;  %3046 = vst.msk [vmem:[#allocation2 + $0x50] sm:$0xff] %vm843_vm1, %v11883_v17  ;;  %913 = vmatpush1.msra.mxu0 %v604_v11  ;;  %1048 = vmatpush1.msra.mxu1 %v606_v12  ;;  %v587_v20 = vld [vmem:[%s11877_s1 + $0x1b8] sm:$0xff]  ;;  %v589_v21 = vld [vmem:[%s11877_s1 + $0x1c8] sm:$0xff]  ;;  %s7594_s15 = scalar_lea.vmem %s11876_s0, %s7329_s18  ;;  %vm2393_vm5 = vcmask 1040384   ;;  %vm2394_vm6 = vcmask 1042434   ;;  %s11656_s16 = scalar_lea.vmem %s11882_s6, %s7329_s18 }
  0x12   : > { %3048 = vst.msk [vmem:[#allocation2 + $0x60] sm:$0xff] %vm843_vm1, %v11883_v17  ;;  %3050 = vst.msk [vmem:[#allocation2 + $0x70] sm:$0xff] %vm843_vm1, %v11883_v17  ;;  %914 = vmatprep.subr.mxu0 %v596_v15  ;;  %1049 = vmatprep.subr.mxu1 %v598_v16  ;;  %v586_v22 = vld [vmem:[%s11877_s1 + $0x1b0] sm:$0xff]  ;;  %v588_v23 = vld [vmem:[%s11877_s1 + $0x1c0] sm:$0xff]  ;;  %v7596_v34 = vsub.s32 %v295_v24, %v297_v25  ;;  %vm2396_vm8 = vcmask 1044484   ;;  %vm2398_vm9 = vcmask 1046534  }
  0x13   : > { %3052 = vst.msk [vmem:[#allocation2 + $0x80] sm:$0xff] %vm843_vm1, %v11883_v17  ;;  %3054 = vst.msk [vmem:[#allocation2 + $0x90] sm:$0xff] %vm843_vm1, %v11883_v17  ;;  %915 = vmatpush1.msra.mxu0 %v595_v18  ;;  %1050 = vmatpush1.msra.mxu1 %v597_v19  ;;  %v578_v26 = vld [vmem:[%s11877_s1 + $0x170] sm:$0xff]  ;;  %v580_v27 = vld [vmem:[%s11877_s1 + $0x180] sm:$0xff]  ;;  %vm3060_vm12 = vcmask 261120   ;;  %vm3062_vm13 = vcmask 257024  }
  0x14   : > { %3056 = vst.msk [vmem:[#allocation2 + $0xa0] sm:$0xff] %vm843_vm1, %v11883_v17  ;;  %3058 = vst.msk [vmem:[#allocation2 + $0xb0] sm:$0xff] %vm843_vm1, %v11883_v17  ;;  %916 = vmatprep.subr.mxu0 %v587_v20  ;;  %1051 = vmatprep.subr.mxu1 %v589_v21  ;;  %v577_v28 = vld [vmem:[%s11877_s1 + $0x168] sm:$0xff]  ;;  %v579_v29 = vld [vmem:[%s11877_s1 + $0x178] sm:$0xff]  ;;  %vm2974_vm14 = vcmask 256000   ;;  %vm2992_vm15 = vcmask 257025  }
  0x15   : > { %3039 = vst.msk [vmem:[#allocation2 + $0x18] sm:$0xf] %vm3036_vm2, %v11883_v17  ;;  %3037 = vst.msk [vmem:[#allocation2 + $0x8] sm:$0xf] %vm3036_vm2, %v11883_v17  ;;  %917 = vmatpush1.msra.mxu0 %v586_v22  ;;  %1052 = vmatpush1.msra.mxu1 %v588_v23  ;;  %v569_v30 = vld [vmem:[%s11877_s1 + $0x128] sm:$0xff]  ;;  %v571_v31 = vld [vmem:[%s11877_s1 + $0x138] sm:$0xff] }
  0x16   : > { %3041 = vst.msk [vmem:[#allocation2 + $0x28] sm:$0xf] %vm3036_vm2, %v11883_v17  ;;  %3043 = vst.msk [vmem:[#allocation2 + $0x38] sm:$0xf] %vm3036_vm2, %v11883_v17  ;;  %918 = vmatprep.subr.mxu0 %v578_v26  ;;  %1053 = vmatprep.subr.mxu1 %v580_v27  ;;  %v568_v32 = vld [vmem:[%s11877_s1 + $0x120] sm:$0xff]  ;;  %v570_v33 = vld [vmem:[%s11877_s1 + $0x130] sm:$0xff] }
  0x17   : > { %3045 = vst.msk [vmem:[#allocation2 + $0x48] sm:$0xf] %vm3036_vm2, %v11883_v17  ;;  %3047 = vst.msk [vmem:[#allocation2 + $0x58] sm:$0xf] %vm3036_vm2, %v11883_v17  ;;  %919 = vmatpush1.msra.mxu0 %v577_v28  ;;  %1054 = vmatpush1.msra.mxu1 %v579_v29  ;;  %v560_v35 = vld [vmem:[%s11877_s1 + $0xe0] sm:$0xff]  ;;  %v562_v36 = vld [vmem:[%s11877_s1 + $0xf0] sm:$0xff] }
  0x18   : > { %3049 = vst.msk [vmem:[#allocation2 + $0x68] sm:$0xf] %vm3036_vm2, %v11883_v17  ;;  %3051 = vst.msk [vmem:[#allocation2 + $0x78] sm:$0xf] %vm3036_vm2, %v11883_v17  ;;  %v559_v37 = vld [vmem:[%s11877_s1 + $0xd8] sm:$0xff]  ;;  %920 = vmatprep.subr.mxu0 %v569_v30  ;;  %1055 = vmatprep.subr.mxu1 %v571_v31  ;;  %v561_v38 = vld [vmem:[%s11877_s1 + $0xe8] sm:$0xff] }
  0x19   : > { %3053 = vst.msk [vmem:[#allocation2 + $0x88] sm:$0xf] %vm3036_vm2, %v11883_v17  ;;  %3055 = vst.msk [vmem:[#allocation2 + $0x98] sm:$0xf] %vm3036_vm2, %v11883_v17  ;;  %v551_v39 = vld [vmem:[%s11877_s1 + $0x98] sm:$0xff]  ;;  %v553_v40 = vld [vmem:[%s11877_s1 + $0xa8] sm:$0xff]  ;;  %921 = vmatpush1.msra.mxu0 %v568_v32  ;;  %1056 = vmatpush1.msra.mxu1 %v570_v33 }
  0x1a   : > { %3057 = vst.msk [vmem:[#allocation2 + $0xa8] sm:$0xf] %vm3036_vm2, %v11883_v17  ;;  %3059 = vst.msk [vmem:[#allocation2 + $0xb8] sm:$0xf] %vm3036_vm2, %v11883_v17  ;;  %v550_v41 = vld [vmem:[%s11877_s1 + $0x90] sm:$0xff]  ;;  %v552_v42 = vld [vmem:[%s11877_s1 + $0xa0] sm:$0xff]  ;;  %922 = vmatprep.subr.mxu0 %v560_v35  ;;  %1057 = vmatprep.subr.mxu1 %v562_v36 }
  0x1b   : > { %v252_v43 = vld [vmem:[%s7594_s15] sm:$0xff]  ;;  %v542_v44 = vld [vmem:[%s11877_s1 + $0x50] sm:$0xff]  ;;  %v253_v48 = vld [vmem:[%s7594_s15 + $0x8] sm:$0x3]  ;;  %923 = vmatpush1.msra.mxu0 %v559_v37  ;;  %1058 = vmatpush1.msra.mxu1 %v561_v38  ;;  %vm3109_vm2 = vcmask 258048  }
  0x1c   : > { %v544_v45 = vld [vmem:[%s11877_s1 + $0x60] sm:$0xff]  ;;  %v292_v46 = vcombine.high %v252_v43, %v252_v43  ;;  %v299_v47 = vrot.slane %v252_v43, %v7596_v34  ;;  %3087 = vst.msk [vmem:[#allocation2 + $0x11] sm:$0xff] %vm843_vm1, %v252_v43  ;;  %v541_v49 = vld [vmem:[%s11877_s1 + $0x48] sm:$0xff]  ;;  %v543_v50 = vld [vmem:[%s11877_s1 + $0x58] sm:$0xff]  ;;  %v315_v52 = vrot.slane %v253_v48, %v7596_v34  ;;  %924 = vmatprep.subr.mxu0 %v551_v39 }
  0x1d   : > { %v254_v51 = vld [vmem:[%s7594_s15 + $0x10] sm:$0xff]  ;;  %3089 = vst.msk [vmem:[#allocation2 + $0x19] sm:$0x3] %vm3088_vm3, %v253_v48  ;;  %1059 = vmatprep.subr.mxu1 %v553_v40  ;;  %v533_v53 = vld [vmem:[%s11877_s1 + $0x8] sm:$0xff]  ;;  %v255_v57 = vld [vmem:[%s7594_s15 + $0x18] sm:$0x3]  ;;  %925 = vmatpush1.msra.mxu0 %v550_v41 }
  0x1e   : > { %v306_v54 = vrot.slane %v292_v46, %v7596_v34  ;;  %v307_v55 = vcombine.high %v299_v47, %v299_v47  ;;  %v316_v56 = vcombine.high %v254_v51, %v254_v51  ;;  %3090 = vst.msk [vmem:[#allocation2 + $0x21] sm:$0xff] %vm843_vm1, %v254_v51  ;;  %v7648_v58 = vld [vmem:[%s7594_s15 + $0x20] sm:$0xff]  ;;  %1060 = vmatpush1.msra.mxu1 %v552_v42  ;;  %v535_v59 = vld [vmem:[%s11877_s1 + $0x18] sm:$0xff]  ;;  %v7661_v63 = vld [vmem:[%s7594_s15 + $0x28] sm:$0x3] }
  0x1f   : > { %v323_v60 = vrot.slane %v254_v51, %v7596_v34  ;;  %v339_v61 = vrot.slane %v255_v57, %v7596_v34  ;;  %v347_v62 = vrot.slane %v7648_v58, %v7596_v34  ;;  %3091 = vst.msk [vmem:[#allocation2 + $0x29] sm:$0x3] %vm3088_vm3, %v255_v57  ;;  %v7664_v0 = vld [vmem:[%s7594_s15 + $0x30] sm:$0xff]  ;;  %926 = vmatprep.subr.mxu0 %v542_v44  ;;  %v532_v1 = vld [vmem:[%s11877_s1] sm:$0xff]  ;;  %3093 = vst.msk [vmem:[#allocation2 + $0x39] sm:$0x3] %vm3088_vm3, %v7661_v63 }
  0x20   : > { %3092 = vst.msk [vmem:[#allocation2 + $0x31] sm:$0xff] %vm843_vm1, %v7648_v58  ;;  %1061 = vmatprep.subr.mxu1 %v544_v45  ;;  %v308_v2 = vcombine.high %v306_v54, %v306_v54  ;;  %v631_v3 = vcombine.low %v299_v47, %v307_v55  ;;  %v330_v4 = vrot.slane %v316_v56, %v7596_v34  ;;  %3094 = vst.msk [vmem:[#allocation2 + $0x41] sm:$0xff] %vm843_vm1, %v7664_v0  ;;  %v7675_v5 = vld [vmem:[%s7594_s15 + $0x38] sm:$0x3]  ;;  %v534_v6 = vld [vmem:[%s11877_s1 + $0x10] sm:$0xff] }
  0x21   : > { %927 = vmatpush1.msra.mxu0 %v541_v49  ;;  %1062 = vmatpush1.msra.mxu1 %v543_v50  ;;  %v331_v7 = vcombine.high %v323_v60, %v323_v60  ;;  %v648_v8 = vcombine.low %v315_v52, %v323_v60  ;;  %v355_v9 = vcombine.high %v347_v62, %v347_v62  ;;  %v7683_v10 = vld [vmem:[%s7594_s15 + $0x40] sm:$0xff]  ;;  %v627_v13 = vld [vmem:[%s11877_s1 + $0x2f8] sm:$0x3f]  ;;  %v7692_v15 = vld [vmem:[%s7594_s15 + $0x48] sm:$0x3] }
  0x22   : > { %3095 = vst.msk [vmem:[#allocation2 + $0x49] sm:$0x3] %vm3088_vm3, %v7675_v5  ;;  %928 = vmatprep.subr.mxu0 %v533_v53  ;;  %1063 = vmatprep.subr.mxu1 %v535_v59  ;;  %v632_v11 = vcombine.low %v306_v54, %v308_v2  ;;  %v639_v12 = vrot.slane %v631_v3, %v7596_v34  ;;  %v7695_v16 = vld [vmem:[%s7594_s15 + $0x50] sm:$0xff]  ;;  %3097 = vst.msk [vmem:[#allocation2 + $0x59] sm:$0x3] %vm3088_vm3, %v7692_v15  ;;  %v7707_v22 = vld [vmem:[%s7594_s15 + $0x60] sm:$0xff] }
  0x23   : > { %v332_v14 = vcombine.high %v330_v4, %v330_v4  ;;  %3096 = vst.msk [vmem:[#allocation2 + $0x51] sm:$0xff] %vm843_vm1, %v7683_v10  ;;  %929 = vmatpush1.msra.mxu0 %v532_v1  ;;  %962 = vmatprep.mubr.f32.mxu0 %v11883_v17  ;;  %v649_v18 = vcombine.low %v331_v7, %v330_v4  ;;  %3098 = vst.msk [vmem:[#allocation2 + $0x61] sm:$0xff] %vm843_vm1, %v7695_v16  ;;  %v7704_v21 = vld [vmem:[%s7594_s15 + $0x58] sm:$0x3]  ;;  %v629_v26 = vld [vmem:[%s11877_s1 + $0x308] sm:$0x3f] }
  0x24   : > { %v656_v19 = vrot.slane %v648_v8, %v7596_v34  ;;  %v666_v20 = vcombine.low %v347_v62, %v355_v9  ;;  %1064 = vmatpush1.msra.mxu1 %v534_v6  ;;  %1097 = vmatprep.mubr.f32.mxu1 %v11883_v17  ;;  %v646_v23 = vrot.slane %v632_v11, %v7596_v34  ;;  %v7727_v30 = vld [vmem:[%s7594_s15 + $0x68] sm:$0x3]  ;;  %v7730_v31 = vld [vmem:[%s7594_s15 + $0x70] sm:$0xff]  ;;  %v7763_v47 = vld [vmem:[%s7594_s15 + $0x78] sm:$0x3] }
  0x25   : > { %v665_v24 = vcombine.low %v332_v14, %v339_v61  ;;  %v340_v25 = vcombine.high %v7648_v58, %v7648_v58  ;;  %3099 = vst.msk [vmem:[#allocation2 + $0x69] sm:$0x3] %vm3088_vm3, %v7704_v21  ;;  %6761 = vmatprep.subr.msk.mxu0 %vm870_vm0, %v627_v13  ;;  %v663_v27 = vrot.slane %v649_v18, %v7596_v34  ;;  %v626_v33 = vld [vmem:[%s11877_s1 + $0x2f0] sm:$0x3f]  ;;  %3101 = vst.msk [vmem:[#allocation2 + $0x79] sm:$0x3] %vm3088_vm3, %v7727_v30 }
  0x26   : > { %3100 = vst.msk [vmem:[#allocation2 + $0x71] sm:$0xff] %vm843_vm1, %v7707_v22  ;;  %v363_v28 = vrot.slane %v7661_v63, %v7596_v34  ;;  %v371_v29 = vrot.slane %v7664_v0, %v7596_v34  ;;  %v7732_v32 = vcombine.low %v639_v12, %v646_v23  ;;  %v680_v35 = vrot.slane %v666_v20, %v7596_v34  ;;  %v618_v39 = vld [vmem:[%s11877_s1 + $0x2b0] sm:$0xff]  ;;  %v617_v43 = vld [vmem:[%s11877_s1 + $0x2a8] sm:$0xff]  ;;  %v7775_v53 = vld [vmem:[%s7594_s15 + $0x80] sm:$0xff] }
  0x27   : > { %v354_v36 = vrot.slane %v340_v25, %v7596_v34  ;;  %v364_v37 = vcombine.high %v7664_v0, %v7664_v0  ;;  %6776 = vmatprep.subr.msk.mxu1 %vm870_vm0, %v629_v26  ;;  %3102 = vst.msk [vmem:[#allocation2 + $0x81] sm:$0xff] %vm843_vm1, %v7730_v31  ;;  %v7746_v38 = vcombine.low %v656_v19, %v663_v27  ;;  %v609_v54 = vld [vmem:[%s11877_s1 + $0x268] sm:$0xff]  ;;  %3104 = vst.msk [vmem:[#allocation2 + $0x91] sm:$0xff] %vm843_vm1, %v7775_v53  ;;  %v608_v60 = vld [vmem:[%s11877_s1 + $0x260] sm:$0xff] }
  0x28   : > { %v673_v40 = vrot.slane %v665_v24, %v7596_v34  ;;  %v683_v41 = vcombine.low %v363_v28, %v371_v29  ;;  %v379_v42 = vcombine.high %v371_v29, %v371_v29  ;;  %6733 = vmatmul.mubr.msk.f32.vlgmr.msra.gmra.mxu0 %vm843_vm1, %v7732_v32  ;;  %6748 = vmatmul.mubr.msk.f32.vlgmr.msra.gmra.mxu1 %vm843_vm1, %v7732_v32  ;;  %v7797_v63 = vld [vmem:[%s7594_s15 + $0x88] sm:$0x3]  ;;  %v7800_v0 = vld [vmem:[%s7594_s15 + $0x90] sm:$0xff]  ;;  %v7815_v7 = vld [vmem:[%s7594_s15 + $0x98] sm:$0x3] }
  0x29   : > { %v356_v44 = vcombine.high %v354_v36, %v354_v36  ;;  %v378_v45 = vrot.slane %v364_v37, %v7596_v34  ;;  %v387_v46 = vrot.slane %v7675_v5, %v7596_v34  ;;  %6762 = vmatpush1.msk.msra.mxu0 %vm870_vm0, %v626_v33  ;;  %968 = vmatprep.mubr.f32.mxu0 %v11883_v17  ;;  %v600_v9 = vld [vmem:[%s11877_s1 + $0x220] sm:$0xff]  ;;  %v599_v14 = vld [vmem:[%s11877_s1 + $0x218] sm:$0xff]  ;;  %vm2395_vm7 = vmor %vm2393_vm5, %vm2394_vm6  ;;  %vm5513_vm5 = vcmask 1046532  }
  0x2a   : > { %v388_v48 = vcombine.high %v7683_v10, %v7683_v10  ;;  %v395_v49 = vrot.slane %v7683_v10, %v7596_v34  ;;  %3103 = vst.msk [vmem:[#allocation2 + $0x89] sm:$0x3] %vm3088_vm3, %v7763_v47  ;;  %1103 = vmatprep.mubr.f32.mxu1 %v11883_v17  ;;  %1180 = vmatprep.subr.mxu0 %v618_v39  ;;  %3105 = vst.msk [vmem:[#allocation2 + $0x99] sm:$0x3] %vm3088_vm3, %v7797_v63  ;;  %v628_v13 = vld [vmem:[%s11877_s1 + $0x300] sm:$0x3f] }
  0x2b   : > { %v682_v50 = vcombine.low %v354_v36, %v356_v44  ;;  %v380_v51 = vcombine.high %v378_v45, %v378_v45  ;;  %v699_v52 = vcombine.low %v379_v42, %v378_v45  ;;  %1181 = vmatpush1.msra.mxu0 %v617_v43  ;;  %v697_v55 = vrot.slane %v683_v41, %v7596_v34  ;;  %v591_v23 = vld [vmem:[%s11877_s1 + $0x1d8] sm:$0xff]  ;;  %v620_v27 = vld [vmem:[%s11877_s1 + $0x2c0] sm:$0xff]  ;;  %v582_v42 = vld [vmem:[%s11877_s1 + $0x190] sm:$0xff] }
  0x2c   : > { %v402_v56 = vrot.slane %v388_v48, %v7596_v34  ;;  %v403_v57 = vcombine.high %v395_v49, %v395_v49  ;;  %v412_v58 = vcombine.high %v7695_v16, %v7695_v16  ;;  %6734 = vmatmul.mubr.msk.f32.gmra.mxu0 %vm843_vm1, %v7746_v38  ;;  %6749 = vmatmul.mubr.msk.f32.gmra.mxu1 %vm843_vm1, %v7746_v38  ;;  %v610_v48 = vld [vmem:[%s11877_s1 + $0x270] sm:$0xff]  ;;  %vm2397_vm10 = vmor %vm2395_vm7, %vm2396_vm8  ;;  %vm6649_vm7 = vcmask 517120  }
  0x2d   : > { %v7790_v59 = vcombine.low %v673_v40, %v680_v35  ;;  %v690_v61 = vrot.slane %v682_v50, %v7596_v34  ;;  %v700_v62 = vcombine.low %v380_v51, %v387_v46  ;;  %974 = vmatprep.mubr.f32.mxu0 %v11883_v17  ;;  %1109 = vmatprep.mubr.f32.mxu1 %v11883_v17  ;;  %v619_v35 = vld [vmem:[%s11877_s1 + $0x2b8] sm:$0xff]  ;;  %v581_v46 = vld [vmem:[%s11877_s1 + $0x188] sm:$0xff]  ;;  %vm8258_vm11 = vmor %vm2397_vm10, %vm2398_vm9  ;;  %vm6647_vm8 = vcmask 523264  }
  0x2e   : > { %v404_v1 = vcombine.high %v402_v56, %v402_v56  ;;  %v419_v2 = vrot.slane %v7695_v16, %v7596_v34  ;;  %3106 = vst.msk [vmem:[#allocation2 + $0xa1] sm:$0xff] %vm843_vm1, %v7800_v0  ;;  %1182 = vmatprep.subr.mxu0 %v609_v54  ;;  %v707_v3 = vrot.slane %v699_v52, %v7596_v34 }
  0x2f   : > { %v716_v4 = vcombine.low %v395_v49, %v403_v57  ;;  %v411_v5 = vrot.slane %v7692_v15, %v7596_v34  ;;  %v426_v6 = vrot.slane %v412_v58, %v7596_v34  ;;  %1183 = vmatpush1.msra.mxu0 %v608_v60  ;;  %v7817_v8 = vcombine.low %v690_v61, %v697_v55  ;;  %v602_v60 = vld [vmem:[%s11877_s1 + $0x230] sm:$0xff] }
  0x30   : > { %v714_v10 = vrot.slane %v700_v62, %v7596_v34  ;;  %v717_v11 = vcombine.low %v402_v56, %v404_v1  ;;  %v435_v12 = vrot.slane %v7704_v21, %v7596_v34  ;;  %3107 = vst.msk [vmem:[#allocation2 + $0xa9] sm:$0x3] %vm3088_vm3, %v7815_v7  ;;  %6735 = vmatmul.mubr.msk.f32.gmra.mxu0 %vm843_vm1, %v7790_v59  ;;  %v573_v56 = vld [vmem:[%s11877_s1 + $0x148] sm:$0xff]  ;;  %v572_v62 = vld [vmem:[%s11877_s1 + $0x140] sm:$0xff]  ;;  %vm5686_vm3 = vcmask 1045508  }
  0x31   : > { %6750 = vmatmul.mubr.msk.f32.gmra.mxu1 %vm843_vm1, %v7790_v59  ;;  %v427_v15 = vcombine.high %v419_v2, %v419_v2  ;;  %v428_v16 = vcombine.high %v426_v6, %v426_v6  ;;  %v443_v18 = vrot.slane %v7707_v22, %v7596_v34  ;;  %980 = vmatprep.mubr.f32.mxu0 %v11883_v17  ;;  %v601_v1 = vld [vmem:[%s11877_s1 + $0x228] sm:$0xff] }
  0x32   : > { %1115 = vmatprep.mubr.f32.mxu1 %v11883_v17  ;;  %1184 = vmatprep.subr.mxu0 %v600_v9  ;;  %v436_v20 = vcombine.high %v7707_v22, %v7707_v22  ;;  %v7844_v21 = vcombine.low %v707_v3, %v714_v10  ;;  %v724_v24 = vrot.slane %v716_v4, %v7596_v34  ;;  %v590_v22 = vld [vmem:[%s11877_s1 + $0x1d0] sm:$0xff]  ;;  %v593_v10 = vld [vmem:[%s11877_s1 + $0x1e8] sm:$0xff] }
  0x33   : > { %v451_v19 = vcombine.high %v443_v18, %v443_v18  ;;  %6777 = vmatpush1.msk.msra.mxu1 %vm870_vm0, %v628_v13  ;;  %1185 = vmatpush1.msra.mxu0 %v599_v14  ;;  %v731_v25 = vrot.slane %v717_v11, %v7596_v34  ;;  %v733_v26 = vcombine.low %v411_v5, %v419_v2  ;;  %v592_v13 = vld [vmem:[%s11877_s1 + $0x1e0] sm:$0xff] }
  0x34   : > { %6736 = vmatmul.mubr.msk.f32.gmra.mxu0 %vm843_vm1, %v7817_v8  ;;  %v734_v28 = vcombine.low %v427_v15, %v426_v6  ;;  %v750_v29 = vcombine.low %v428_v16, %v435_v12  ;;  %v450_v33 = vrot.slane %v436_v20, %v7596_v34  ;;  %v459_v36 = vrot.slane %v7727_v30, %v7596_v34  ;;  %v611_v30 = vld [vmem:[%s11877_s1 + $0x278] sm:$0xff]  ;;  %v564_v6 = vld [vmem:[%s11877_s1 + $0x100] sm:$0xff] }
  0x35   : > { %6751 = vmatmul.mubr.msk.f32.gmra.mxu1 %vm843_vm1, %v7817_v8  ;;  %986 = vmatprep.mubr.f32.mxu0 %v11883_v17  ;;  %v467_v37 = vrot.slane %v7730_v31, %v7596_v34  ;;  %v460_v39 = vcombine.high %v7730_v31, %v7730_v31  ;;  %v751_v40 = vcombine.low %v443_v18, %v451_v19  ;;  %v563_v12 = vld [vmem:[%s11877_s1 + $0xf8] sm:$0xff] }
  0x36   : > { %1121 = vmatprep.mubr.f32.mxu1 %v11883_v17  ;;  %1186 = vmatprep.subr.mxu0 %v591_v23  ;;  %v741_v41 = vrot.slane %v733_v26, %v7596_v34  ;;  %v452_v43 = vcombine.high %v450_v33, %v450_v33  ;;  %v7885_v31 = vcombine.low %v724_v24, %v731_v25  ;;  %v584_v25 = vld [vmem:[%s11877_s1 + $0x1a0] sm:$0xff] }
  0x37   : > { %1315 = vmatprep.subr.mxu1 %v620_v27  ;;  %1187 = vmatpush1.msra.mxu0 %v590_v22  ;;  %v474_v44 = vrot.slane %v460_v39, %v7596_v34  ;;  %v748_v45 = vrot.slane %v734_v28, %v7596_v34  ;;  %v484_v49 = vcombine.high %v7775_v53, %v7775_v53  ;;  %v583_v27 = vld [vmem:[%s11877_s1 + $0x198] sm:$0xff]  ;;  %v574_v39 = vld [vmem:[%s11877_s1 + $0x150] sm:$0xff] }
  0x38   : > { %1316 = vmatpush1.msra.mxu1 %v619_v35  ;;  %6737 = vmatmul.mubr.msk.f32.gmra.mxu0 %vm843_vm1, %v7844_v21  ;;  %v758_v50 = vrot.slane %v750_v29, %v7596_v34  ;;  %v768_v51 = vcombine.low %v459_v36, %v467_v37  ;;  %v765_v52 = vrot.slane %v751_v40, %v7596_v34  ;;  %v575_v35 = vld [vmem:[%s11877_s1 + $0x158] sm:$0xff]  ;;  %v546_v36 = vld [vmem:[%s11877_s1 + $0x70] sm:$0xff] }
  0x39   : > { %6752 = vmatmul.mubr.msk.f32.gmra.mxu1 %vm843_vm1, %v7844_v21  ;;  %992 = vmatprep.mubr.f32.mxu0 %v11883_v17  ;;  %v475_v54 = vcombine.high %v467_v37, %v467_v37  ;;  %v483_v55 = vrot.slane %v7763_v47, %v7596_v34  ;;  %v767_v57 = vcombine.low %v450_v33, %v452_v43  ;;  %v566_v43 = vld [vmem:[%s11877_s1 + $0x110] sm:$0xff] }
  0x3a   : > { %1127 = vmatprep.mubr.f32.mxu1 %v11883_v17  ;;  %1188 = vmatprep.subr.mxu0 %v582_v42  ;;  %v476_v58 = vcombine.high %v474_v44, %v474_v44  ;;  %v491_v61 = vrot.slane %v7775_v53, %v7596_v34  ;;  %v7914_v47 = vcombine.low %v741_v41, %v748_v45  ;;  %v545_v42 = vld [vmem:[%s11877_s1 + $0x68] sm:$0xff] }
  0x3b   : > { %1317 = vmatprep.subr.mxu1 %v611_v30  ;;  %1189 = vmatpush1.msra.mxu0 %v581_v46  ;;  %v498_v2 = vrot.slane %v484_v49, %v7596_v34  ;;  %v7925_v53 = vcombine.low %v758_v50, %v765_v52  ;;  %v782_v3 = vrot.slane %v768_v51, %v7596_v34  ;;  %v537_v45 = vld [vmem:[%s11877_s1 + $0x28] sm:$0xff]  ;;  %v536_v50 = vld [vmem:[%s11877_s1 + $0x20] sm:$0xff] }
  0x3c   : > { %1318 = vmatpush1.msra.mxu1 %v610_v48  ;;  %6738 = vmatmul.mubr.msk.f32.gmra.mxu0 %vm843_vm1, %v7885_v31  ;;  %v784_v4 = vcombine.low %v475_v54, %v474_v44  ;;  %v775_v5 = vrot.slane %v767_v57, %v7596_v34  ;;  %v785_v9 = vcombine.low %v476_v58, %v483_v55  ;;  %v557_v51 = vld [vmem:[%s11877_s1 + $0xc8] sm:$0xff]  ;;  %v556_v54 = vld [vmem:[%s11877_s1 + $0xc0] sm:$0xff]  ;;  %v547_v58 = vld [vmem:[%s11877_s1 + $0x78] sm:$0xff] }
  0x3d   : > { %6753 = vmatmul.mubr.msk.f32.gmra.mxu1 %vm843_vm1, %v7885_v31  ;;  %998 = vmatprep.mubr.f32.mxu0 %v11883_v17  ;;  %v499_v11 = vcombine.high %v491_v61, %v491_v61  ;;  %v500_v14 = vcombine.high %v498_v2, %v498_v2  ;;  %v508_v15 = vcombine.high %v7800_v0, %v7800_v0 }
  0x3e   : > { %1133 = vmatprep.mubr.f32.mxu1 %v11883_v17  ;;  %1190 = vmatprep.subr.mxu0 %v573_v56  ;;  %v515_v16 = vrot.slane %v7800_v0, %v7596_v34  ;;  %v792_v18 = vrot.slane %v784_v4, %v7596_v34  ;;  %v507_v19 = vrot.slane %v7797_v63, %v7596_v34  ;;  %v555_v0 = vld [vmem:[%s11877_s1 + $0xb8] sm:$0xff]  ;;  %v554_v63 = vld [vmem:[%s11877_s1 + $0xb0] sm:$0xff]  ;;  %v548_v56 = vld [vmem:[%s11877_s1 + $0x80] sm:$0xff] }
  0x3f   : > { %1319 = vmatprep.subr.mxu1 %v602_v60  ;;  %1191 = vmatpush1.msra.mxu0 %v572_v62  ;;  %v7954_v20 = vcombine.low %v775_v5, %v782_v3  ;;  %v799_v23 = vrot.slane %v785_v9, %v7596_v34  ;;  %v801_v24 = vcombine.low %v491_v61, %v499_v11  ;;  %v539_v60 = vld [vmem:[%s11877_s1 + $0x38] sm:$0xff]  ;;  %v538_v61 = vld [vmem:[%s11877_s1 + $0x30] sm:$0xff]  ;;  %v585_v5 = vld [vmem:[%s11877_s1 + $0x1a8] sm:$0xff] }
  0x40   : > { %1320 = vmatpush1.msra.mxu1 %v601_v1  ;;  %6739 = vmatmul.mubr.msk.f32.gmra.mxu0 %vm843_vm1, %v7914_v47  ;;  %v802_v26 = vcombine.low %v498_v2, %v500_v14  ;;  %v522_v22 = vrot.slane %v508_v15, %v7596_v34  ;;  %v523_v28 = vcombine.high %v515_v16, %v515_v16  ;;  %v630_v62 = vld [vmem:[%s11877_s1 + $0x310] sm:$0x3f]  ;;  %v621_v1 = vld [vmem:[%s11877_s1 + $0x2c8] sm:$0xff]  ;;  %v612_v2 = vld [vmem:[%s11877_s1 + $0x280] sm:$0xff] }
  0x41   : > { %6754 = vmatmul.mubr.msk.f32.gmra.mxu1 %vm843_vm1, %v7914_v47  ;;  %1004 = vmatprep.mubr.f32.mxu0 %v11883_v17  ;;  %v7976_v29 = vcombine.low %v792_v18, %v799_v23  ;;  %v809_v33 = vrot.slane %v801_v24, %v7596_v34  ;;  %v818_v40 = vcombine.low %v507_v19, %v515_v16  ;;  %v603_v3 = vld [vmem:[%s11877_s1 + $0x238] sm:$0xff]  ;;  %v594_v4 = vld [vmem:[%s11877_s1 + $0x1f0] sm:$0xff]  ;;  %v549_v11 = vld [vmem:[%s11877_s1 + $0x88] sm:$0xff] }
  0x42   : > { %1139 = vmatprep.mubr.f32.mxu1 %v11883_v17  ;;  %1192 = vmatprep.subr.mxu0 %v564_v6  ;;  %v816_v37 = vrot.slane %v802_v26, %v7596_v34  ;;  %v819_v41 = vcombine.low %v523_v28, %v522_v22  ;;  %v524_v30 = vcombine.high %v522_v22, %v522_v22  ;;  %v576_v6 = vld [vmem:[%s11877_s1 + $0x160] sm:$0xff]  ;;  %v567_v9 = vld [vmem:[%s11877_s1 + $0x118] sm:$0xff] }
  0x43   : > { %1321 = vmatprep.subr.mxu1 %v593_v10  ;;  %1193 = vmatpush1.msra.mxu0 %v563_v12  ;;  %v531_v44 = vrot.slane %v7815_v7, %v7596_v34  ;;  %v826_v48 = vrot.slane %v818_v40, %v7596_v34  ;;  %v565_v7 = vld [vmem:[%s11877_s1 + $0x108] sm:$0xff]  ;;  %v558_v10 = vld [vmem:[%s11877_s1 + $0xd0] sm:$0xff]  ;;  %v540_v12 = vld [vmem:[%s11877_s1 + $0x40] sm:$0xff] }
  0x44   : > { %1322 = vmatpush1.msra.mxu1 %v592_v13  ;;  %6740 = vmatmul.mubr.msk.f32.gmra.mxu0 %vm843_vm1, %v7925_v53  ;;  %v8010_v46 = vcombine.low %v809_v33, %v816_v37  ;;  %v833_v49 = vrot.slane %v819_v41, %v7596_v34  ;;  %v8247_v15 = vld [vmem:[%s11878_s2] ss:$0 sm:$0xff] }
  0x45   : > { %6755 = vmatmul.mubr.msk.f32.gmra.mxu1 %vm843_vm1, %v7925_v53  ;;  %1010 = vmatprep.mubr.f32.mxu0 %v11883_v17  ;;  %v835_v55 = vcombine.low %v524_v30, %v531_v44  ;;  %v2914_v30 = vcombine.high %v8247_v15, %v8247_v15 }
  0x46   : > { %1145 = vmatprep.mubr.f32.mxu1 %v11883_v17  ;;  %1194 = vmatprep.subr.mxu0 %v555_v0  ;;  %v8029_v52 = vcombine.low %v826_v48, %v833_v49 }
  0x47   : > { %1323 = vmatprep.subr.mxu1 %v584_v25  ;;  %1195 = vmatpush1.msra.mxu0 %v554_v63  ;;  %v8045_v57 = vrot.slane %v835_v55, %v7596_v34  ;;  %v8255_v63 = vrot.slane %v8247_v15, %v7596_v34 }
  0x48   : > { %1324 = vmatpush1.msra.mxu1 %v583_v27  ;;  %6741 = vmatmul.mubr.msk.f32.gmra.mxu0 %vm843_vm1, %v7954_v20 }
  0x49   : > { %6756 = vmatmul.mubr.msk.f32.gmra.mxu1 %vm843_vm1, %v7954_v20  ;;  %1016 = vmatprep.mubr.f32.mxu0 %v11883_v17  ;;  %11958 = vst [vmem:[#allocation4_spill] sm:$0xff] %v8255_v63 }
  0x4a   : > { %1151 = vmatprep.mubr.f32.mxu1 %v11883_v17  ;;  %1325 = vmatprep.subr.mxu1 %v575_v35 }
  0x4b   : > { %1196 = vmatprep.subr.mxu0 %v546_v36  ;;  %1326 = vmatpush1.msra.mxu1 %v574_v39 }
  0x4c   : > { %1197 = vmatpush1.msra.mxu0 %v545_v42  ;;  %1327 = vmatprep.subr.mxu1 %v566_v43 }
  0x4d   : > { %6742 = vmatmul.mubr.msk.f32.gmra.mxu0 %vm843_vm1, %v7976_v29  ;;  %6757 = vmatmul.mubr.msk.f32.gmra.mxu1 %vm843_vm1, %v7976_v29 }
  0x4e   : > { %1020 = vmatprep.mubr.f32.mxu0 %v11883_v17  ;;  %1155 = vmatprep.mubr.f32.mxu1 %v11883_v17 }
  0x4f   : > { %1198 = vmatprep.subr.mxu0 %v537_v45  ;;  %1328 = vmatpush1.msra.mxu1 %v565_v7  ;;  %v8267_v7 = vcombine.high %v8255_v63, %v8255_v63 }
  0x50   : > { %1199 = vmatpush1.msra.mxu0 %v536_v50  ;;  %1329 = vmatprep.subr.mxu1 %v557_v51 }
  0x51   : > { %6743 = vmatmul.mubr.msk.f32.gmra.mxu0 %vm843_vm1, %v8010_v46  ;;  %6758 = vmatmul.mubr.msk.f32.gmra.mxu1 %vm843_vm1, %v8010_v46  ;;  %11961 = vst [vmem:[#allocation5_spill] sm:$0xff] %v8267_v7 }
  0x52   : > { %1024 = vmatprep.mubr.f32.mxu0 %v11883_v17  ;;  %1159 = vmatprep.mubr.f32.mxu1 %v11883_v17 }
  0x53   : > { %7176 = vmatprep.subr.mxu0 %v11883_v17  ;;  %1330 = vmatpush1.msra.mxu1 %v556_v54 }
  0x54   : > { %1331 = vmatprep.subr.mxu1 %v548_v56 }
  0x55   : > { %6744 = vmatmul.mubr.msk.f32.gmra.mxu0 %vm843_vm1, %v8029_v52  ;;  %6759 = vmatmul.mubr.msk.f32.gmra.mxu1 %vm843_vm1, %v8029_v52 }
  0x56   : > { %1028 = vmatprep.mubr.f32.mxu0 %v11883_v17  ;;  %1163 = vmatprep.mubr.f32.mxu1 %v11883_v17 }
  0x57   : > { %1332 = vmatpush1.msra.mxu1 %v547_v58 }
  0x58   : > { %1333 = vmatprep.subr.mxu1 %v539_v60 }
  0x59   : > { %6745 = vmatmul.mubr.msk.f32.gmra.mxu0 %vm843_vm1, %v8045_v57  ;;  %6760 = vmatmul.mubr.msk.f32.gmra.mxu1 %vm843_vm1, %v8045_v57 }
  0x5a   : > { %1232 = vmatprep.mubr.f32.mxu0 %v11883_v17  ;;  %1334 = vmatpush1.msra.mxu1 %v538_v61 }
  0x5b   : > { %1367 = vmatprep.mubr.f32.mxu1 %v11883_v17 }
  0x5d   : > { %6763 = vmatmul.mubr.msk.f32.vlgmr.msra.gmra.mxu0 %vm843_vm1, %v7732_v32  ;;  %6778 = vmatmul.mubr.msk.f32.vlgmr.msra.gmra.mxu1 %vm843_vm1, %v7732_v32 }
  0x5e   : > { %7177 = vmatpush3.msk.msra.mxu0 %vm870_vm0, %v630_v62  ;;  %1236 = vmatprep.mubr.f32.mxu0 %v11883_v17 }
  0x5f   : > { %1371 = vmatprep.mubr.f32.mxu1 %v11883_v17  ;;  %7178 = vmatprep.subr.mxu0 %v11883_v17 }
  0x60   : > { %7179 = vmatpush3.msra.mxu0 %v621_v1 }
  0x61   : > { %6764 = vmatmul.mubr.msk.f32.gmra.mxu0 %vm843_vm1, %v7746_v38  ;;  %6779 = vmatmul.mubr.msk.f32.gmra.mxu1 %vm843_vm1, %v7746_v38 }
  0x62   : > { %1242 = vmatprep.mubr.f32.mxu0 %v11883_v17  ;;  %1377 = vmatprep.mubr.f32.mxu1 %v11883_v17 }
  0x63   : > { %7180 = vmatprep.subr.mxu0 %v11883_v17 }
  0x64   : > { %7181 = vmatpush3.msra.mxu0 %v612_v2 }
  0x65   : > { %6765 = vmatmul.mubr.msk.f32.gmra.mxu0 %vm843_vm1, %v7790_v59  ;;  %6780 = vmatmul.mubr.msk.f32.gmra.mxu1 %vm843_vm1, %v7790_v59 }
  0x66   : > { %1248 = vmatprep.mubr.f32.mxu0 %v11883_v17  ;;  %1383 = vmatprep.mubr.f32.mxu1 %v11883_v17 }
  0x67   : > { %7182 = vmatprep.subr.mxu0 %v11883_v17 }
  0x68   : > { %7183 = vmatpush3.msra.mxu0 %v603_v3 }
  0x69   : > { %6766 = vmatmul.mubr.msk.f32.gmra.mxu0 %vm843_vm1, %v7817_v8  ;;  %6781 = vmatmul.mubr.msk.f32.gmra.mxu1 %vm843_vm1, %v7817_v8 }
  0x6a   : > { %1254 = vmatprep.mubr.f32.mxu0 %v11883_v17  ;;  %1389 = vmatprep.mubr.f32.mxu1 %v11883_v17 }
  0x6b   : > { %7184 = vmatprep.subr.mxu0 %v11883_v17 }
  0x6c   : > { %7185 = vmatpush3.msra.mxu0 %v594_v4 }
  0x6d   : > { %6767 = vmatmul.mubr.msk.f32.gmra.mxu0 %vm843_vm1, %v7844_v21  ;;  %6782 = vmatmul.mubr.msk.f32.gmra.mxu1 %vm843_vm1, %v7844_v21 }
  0x6e   : > { %1260 = vmatprep.mubr.f32.mxu0 %v11883_v17  ;;  %1395 = vmatprep.mubr.f32.mxu1 %v11883_v17 }
  0x6f   : > { %7186 = vmatprep.subr.mxu0 %v11883_v17 }
  0x70   : > { %7187 = vmatpush3.msra.mxu0 %v585_v5 }
  0x71   : > { %6768 = vmatmul.mubr.msk.f32.gmra.mxu0 %vm843_vm1, %v7885_v31  ;;  %6783 = vmatmul.mubr.msk.f32.gmra.mxu1 %vm843_vm1, %v7885_v31 }
  0x72   : > { %1266 = vmatprep.mubr.f32.mxu0 %v11883_v17  ;;  %1401 = vmatprep.mubr.f32.mxu1 %v11883_v17 }
  0x73   : > { %7188 = vmatprep.subr.mxu0 %v11883_v17 }
  0x74   : > { %7189 = vmatpush3.msra.mxu0 %v576_v6 }
  0x75   : > { %6769 = vmatmul.mubr.msk.f32.gmra.mxu0 %vm843_vm1, %v7914_v47  ;;  %6784 = vmatmul.mubr.msk.f32.gmra.mxu1 %vm843_vm1, %v7914_v47 }
  0x76   : > { %1272 = vmatprep.mubr.f32.mxu0 %v11883_v17  ;;  %1407 = vmatprep.mubr.f32.mxu1 %v11883_v17 }
  0x77   : > { %7190 = vmatprep.subr.mxu0 %v11883_v17 }
  0x78   : > { %7191 = vmatpush3.msra.mxu0 %v567_v9 }
  0x79   : > { %6770 = vmatmul.mubr.msk.f32.gmra.mxu0 %vm843_vm1, %v7925_v53  ;;  %6785 = vmatmul.mubr.msk.f32.gmra.mxu1 %vm843_vm1, %v7925_v53 }
  0x7a   : > { %1278 = vmatprep.mubr.f32.mxu0 %v11883_v17  ;;  %1413 = vmatprep.mubr.f32.mxu1 %v11883_v17 }
  0x7b   : > { %7192 = vmatprep.subr.mxu0 %v11883_v17 }
  0x7c   : > { %7193 = vmatpush3.msra.mxu0 %v558_v10 }
  0x7d   : > { %6771 = vmatmul.mubr.msk.f32.gmra.mxu0 %vm843_vm1, %v7954_v20  ;;  %6786 = vmatmul.mubr.msk.f32.gmra.mxu1 %vm843_vm1, %v7954_v20 }
  0x7e   : > { %1284 = vmatprep.mubr.f32.mxu0 %v11883_v17  ;;  %1419 = vmatprep.mubr.f32.mxu1 %v11883_v17 }
  0x7f   : > { %7194 = vmatprep.subr.mxu0 %v11883_v17 }
  0x80   : > { %7195 = vmatpush3.msra.mxu0 %v549_v11 }
  0x81   : > { %6772 = vmatmul.mubr.msk.f32.gmra.mxu0 %vm843_vm1, %v7976_v29  ;;  %6787 = vmatmul.mubr.msk.f32.gmra.mxu1 %vm843_vm1, %v7976_v29 }
  0x82   : > { %1290 = vmatprep.mubr.f32.mxu0 %v11883_v17  ;;  %7196 = vmatprep.subr.mxu0 %v11883_v17 }
  0x83   : > { %7197 = vmatpush3.msra.mxu0 %v540_v12  ;;  %1425 = vmatprep.mubr.f32.mxu1 %v11883_v17 }
  0x85   : > { %6773 = vmatmul.mubr.msk.f32.gmra.mxu0 %vm843_vm1, %v8010_v46  ;;  %6788 = vmatmul.mubr.msk.f32.gmra.mxu1 %vm843_vm1, %v8010_v46 }
  0x86   : > { %1294 = vmatprep.mubr.f32.mxu0 %v11883_v17  ;;  %1429 = vmatprep.mubr.f32.mxu1 %v11883_v17 }
  0x89   : > { %6774 = vmatmul.mubr.msk.f32.gmra.mxu0 %vm843_vm1, %v8029_v52  ;;  %6789 = vmatmul.mubr.msk.f32.gmra.mxu1 %vm843_vm1, %v8029_v52 }
  0x8a   : > { %1298 = vmatprep.mubr.f32.mxu0 %v11883_v17  ;;  %1433 = vmatprep.mubr.f32.mxu1 %v11883_v17 }
  0x8d   : > { %6775 = vmatmul.mubr.msk.f32.gmra.mxu0 %vm843_vm1, %v8045_v57  ;;  %6790 = vmatmul.mubr.msk.f32.gmra.mxu1 %vm843_vm1, %v8045_v57 }
  0x8e   : > { %7198 = vmatprep.mubr.msk.f32.mxu0 %vm7393_vm4, %v11883_v17  ;;  %3516 = vmatprep.mubr.f32.mxu1 %v11883_v17 }
  0x91   : > { %7199 = vmatmul.mubr.msk.f32.vlgmr.msra.gmra.mxu0 %vm843_vm1, %v7732_v32  ;;  %v3378_v32 = vld [vmem:[%s11880_s4 + $0xe0] sm:$0xff] }
  0x92   : > { %7201 = vmatprep.mubr.msk.f32.mxu0 %vm7393_vm4, %v11883_v17  ;;  %7321 = vmatprep.subr.mxu1 %v3378_v32 }
  0x93   : > { %3464 = vmatprep.subr.mxu0 %v3378_v32 }
  0x95   : > { %7202 = vmatmul.mubr.msk.f32.gmra.mxu0 %vm843_vm1, %v7746_v38  ;;  %v3377_v38 = vld [vmem:[%s11880_s4 + $0xd8] sm:$0xff] }
  0x96   : > { %7204 = vmatprep.mubr.msk.f32.mxu0 %vm7393_vm4, %v11883_v17  ;;  %7325 = vmatpush1.msra.mxu1 %v3377_v38 }
  0x97   : > { %3465 = vmatpush1.msra.mxu0 %v3377_v38 }
  0x99   : > { %7205 = vmatmul.mubr.msk.f32.gmra.mxu0 %vm843_vm1, %v7790_v59 }
  0x9a   : > { %7207 = vmatprep.mubr.msk.f32.mxu0 %vm7393_vm4, %v11883_v17 }
  0x9d   : > { %7208 = vmatmul.mubr.msk.f32.gmra.mxu0 %vm843_vm1, %v7817_v8 }
  0x9e   : > { %7210 = vmatprep.mubr.msk.f32.mxu0 %vm7393_vm4, %v11883_v17 }
  0xa1   : > { %7211 = vmatmul.mubr.msk.f32.gmra.mxu0 %vm843_vm1, %v7844_v21 }
  0xa2   : > { %7213 = vmatprep.mubr.msk.f32.mxu0 %vm7393_vm4, %v11883_v17 }
  0xa5   : > { %7214 = vmatmul.mubr.msk.f32.gmra.mxu0 %vm843_vm1, %v7885_v31 }
  0xa6   : > { %7216 = vmatprep.mubr.msk.f32.mxu0 %vm7393_vm4, %v11883_v17 }
  0xa9   : > { %7217 = vmatmul.mubr.msk.f32.gmra.mxu0 %vm843_vm1, %v7914_v47 }
  0xaa   : > { %7219 = vmatprep.mubr.msk.f32.mxu0 %vm7393_vm4, %v11883_v17 }
  0xad   : > { %7220 = vmatmul.mubr.msk.f32.gmra.mxu0 %vm843_vm1, %v7925_v53 }
  0xae   : > { %7222 = vmatprep.mubr.msk.f32.mxu0 %vm7393_vm4, %v11883_v17 }
  0xb1   : > { %7223 = vmatmul.mubr.msk.f32.gmra.mxu0 %vm843_vm1, %v7954_v20 }
  0xb2   : > { %7225 = vmatprep.mubr.msk.f32.mxu0 %vm7393_vm4, %v11883_v17 }
  0xb5   : > { %7226 = vmatmul.mubr.msk.f32.gmra.mxu0 %vm843_vm1, %v7976_v29 }
  0xb6   : > { %7228 = vmatprep.mubr.msk.f32.mxu0 %vm7393_vm4, %v11883_v17 }
  0xb9   : > { %7229 = vmatmul.mubr.msk.f32.gmra.mxu0 %vm843_vm1, %v8010_v46 }
  0xba   : > { %7231 = vmatprep.mubr.msk.f32.mxu0 %vm7393_vm4, %v11883_v17 }
  0xbd   : > { %7232 = vmatmul.mubr.msk.f32.gmra.mxu0 %vm843_vm1, %v8029_v52 }
  0xbe   : > { %7234 = vmatprep.mubr.msk.f32.mxu0 %vm7393_vm4, %v11883_v17 }
  0xc1   : > { %7235 = vmatmul.mubr.msk.f32.gmra.mxu0 %vm843_vm1, %v8045_v57 }
  0xc2   : > { %3504 = vmatprep.mubr.f32.mxu0 %v11883_v17 }
  0xe8   : > { %v964_v59 = vpop.f32.mrf.mxu0  ;;  %v1099_v8 = vpop.f32.mrf.mxu1 }
  0xea   : > { %v966_v21 = vpop.f32.mrf.mxu0  ;;  %v1101_v31 = vpop.f32.mrf.mxu1 }
  0xeb   : > { %v1643_v47 = vcombine.low %v964_v59, %v966_v21  ;;  %v1644_v53 = vcombine.high %v964_v59, %v966_v21  ;;  %v1645_v13 = vcombine.low %v1099_v8, %v1101_v31  ;;  %v1646_v14 = vcombine.high %v1099_v8, %v1101_v31 }
  0xec   : > { %v970_v16 = vpop.f32.mrf.mxu0  ;;  %v1105_v18 = vpop.f32.mrf.mxu1 }
  0xed   : > { %v1653_v19 = vrot.slane %v1643_v47, %v7596_v34  ;;  %v1660_v20 = vrot.slane %v1644_v53, %v7596_v34  ;;  %v1667_v23 = vrot.slane %v1645_v13, %v7596_v34  ;;  %v1674_v0 = vrot.slane %v1646_v14, %v7596_v34 }
  0xee   : > { %v972_v24 = vpop.f32.mrf.mxu0  ;;  %v1107_v25 = vpop.f32.mrf.mxu1 }
  0xef   : > { %v1675_v26 = vcombine.low %v1653_v19, %v1667_v23  ;;  %v1676_v27 = vcombine.high %v1653_v19, %v1667_v23  ;;  %v1677_v22 = vcombine.low %v1660_v20, %v1674_v0  ;;  %v1678_v28 = vcombine.high %v1660_v20, %v1674_v0 }
  0xf0   : > { %v1679_v33 = vcombine.low %v970_v16, %v972_v24  ;;  %v1680_v35 = vcombine.high %v970_v16, %v972_v24  ;;  %v1681_v36 = vcombine.low %v1105_v18, %v1107_v25  ;;  %v1682_v37 = vcombine.high %v1105_v18, %v1107_v25  ;;  %v976_v39 = vpop.f32.mrf.mxu0 }
  0xf1   : > { %v1111_v40 = vpop.f32.mrf.mxu1  ;;  %v6805_v41 = vrot.slane %v1675_v26, 9  ;;  %v2402_v42 = vrot.slane %v1676_v27, 7  ;;  %v2405_v43 = vrot.slane %v1677_v22, 7  ;;  %v2408_v44 = vrot.slane %v1678_v28, 7 }
  0xf2   : > { %v2514_v45 = vrot.slane %v1676_v27, 4  ;;  %v1689_v46 = vrot.slane %v1679_v33, %v7596_v34  ;;  %v978_v48 = vpop.f32.mrf.mxu0  ;;  %v1696_v54 = vrot.slane %v1680_v35, %v7596_v34  ;;  %v2515_v56 = vrot.slane %v1677_v22, 4 }
  0xf3   : > { %v1113_v49 = vpop.f32.mrf.mxu1  ;;  %v2403_v50 = vsel %vm8258_vm11, %v6805_v41, %v2402_v42  ;;  %v2404_v51 = vrot.slane %v2402_v42, 2  ;;  %v2407_v52 = vrot.slane %v2405_v43, 2  ;;  %v1703_v57 = vrot.slane %v1681_v36, %v7596_v34 }
  0xf4   : > { %v2460_v55 = vrot.slane %v2403_v50, 2  ;;  %v1710_v58 = vrot.slane %v1682_v37, %v7596_v34  ;;  %v982_v60 = vpop.f32.mrf.mxu0  ;;  %v1749_v2 = vcombine.low %v976_v39, %v978_v48  ;;  %v1750_v3 = vcombine.high %v976_v39, %v978_v48 }
  0xf5   : > { %v1117_v61 = vpop.f32.mrf.mxu1  ;;  %v2406_v62 = vsel %vm8258_vm11, %v2404_v51, %v2405_v43  ;;  %v2409_v1 = vsel %vm8258_vm11, %v2407_v52, %v2408_v44  ;;  %v1711_v9 = vcombine.high %v1689_v46, %v1703_v57  ;;  %v2516_v12 = vrot.slane %v1678_v28, 4 }
  0xf6   : > { %v2461_v4 = vrot.slane %v2406_v62, 2  ;;  %v2462_v5 = vrot.slane %v2409_v1, 2  ;;  %v2496_v6 = vadd.f32 %v2460_v55, %v1675_v26  ;;  %v984_v10 = vpop.f32.mrf.mxu0  ;;  %v8278_v32 = vcombine.low %v1696_v54, %v1710_v58 }
  0xf7   : > { %v1119_v11 = vpop.f32.mrf.mxu1  ;;  %v8280_v38 = vcombine.high %v1696_v54, %v1710_v58  ;;  %v1751_v59 = vcombine.low %v1111_v40, %v1113_v49  ;;  %v6806_v47 = vrot.slane %v1711_v9, 9  ;;  %v2568_v16 = vrot.slane %v1711_v9, 6 }
  0xf8   : > { %v2497_v8 = vadd.f32 %v2461_v4, %v1676_v27  ;;  %v2498_v21 = vadd.f32 %v2462_v5, %v1677_v22  ;;  %v2550_v31 = vadd.f32 %v2514_v45, %v2496_v6  ;;  %v8282_v53 = vpop.f32.mrf.mxu0  ;;  %v2412_v14 = vrot.slane %v8278_v32, 7 }
  0xf9   : > { %v8284_v13 = vpop.f32.mrf.mxu1  ;;  %v2415_v15 = vrot.slane %v8280_v38, 7  ;;  %v1759_v18 = vrot.slane %v1749_v2, %v7596_v34  ;;  %v1766_v23 = vrot.slane %v1750_v3, %v7596_v34  ;;  %v1752_v0 = vcombine.high %v1111_v40, %v1113_v49 }
  0xfa   : > { %v8289_v19 = vadd.f32 %v2515_v56, %v2497_v8  ;;  %v8291_v20 = vadd.f32 %v2516_v12, %v2498_v21  ;;  %v990_v24 = vpop.f32.mrf.mxu0  ;;  %v2413_v26 = vsel %vm8258_vm11, %v6806_v47, %v2412_v14  ;;  %v2517_v27 = vrot.slane %v8278_v32, 4 }
  0xfb   : > { %v8294_v25 = vpop.f32.mrf.mxu1  ;;  %v8299_v22 = vadd.f32 %v2568_v16, %v2550_v31  ;;  %v8302_v28 = vrot.slane %v2914_v30, %v7596_v34  ;;  %v2463_v33 = vrot.slane %v2413_v26, 2  ;;  %v1773_v35 = vrot.slane %v1751_v59, %v7596_v34 }
  0xfc   : > { %v1780_v36 = vrot.slane %v1752_v0, %v7596_v34  ;;  %v1828_v37 = vcombine.low %v982_v60, %v984_v10  ;;  %v8306_v39 = vpop.f32.mrf.mxu0  ;;  %v2417_v41 = vrot.slane %v2415_v15, 2  ;;  %v1829_v42 = vcombine.high %v982_v60, %v984_v10 }
  0xfd   : > { %11962 = vst [vmem:[#allocation6_spill] sm:$0xff] %v8302_v28  ;;  %v8308_v40 = vpop.f32.mrf.mxu1  ;;  %v1830_v43 = vcombine.low %v1117_v61, %v1119_v11  ;;  %v1831_v44 = vcombine.high %v1117_v61, %v1119_v11  ;;  %v2499_v45 = vadd.f32 %v2463_v33, %v1711_v9  ;;  %v1781_v46 = vcombine.low %v1759_v18, %v1773_v35 }
  0xfe   : > { %v8312_v30 = vcombine.low %v1766_v23, %v1780_v36  ;;  %v8314_v48 = vcombine.high %v1766_v23, %v1780_v36  ;;  %v8316_v49 = vpop.f32.mrf.mxu0  ;;  %v1838_v51 = vrot.slane %v1828_v37, %v7596_v34  ;;  %v1845_v52 = vrot.slane %v1829_v42, %v7596_v34  ;;  %v3369_v36 = vld [vmem:[%s11880_s4 + $0x98] sm:$0xff] }
  0xff   : > { %v8318_v50 = vpop.f32.mrf.mxu1  ;;  %v1852_v54 = vrot.slane %v1830_v43, %v7596_v34  ;;  %v1859_v55 = vrot.slane %v1831_v44, %v7596_v34  ;;  %v8324_v56 = vadd.f32 %v2517_v27, %v2499_v45  ;;  %v2418_v57 = vrot.slane %v1781_v46, 7  ;;  %7322 = vmatprep.subr.mxu1 %v3369_v36  ;;  %3466 = vmatprep.subr.mxu0 %v3369_v36 }
 0x100   : > { %v6807_v58 = vrot.slane %v8312_v30, 9  ;;  %v2422_v60 = vrot.slane %v8314_v48, 7  ;;  %v8328_v61 = vpop.f32.mrf.mxu0  ;;  %v8332_v1 = vrot.slane %v2412_v14, 2  ;;  %v1906_v4 = vcombine.low %v8282_v53, %v990_v24 }
 0x101   : > { %v8330_v62 = vpop.f32.mrf.mxu1  ;;  %v8335_v3 = vcombine.low %v1838_v51, %v1852_v54  ;;  %v2419_v5 = vsel %vm8258_vm11, %v2417_v41, %v2418_v57  ;;  %v2519_v9 = vrot.slane %v1781_v46, 4  ;;  %v1861_v10 = vcombine.high %v1838_v51, %v1852_v54 }
 0x102   : > { %v2423_v6 = vsel %vm8258_vm11, %v6807_v58, %v2422_v60  ;;  %v8342_v11 = vpop.f32.mrf.mxu0  ;;  %v2465_v59 = vrot.slane %v2419_v5, 2  ;;  %v8346_v21 = vcombine.high %v1845_v52, %v1859_v55  ;;  %v8349_v47 = vrot.slane %v2422_v60, 2 }
 0x103   : > { %v8344_v12 = vpop.f32.mrf.mxu1  ;;  %v2466_v8 = vrot.slane %v2423_v6, 2  ;;  %v11886_v31 = vrot.slane %v8335_v3, 7  ;;  %v2571_v16 = vrot.slane %v8312_v30, 6  ;;  %v1907_v18 = vcombine.high %v8282_v53, %v990_v24  ;;  %v3368_v53 = vld [vmem:[%s11880_s4 + $0x90] sm:$0xff] }
 0x104   : > { %v8354_v23 = vpop.f32.mrf.mxu0  ;;  %v2501_v26 = vadd.f32 %v2465_v59, %v8280_v38  ;;  %v2428_v35 = vrot.slane %v1861_v10, 7  ;;  %v1916_v37 = vrot.slane %v1906_v4, %v7596_v34  ;;  %v1908_v42 = vcombine.low %v8284_v13, %v8294_v25  ;;  %7326 = vmatpush1.msra.mxu1 %v3368_v53  ;;  %3467 = vmatpush1.msra.mxu0 %v3368_v53 }
 0x105   : > { %v8356_v0 = vpop.f32.mrf.mxu1  ;;  %v8360_v27 = vadd.f32 %v2466_v8, %v8312_v30  ;;  %v2427_v33 = vrot.slane %v11886_v31, 2  ;;  %v1923_v41 = vrot.slane %v1907_v18, %v7596_v34  ;;  %v1909_v51 = vcombine.high %v8284_v13, %v8294_v25 }
 0x106   : > { %v8375_v43 = vpop.f32.mrf.mxu0  ;;  %v8379_v45 = vadd.f32 %v2519_v9, %v2501_v26  ;;  %v1992_v52 = vcombine.low %v8306_v39, %v8316_v49  ;;  %v1930_v55 = vrot.slane %v1908_v42, %v7596_v34  ;;  %v1993_v57 = vcombine.high %v8306_v39, %v8316_v49 }
 0x107   : > { %v8377_v44 = vpop.f32.mrf.mxu1  ;;  %v2429_v46 = vsel %vm8258_vm11, %v2427_v33, %v2428_v35  ;;  %v1994_v58 = vcombine.low %v8308_v40, %v8318_v50  ;;  %v2522_v25 = vrot.slane %v1861_v10, 4  ;;  %v1937_v5 = vrot.slane %v1909_v51, %v7596_v34 }
 0x108   : > { %v2468_v54 = vrot.slane %v2429_v46, 2  ;;  %v8392_v60 = vpop.f32.mrf.mxu0  ;;  %v1995_v6 = vcombine.high %v8308_v40, %v8318_v50  ;;  %v8401_v59 = vcombine.low %v1916_v37, %v1930_v55  ;;  %v8403_v39 = vcombine.high %v1916_v37, %v1930_v55 }
 0x109   : > { %v8394_v4 = vpop.f32.mrf.mxu1  ;;  %v2002_v49 = vrot.slane %v1992_v52, %v7596_v34  ;;  %v1940_v26 = vcombine.low %v1923_v41, %v1937_v5  ;;  %v2009_v10 = vrot.slane %v1993_v57, %v7596_v34  ;;  %v2016_v33 = vrot.slane %v1994_v58, %v7596_v34 }
 0x10a   : > { %v2504_v9 = vadd.f32 %v2468_v54, %v8335_v3  ;;  %v8406_v8 = vpop.f32.mrf.mxu0  ;;  %v2023_v35 = vrot.slane %v1995_v6, %v7596_v34  ;;  %v11885_v36 = vrot.slane %v8401_v59, 7  ;;  %v2435_v53 = vrot.slane %v8403_v39, 7 }
 0x10b   : > { %v8408_v18 = vpop.f32.mrf.mxu1  ;;  %v2438_v46 = vrot.slane %v1940_v26, 7  ;;  %v2081_v41 = vcombine.low %v8328_v61, %v8342_v11  ;;  %v2082_v52 = vcombine.high %v8328_v61, %v8342_v11  ;;  %v8426_v58 = vcombine.low %v2002_v49, %v2016_v33 }
 0x10c   : > { %v8413_v40 = vadd.f32 %v2522_v25, %v2504_v9  ;;  %v2434_v54 = vrot.slane %v11885_v36, 2  ;;  %v2437_v55 = vrot.slane %v2435_v53, 2  ;;  %v2525_v6 = vrot.slane %v1940_v26, 4 }
 0x10d   : > { %v1018_v37 = vpop.f32.mrf.mxu0  ;;  %v1153_v42 = vpop.f32.mrf.mxu1  ;;  %11963 = vst [vmem:[#allocation7_spill] sm:$0xff] %v8426_v58  ;;  %v8428_v9 = vcombine.high %v2002_v49, %v2016_v33  ;;  %v6809_v51 = vrot.slane %v8426_v58, 9  ;;  %v8521_v30 = vsel %vm8258_vm11, %v8332_v1, %v2415_v15 }
 0x10e   : > { %v8430_v37 = vcombine.low %v2009_v10, %v2023_v35  ;;  %v2027_v42 = vcombine.high %v2009_v10, %v2023_v35  ;;  %v2436_v17 = vsel %vm8258_vm11, %v2434_v54, %v2435_v53  ;;  %v2439_v61 = vsel %vm8258_vm11, %v2437_v55, %v2438_v46 }
 0x10f   : > { %v1019_v25 = vpop.f32.mrf.mxu0  ;;  %v1154_v5 = vpop.f32.mrf.mxu1  ;;  %11964 = vst [vmem:[#allocation8_spill] sm:$0xff] %v8428_v9  ;;  %v2442_v49 = vrot.slane %v8428_v9, 7  ;;  %v2091_v53 = vrot.slane %v2081_v41, %v7596_v34  ;;  %v2526_v11 = vrot.slane %v8428_v9, 4 }
 0x110   : > { %11965 = vst [vmem:[#allocation9_spill] sm:$0xff] %v8430_v37  ;;  %v2470_v25 = vrot.slane %v2436_v17, 2  ;;  %v2471_v5 = vrot.slane %v2439_v61, 2  ;;  %v2445_v26 = vrot.slane %v8430_v37, 7  ;;  %v2448_v33 = vrot.slane %v2027_v42, 7 }
 0x111   : > { %v1022_v57 = vpop.f32.mrf.mxu0  ;;  %v1157_v13 = vpop.f32.mrf.mxu1  ;;  %v2443_v17 = vsel %vm8258_vm11, %v6809_v51, %v2442_v49  ;;  %v2528_v50 = vrot.slane %v2027_v42, 4 }
 0x112   : > { %v8444_v55 = vadd.f32 %v2470_v25, %v8401_v59  ;;  %v2507_v13 = vadd.f32 %v2471_v5, %v8403_v39  ;;  %v2444_v57 = vrot.slane %v2442_v49, 2  ;;  %v2447_v61 = vrot.slane %v2445_v26, 2 }
 0x113   : > { %v1023_v46 = vpop.f32.mrf.mxu0  ;;  %v1158_v54 = vpop.f32.mrf.mxu1  ;;  %v2472_v36 = vrot.slane %v2443_v17, 2  ;;  %v2098_v25 = vrot.slane %v2082_v52, %v7596_v34  ;;  %v2083_v5 = vcombine.low %v8330_v62, %v8344_v12  ;;  %v2160_v52 = vcombine.low %v8354_v23, %v8375_v43 }
 0x114   : > { %11966 = vst [vmem:[#allocation10_spill] sm:$0xff] %v8444_v55  ;;  %v8450_v10 = vadd.f32 %v2525_v6, %v2507_v13  ;;  %v2446_v41 = vsel %vm8258_vm11, %v2444_v57, %v2445_v26  ;;  %v2449_v51 = vsel %vm8258_vm11, %v2447_v61, %v2448_v33  ;;  %v2161_v26 = vcombine.high %v8354_v23, %v8375_v43 }
 0x115   : > { %v1026_v24 = vpop.f32.mrf.mxu0  ;;  %v1161_v35 = vpop.f32.mrf.mxu1  ;;  %v2473_v49 = vrot.slane %v2446_v41, 2  ;;  %v2508_v46 = vadd.f32 %v2472_v36, %v8426_v58  ;;  %v2105_v54 = vrot.slane %v2083_v5, %v7596_v34  ;;  %v2170_v41 = vrot.slane %v2160_v52, %v7596_v34 }
 0x116   : > { %11967 = vst [vmem:[#allocation11_spill] sm:$0xff] %v8450_v10  ;;  %v2084_v24 = vcombine.high %v8330_v62, %v8344_v12  ;;  %v2474_v35 = vrot.slane %v2449_v51, 2  ;;  %v2162_v62 = vcombine.low %v8356_v0, %v8377_v44  ;;  %v2177_v23 = vrot.slane %v2161_v26, %v7596_v34 }
 0x117   : > { %v1027_v42 = vpop.f32.mrf.mxu0  ;;  %v1162_v6 = vpop.f32.mrf.mxu1  ;;  %v8468_v13 = vadd.f32 %v2473_v49, %v8428_v9  ;;  %v8470_v33 = vadd.f32 %v2526_v11, %v2508_v46  ;;  %v8476_v61 = vcombine.high %v2091_v53, %v2105_v54  ;;  %v2163_v11 = vcombine.high %v8356_v0, %v8377_v44 }
 0x118   : > { %v2112_v36 = vrot.slane %v2084_v24, %v7596_v34  ;;  %v2510_v57 = vadd.f32 %v2474_v35, %v8430_v37  ;;  %v2184_v51 = vrot.slane %v2162_v62, %v7596_v34  ;;  %v2246_v6 = vcombine.low %v8392_v60, %v8406_v8 }
 0x119   : > { %11968 = vst [vmem:[#allocation12_spill] sm:$0xff] %v8468_v13  ;;  %11969 = vst [vmem:[#allocation13_spill] sm:$0xff] %v8470_v33  ;;  %v1030_v12 = vpop.f32.mrf.mxu0  ;;  %v1165_v17 = vpop.f32.mrf.mxu1  ;;  %v6810_v53 = vrot.slane %v8476_v61, 9  ;;  %v2191_v54 = vrot.slane %v2163_v11, %v7596_v34  ;;  %v2247_v62 = vcombine.low %v8394_v4, %v8408_v18 }
 0x11a   : > { %11970 = vst [vmem:[#allocation14_spill] sm:$0xff] %v8476_v61  ;;  %v8480_v43 = vcombine.low %v2098_v25, %v2112_v36  ;;  %v8482_v5 = vcombine.high %v2098_v25, %v2112_v36  ;;  %v8488_v42 = vadd.f32 %v2528_v50, %v2510_v57  ;;  %v2192_v0 = vcombine.low %v2170_v41, %v2184_v51 }
 0x11b   : > { %v1031_v49 = vpop.f32.mrf.mxu0  ;;  %v1166_v46 = vpop.f32.mrf.mxu1  ;;  %v2193_v12 = vcombine.low %v2177_v23, %v2191_v54  ;;  %v2254_v17 = vrot.slane %v2246_v6, %v7596_v34  ;;  %v2261_v4 = vrot.slane %v2247_v62, %v7596_v34 }
 0x11c   : > { %11971 = vst [vmem:[#allocation15_spill] sm:$0xff] %v8480_v43  ;;  %11972 = vst [vmem:[#allocation16_spill] sm:$0xff] %v8482_v5  ;;  %v2452_v35 = vrot.slane %v8480_v43, 7  ;;  %v2455_v25 = vrot.slane %v8482_v5, 7  ;;  %v2529_v50 = vrot.slane %v8480_v43, 4  ;;  %v2194_v49 = vcombine.high %v2177_v23, %v2191_v54 }
 0x11d   : > { %11973 = vst [vmem:[#allocation17_spill] sm:$0xff] %v8488_v42  ;;  %v1234_v44 = vpop.f32.mrf.mxu0  ;;  %v1369_v52 = vpop.f32.mrf.mxu1  ;;  %v2458_v46 = vrot.slane %v2192_v0, 7  ;;  %v2531_v54 = vrot.slane %v2192_v0, 4 }
 0x11e   : > { %v2453_v60 = vsel %vm8258_vm11, %v6810_v53, %v2452_v35  ;;  %v2454_v8 = vrot.slane %v2452_v35, 2  ;;  %v2457_v11 = vrot.slane %v2455_v25, 2  ;;  %v2530_v52 = vrot.slane %v8482_v5, 4 }
 0x11f   : > { %v1235_v57 = vpop.f32.mrf.mxu0  ;;  %v1370_v41 = vpop.f32.mrf.mxu1  ;;  %v2475_v51 = vrot.slane %v2453_v60, 2  ;;  %v8511_v53 = vadd.f32 %v2571_v16, %v8324_v56  ;;  %v2583_v60 = vrot.slane %v2193_v12, 6 }
 0x120   : > { %v2456_v44 = vsel %vm8258_vm11, %v2454_v8, %v2455_v25  ;;  %v2459_v23 = vsel %vm8258_vm11, %v2457_v11, %v2458_v46  ;;  %v2262_v25 = vcombine.low %v2254_v17, %v2261_v4  ;;  %v2584_v11 = vrot.slane %v2194_v49, 6  ;;  %v3360_v4 = vld [vmem:[%s11880_s4 + $0x50] sm:$0xff] }
 0x121   : > { %v1238_v18 = vpop.f32.mrf.mxu0  ;;  %v1373_v24 = vpop.f32.mrf.mxu1  ;;  %v2511_v6 = vadd.f32 %v2475_v51, %v8476_v61  ;;  %v2476_v35 = vrot.slane %v2456_v44, 2  ;;  %v2477_v8 = vrot.slane %v2459_v23, 2  ;;  %7323 = vmatprep.subr.mxu1 %v3360_v4  ;;  %3468 = vmatprep.subr.mxu0 %v3360_v4 }
 0x123   : > { %v1240_v57 = vpop.f32.mrf.mxu0  ;;  %v1375_v41 = vpop.f32.mrf.mxu1  ;;  %v2512_v56 = vadd.f32 %v2476_v35, %v8480_v43  ;;  %v2565_v16 = vadd.f32 %v2529_v50, %v2511_v6  ;;  %v2513_v0 = vadd.f32 %v2477_v8, %v8482_v5  ;;  %v3359_v50 = vld [vmem:[%s11880_s4 + $0x48] sm:$0xff] }
 0x124   : > { %v1714_v62 = vcombine.low %v1238_v18, %v1240_v57  ;;  %v1715_v51 = vcombine.high %v1238_v18, %v1240_v57  ;;  %v1716_v12 = vcombine.low %v1373_v24, %v1375_v41  ;;  %v1717_v17 = vcombine.high %v1373_v24, %v1375_v41  ;;  %7327 = vmatpush1.msra.mxu1 %v3359_v50 }
 0x125   : > { %v1244_v46 = vpop.f32.mrf.mxu0  ;;  %v1379_v44 = vpop.f32.mrf.mxu1  ;;  %v2566_v23 = vadd.f32 %v2530_v52, %v2512_v56  ;;  %v8528_v36 = vadd.f32 %v2583_v60, %v2565_v16  ;;  %v2567_v49 = vadd.f32 %v2531_v54, %v2513_v0  ;;  %v2585_v24 = vrot.slane %v2262_v25, 6  ;;  %v3351_v52 = vld [vmem:[%s11880_s4 + $0x8] sm:$0xff]  ;;  %v3350_v54 = vld [vmem:[%s11880_s4] sm:$0xff]  ;;  %3469 = vmatpush1.msra.mxu0 %v3359_v50 }
 0x126   : > { %v1724_v15 = vrot.slane %v1714_v62, %v7596_v34  ;;  %v1731_v1 = vrot.slane %v1715_v51, %v7596_v34  ;;  %v1738_v18 = vrot.slane %v1716_v12, %v7596_v34  ;;  %v1745_v6 = vrot.slane %v1717_v17, %v7596_v34  ;;  %7324 = vmatprep.subr.mxu1 %v3351_v52  ;;  %v3382_v25 = vld [vmem:[%s11880_s4 + $0x100] sm:$0xff] }
 0x127   : > { %11974 = vst [vmem:[#allocation18_spill] sm:$0xff] %v8528_v36  ;;  %v1246_v35 = vpop.f32.mrf.mxu0  ;;  %v1381_v8 = vpop.f32.mrf.mxu1  ;;  %v8540_v60 = vadd.f32 %v2584_v11, %v2566_v23  ;;  %v8548_v16 = vadd.f32 %v2585_v24, %v2567_v49  ;;  %7328 = vmatpush1.msra.mxu1 %v3350_v54  ;;  %v3380_v49 = vld [vmem:[%s11880_s4 + $0xf0] sm:$0xff]  ;;  %3470 = vmatprep.subr.mxu0 %v3351_v52 }
 0x128   : > { %v1784_v57 = vcombine.low %v1244_v46, %v1246_v35  ;;  %v1785_v41 = vcombine.high %v1244_v46, %v1246_v35  ;;  %v1786_v56 = vcombine.low %v1379_v44, %v1381_v8  ;;  %v1746_v62 = vcombine.high %v1724_v15, %v1738_v18  ;;  %3802 = vmatprep.subr.mxu1 %v3382_v25 }
 0x129   : > { %11975 = vst [vmem:[#allocation19_spill] sm:$0xff] %v8540_v60  ;;  %11976 = vst [vmem:[#allocation20_spill] sm:$0xff] %v8548_v16  ;;  %v8550_v51 = vcombine.low %v1731_v1, %v1745_v6  ;;  %v8552_v0 = vcombine.high %v1731_v1, %v1745_v6  ;;  %v1250_v11 = vpop.f32.mrf.mxu0  ;;  %v1385_v12 = vpop.f32.mrf.mxu1  ;;  %v1787_v4 = vcombine.high %v1379_v44, %v1381_v8  ;;  %3471 = vmatpush1.msra.mxu0 %v3350_v54 }
 0x12a   : > { %v1794_v17 = vrot.slane %v1784_v57, %v7596_v34  ;;  %v1801_v46 = vrot.slane %v1785_v41, %v7596_v34  ;;  %v1808_v23 = vrot.slane %v1786_v56, %v7596_v34  ;;  %v6811_v24 = vrot.slane %v1746_v62, 9  ;;  %3631 = vmatprep.subr.mxu0 %v3380_v49 }
 0x12b   : > { %v2624_v1 = vrot.slane %v8550_v51, 7  ;;  %v1252_v18 = vpop.f32.mrf.mxu0  ;;  %v1387_v6 = vpop.f32.mrf.mxu1  ;;  %v11887_v44 = vrot.slane %v8552_v0, 7  ;;  %v1815_v8 = vrot.slane %v1787_v4, %v7596_v34 }
 0x12c   : > { %v1863_v50 = vcombine.low %v1250_v11, %v1252_v18  ;;  %v8568_v62 = vcombine.low %v1794_v17, %v1808_v23  ;;  %v1864_v15 = vcombine.high %v1250_v11, %v1252_v18  ;;  %v1865_v56 = vcombine.low %v1385_v12, %v1387_v6 }
 0x12d   : > { %v1256_v26 = vpop.f32.mrf.mxu0  ;;  %v1391_v14 = vpop.f32.mrf.mxu1  ;;  %v2625_v52 = vsel %vm8258_vm11, %v6811_v24, %v2624_v1  ;;  %v8572_v25 = vrot.slane %v2624_v1, 2  ;;  %v8574_v4 = vcombine.low %v1801_v46, %v1815_v8  ;;  %v8576_v31 = vcombine.high %v1801_v46, %v1815_v8 }
 0x12e   : > { %v1873_v54 = vrot.slane %v1863_v50, %v7596_v34  ;;  %v1880_v2 = vrot.slane %v1864_v15, %v7596_v34  ;;  %v1866_v17 = vcombine.high %v1385_v12, %v1387_v6  ;;  %v8582_v49 = vrot.slane %v11887_v44, 2 }
 0x12f   : > { %v1258_v23 = vpop.f32.mrf.mxu0  ;;  %v1393_v11 = vpop.f32.mrf.mxu1  ;;  %v6812_v24 = vrot.slane %v8574_v4, 9  ;;  %v1887_v46 = vrot.slane %v1865_v56, %v7596_v34 }
 0x130   : > { %v1941_v18 = vcombine.low %v1256_v26, %v1258_v23  ;;  %v1894_v8 = vrot.slane %v1866_v17, %v7596_v34  ;;  %v1942_v50 = vcombine.high %v1256_v26, %v1258_v23  ;;  %v1943_v35 = vcombine.low %v1391_v14, %v1393_v11 }
 0x131   : > { %v1262_v15 = vpop.f32.mrf.mxu0  ;;  %v1397_v57 = vpop.f32.mrf.mxu1  ;;  %v1944_v41 = vcombine.high %v1391_v14, %v1393_v11  ;;  %v8591_v36 = vcombine.low %v1873_v54, %v1887_v46  ;;  %v8593_v16 = vcombine.high %v1873_v54, %v1887_v46  ;;  %v11977_v54 = vrot.slane %v8576_v31, 7 }
 0x132   : > { %v1951_v44 = vrot.slane %v1941_v18, %v7596_v34  ;;  %v8595_v1 = vcombine.high %v1880_v2, %v1894_v8  ;;  %v1958_v56 = vrot.slane %v1942_v50, %v7596_v34  ;;  %v1965_v23 = vrot.slane %v1943_v35, %v7596_v34 }
 0x133   : > { %v1264_v17 = vpop.f32.mrf.mxu0  ;;  %v1399_v26 = vpop.f32.mrf.mxu1  ;;  %v1972_v60 = vrot.slane %v1944_v41, %v7596_v34  ;;  %v8606_v2 = vsel %vm8258_vm11, %v6812_v24, %v11977_v54  ;;  %v8609_v46 = vadd.f32 %v2625_v52, %v8299_v22 }
 0x134   : > { %v2028_v12 = vcombine.low %v1262_v15, %v1264_v17  ;;  %v2029_v43 = vcombine.high %v1262_v15, %v1264_v17  ;;  %v8612_v41 = vcombine.low %v1951_v44, %v1965_v23  ;;  %v8614_v8 = vcombine.high %v1951_v44, %v1965_v23 }
 0x135   : > { %v1268_v11 = vpop.f32.mrf.mxu0  ;;  %v1403_v18 = vpop.f32.mrf.mxu1  ;;  %v8616_v50 = vcombine.low %v1958_v56, %v1972_v60  ;;  %v2030_v14 = vcombine.low %v1397_v57, %v1399_v26  ;;  %v2031_v6 = vcombine.high %v1397_v57, %v1399_v26 }
 0x136   : > { %v2038_v15 = vrot.slane %v2028_v12, %v7596_v34  ;;  %v2045_v17 = vrot.slane %v2029_v43, %v7596_v34 }
 0x137   : > { %v1270_v13 = vpop.f32.mrf.mxu0  ;;  %v1405_v24 = vpop.f32.mrf.mxu1  ;;  %v2052_v12 = vrot.slane %v2030_v14, %v7596_v34  ;;  %v2059_v43 = vrot.slane %v2031_v6, %v7596_v34  ;;  %v11980_v6 = vrot.slane %v8612_v41, 7 }
 0x138   : > { %v2116_v54 = vcombine.low %v1268_v11, %v1270_v13  ;;  %v2117_v22 = vcombine.high %v1268_v11, %v1270_v13  ;;  %v2118_v10 = vcombine.low %v1403_v18, %v1405_v24  ;;  %v2119_v23 = vcombine.high %v1403_v18, %v1405_v24 }
 0x139   : > { %v1274_v56 = vpop.f32.mrf.mxu0  ;;  %v1409_v57 = vpop.f32.mrf.mxu1  ;;  %v8630_v42 = vcombine.low %v2038_v15, %v2052_v12  ;;  %v8632_v52 = vcombine.high %v2038_v15, %v2052_v12  ;;  %v8634_v35 = vcombine.low %v2045_v17, %v2059_v43  ;;  %v8636_v44 = vcombine.high %v2045_v17, %v2059_v43 }
 0x13a   : > { %v8640_v37 = vrot.slane %v11980_v6, 2  ;;  %v11981_v13 = vrot.slane %v8614_v8, 7  ;;  %v2126_v12 = vrot.slane %v2116_v54, %v7596_v34  ;;  %v2133_v17 = vrot.slane %v2117_v22, %v7596_v34 }
 0x13b   : > { %11978 = vst [vmem:[#allocation21_spill] sm:$0xff] %v8634_v35  ;;  %11979 = vst [vmem:[#allocation22_spill] sm:$0xff] %v8636_v44  ;;  %v1276_v60 = vpop.f32.mrf.mxu0  ;;  %v1411_v14 = vpop.f32.mrf.mxu1  ;;  %v2140_v54 = vrot.slane %v2118_v10, %v7596_v34  ;;  %v2147_v58 = vrot.slane %v2119_v23, %v7596_v34  ;;  %v11983_v23 = vrot.slane %v8632_v52, 7 }
 0x13c   : > { %v8645_v11 = vrot.slane %v11981_v13, 2  ;;  %v2195_v28 = vcombine.low %v1274_v56, %v1276_v60  ;;  %v2196_v61 = vcombine.high %v1274_v56, %v1276_v60  ;;  %v2197_v7 = vcombine.low %v1409_v57, %v1411_v14 }
 0x13d   : > { %v1280_v43 = vpop.f32.mrf.mxu0  ;;  %v1415_v5 = vpop.f32.mrf.mxu1  ;;  %v8659_v6 = vcombine.high %v2126_v12, %v2140_v54  ;;  %v2198_v26 = vcombine.high %v1409_v57, %v1411_v14  ;;  %v8661_v55 = vcombine.low %v2133_v17, %v2147_v58  ;;  %v8663_v13 = vcombine.high %v2133_v17, %v2147_v58 }
 0x13e   : > { %v2205_v10 = vrot.slane %v2195_v28, %v7596_v34  ;;  %v2212_v15 = vrot.slane %v2196_v61, %v7596_v34  ;;  %v8669_v44 = vrot.slane %v11983_v23, 2  ;;  %v11985_v60 = vrot.slane %v8634_v35, 7 }
 0x13f   : > { %v1282_v33 = vpop.f32.mrf.mxu0  ;;  %v1417_v22 = vpop.f32.mrf.mxu1  ;;  %11982 = vst [vmem:[#allocation23_spill] sm:$0xff] %v8663_v13  ;;  %v2226_v57 = vrot.slane %v2198_v26, %v7596_v34  ;;  %v11903_v61 = vrot.slane %v8661_v55, 7 }
 0x140   : > { %v2263_v63 = vcombine.low %v1280_v43, %v1282_v33  ;;  %v2264_v18 = vcombine.high %v1280_v43, %v1282_v33  ;;  %11984 = vst [vmem:[#allocation24_spill] sm:$0xff] %v8669_v44  ;;  %v8673_v56 = vrot.slane %v11985_v60, 2  ;;  %v2219_v33 = vrot.slane %v2197_v7, %v7596_v34 }
 0x141   : > { %v1286_v9 = vpop.f32.mrf.mxu0  ;;  %v1421_v24 = vpop.f32.mrf.mxu1  ;;  %v8684_v23 = vcombine.low %v2212_v15, %v2226_v57  ;;  %v8686_v60 = vcombine.high %v2212_v15, %v2226_v57  ;;  %v2265_v44 = vcombine.low %v1415_v5, %v1417_v22  ;;  %v2266_v28 = vcombine.high %v1415_v5, %v1417_v22 }
 0x142   : > { %11986 = vst [vmem:[#allocation25_spill] sm:$0xff] %v8673_v56  ;;  %v8682_v54 = vcombine.low %v2205_v10, %v2219_v33  ;;  %v2273_v56 = vrot.slane %v2263_v63, %v7596_v34  ;;  %v2280_v58 = vrot.slane %v2264_v18, %v7596_v34  ;;  %v8692_v35 = vrot.slane %v11903_v61, 2 }
 0x143   : > { %v1288_v14 = vpop.f32.mrf.mxu0  ;;  %v1423_v12 = vpop.f32.mrf.mxu1  ;;  %v2287_v63 = vrot.slane %v2265_v44, %v7596_v34  ;;  %v2294_v18 = vrot.slane %v2266_v28, %v7596_v34  ;;  %v2674_v5 = vrot.slane %v8686_v60, 7 }
 0x144   : > { %11987 = vst [vmem:[#allocation26_spill] sm:$0xff] %v8692_v35  ;;  %v2307_v22 = vcombine.high %v1286_v9, %v1288_v14  ;;  %v2308_v43 = vcombine.low %v1421_v24, %v1423_v12  ;;  %v2309_v61 = vcombine.high %v1421_v24, %v1423_v12 }
 0x145   : > { %v1292_v7 = vpop.f32.mrf.mxu0  ;;  %v1427_v26 = vpop.f32.mrf.mxu1  ;;  %v8701_v13 = vcombine.low %v2273_v56, %v2287_v63  ;;  %v8703_v10 = vcombine.high %v2273_v56, %v2287_v63  ;;  %v2784_v56 = vrot.slane %v8684_v23, 4  ;;  %v11999_v63 = vrot.slane %v8314_v48, 4 }
 0x146   : > { %v2306_v26 = vcombine.low %v1286_v9, %v1288_v14  ;;  %v2323_v44 = vrot.slane %v2307_v22, %v7596_v34  ;;  %v2330_v28 = vrot.slane %v2308_v43, %v7596_v34  ;;  %v2337_v33 = vrot.slane %v2309_v61, %v7596_v34 }
 0x147   : > { %v1293_v15 = vpop.f32.mrf.mxu0  ;;  %v1428_v57 = vpop.f32.mrf.mxu1  ;;  %v11988_v9 = vrot.slane %v8550_v51, 2  ;;  %v11989_v22 = vrot.slane %v8521_v30, 2  ;;  %v2572_v30 = vrot.slane %v8314_v48, 6  ;;  %v2556_v14 = vadd.f32 %v11999_v63, %v8360_v27 }
 0x148   : > { %v8705_v15 = vcombine.high %v2280_v58, %v2294_v18  ;;  %v2316_v57 = vrot.slane %v2306_v26, %v7596_v34  ;;  %v8719_v58 = vadd.f32 %v8606_v2, %v8511_v53  ;;  %v11991_v18 = vrot.slane %v8280_v38, 4 }
 0x149   : > { %v1296_v35 = vpop.f32.mrf.mxu0  ;;  %v1431_v17 = vpop.f32.mrf.mxu1  ;;  %v2500_v53 = vadd.f32 %v11989_v22, %v8278_v32  ;;  %v12003_v63 = vrot.slane %v8335_v3, 4 }
 0x14a   : > { %v2754_v35 = vadd.f32 %v11988_v9, %v8609_v46  ;;  %v8722_v43 = vcombine.low %v2316_v57, %v2330_v28  ;;  %v8724_v61 = vcombine.high %v2316_v57, %v2330_v28  ;;  %v11990_v17 = vrot.slane %v8574_v4, 4 }
 0x14b   : > { %v1297_v7 = vpop.f32.mrf.mxu0  ;;  %v1432_v24 = vpop.f32.mrf.mxu1  ;;  %v2554_v26 = vadd.f32 %v11991_v18, %v2500_v53  ;;  %v11994_v53 = vrot.slane %v8568_v62, 7 }
 0x14c   : > { %v2340_v7 = vcombine.low %v2323_v44, %v2337_v33  ;;  %v2808_v57 = vadd.f32 %v11990_v17, %v2754_v35  ;;  %v2836_v33 = vrot.slane %v8606_v2, 6  ;;  %v2569_v44 = vrot.slane %v8278_v32, 6 }
 0x14d   : > { %v1300_v51 = vpop.f32.mrf.mxu0  ;;  %v1435_v46 = vpop.f32.mrf.mxu1  ;;  %v2831_v22 = vrot.slane %v8724_v61, 7  ;;  %v2573_v35 = vrot.slane %v8335_v3, 6  ;;  %v11992_v32 = vrot.slane %v8280_v38, 6 }
 0x14e   : > { %v2828_v46 = vrot.slane %v8722_v43, 7  ;;  %v2605_v2 = vadd.f32 %v2569_v44, %v8289_v19  ;;  %v11993_v51 = vrot.slane %v8552_v0, 7  ;;  %v11995_v44 = vrot.slane %v8576_v31, 7 }
 0x14f   : > { %v1301_v24 = vpop.f32.mrf.mxu0  ;;  %v1436_v28 = vpop.f32.mrf.mxu1  ;;  %v2606_v17 = vadd.f32 %v11992_v32, %v8291_v20  ;;  %v2609_v19 = vadd.f32 %v2573_v35, %v8379_v45  ;;  %v2637_v20 = vrot.slane %v8591_v36, 7  ;;  %v2773_v32 = vrot.slane %v8576_v31, 4 }
 0x150   : > { %v8743_v24 = vrot.slane %v2340_v7, 7  ;;  %v2608_v28 = vadd.f32 %v2572_v30, %v2554_v26  ;;  %v2628_v18 = vsel %vm8258_vm11, %v8572_v25, %v11993_v51  ;;  %v2631_v7 = vsel %vm8258_vm11, %v8582_v49, %v11994_v53 }
 0x151   : > { %v1504_v4 = vpop.f32.mrf.mxu0  ;;  %v2636_v38 = vrot.slane %v11995_v44, 2  ;;  %v2701_v26 = vadd.f32 %v2628_v18, %v2605_v2  ;;  %v2702_v30 = vadd.f32 %v2631_v7, %v2606_v17  ;;  %v2774_v25 = vrot.slane %v8591_v36, 4 }
 0x152   : > { %v11996_v51 = vrot.slane %v8335_v3, 7  ;;  %v2639_v35 = vrot.slane %v2637_v20, 2  ;;  %v11998_v18 = vrot.slane %v8568_v62, 2  ;;  %v12008_v3 = vrot.slane %v8616_v50, 7 }
 0x153   : > { %v7200_v4 = vpop.f32.mrf.mxu0  ;;  %v2638_v45 = vsel %vm8258_vm11, %v2636_v38, %v2637_v20 }
 0x154   : > { %v2426_v49 = vsel %vm8258_vm11, %v8349_v47, %v11996_v51  ;;  %v11997_v4 = vrot.slane %v8552_v0, 2  ;;  %v2704_v17 = vadd.f32 %v2638_v45, %v2608_v28  ;;  %v2756_v7 = vadd.f32 %v11998_v18, %v2702_v30 }
 0x155   : > { %v1508_v53 = vpop.f32.mrf.mxu0  ;;  %v2467_v2 = vrot.slane %v2426_v49, 2  ;;  %v2837_v9 = vrot.slane %v2638_v45, 6  ;;  %v2872_v47 = vadd.f32 %v2836_v33, %v2808_v57  ;;  %v12000_v51 = vrot.slane %v8593_v16, 7 }
 0x156   : > { %v2755_v44 = vadd.f32 %v11997_v4, %v2701_v26  ;;  %v12001_v28 = vrot.slane %v8403_v39, 6  ;;  %v12002_v26 = vrot.slane %v8591_v36, 2  ;;  %v12004_v33 = vrot.slane %v8346_v21, 6 }
 0x157   : > { %v7203_v12 = vpop.f32.mrf.mxu0  ;;  %v2641_v38 = vsel %vm8258_vm11, %v2639_v35, %v12000_v51  ;;  %v2503_v0 = vadd.f32 %v2467_v2, %v8314_v48  ;;  %v12005_v48 = vrot.slane %v8612_v41, 7  ;;  %v12006_v35 = vrot.slane %v8595_v1, 9 }
 0x158   : > { %v2612_v20 = vadd.f32 %v12001_v28, %v8413_v40  ;;  %v2705_v62 = vadd.f32 %v2641_v38, %v2609_v19  ;;  %v2758_v30 = vadd.f32 %v12002_v26, %v2704_v17  ;;  %v2809_v49 = vadd.f32 %v2773_v32, %v2755_v44 }
 0x159   : > { %v2838_v53 = vrot.slane %v2641_v38, 6  ;;  %v1512_v27 = vpop.f32.mrf.mxu0  ;;  %v2810_v12 = vadd.f32 %v2774_v25, %v2756_v7  ;;  %v2557_v57 = vadd.f32 %v12003_v63, %v2503_v0  ;;  %v2610_v45 = vadd.f32 %v12004_v33, %v2556_v14 }
 0x15a   : > { %v2645_v40 = vsel %vm8258_vm11, %v12006_v35, %v12005_v48  ;;  %v1819_v19 = vcombine.high %v1512_v27, %v1512_v27  ;;  %v2873_v36 = vadd.f32 %v2837_v9, %v2809_v49  ;;  %v12007_v32 = vrot.slane %v8614_v8, 7 }
 0x15b   : > { %v2651_v14 = vsel %vm8258_vm11, %v8645_v11, %v12008_v3  ;;  %v7206_v4 = vpop.f32.mrf.mxu0  ;;  %v2874_v44 = vadd.f32 %v2838_v53, %v2810_v12  ;;  %v12009_v2 = vrot.slane %v8401_v59, 6  ;;  %v2706_v18 = vadd.f32 %v2645_v40, %v2610_v45 }
 0x15c   : > { %v2648_v25 = vsel %vm8258_vm11, %v8640_v37, %v12007_v32  ;;  %v2721_v9 = vrot.slane %v8576_v31, 2  ;;  %v1826_v7 = vrot.slane %v1819_v19, %v7596_v34  ;;  %v12010_v51 = vrot.slane %v8593_v16, 2 }
 0x15d   : > { %v2611_v17 = vadd.f32 %v12009_v2, %v2557_v57  ;;  %v2776_v37 = vrot.slane %v8612_v41, 4  ;;  %v2777_v0 = vrot.slane %v8614_v8, 4  ;;  %v1517_v28 = vpop.f32.mrf.mxu0  ;;  %v2708_v26 = vadd.f32 %v2651_v14, %v2612_v20 }
 0x15e   : > { %v2759_v38 = vadd.f32 %v12010_v51, %v2705_v62  ;;  %v2757_v11 = vadd.f32 %v2721_v9, %v8719_v58  ;;  %v2839_v49 = vrot.slane %v2645_v40, 6  ;;  %v2840_v53 = vrot.slane %v2648_v25, 6  ;;  %v12014_v58 = vld [vmem:[#allocation10_spill] sm:$0xff] }
 0x15f   : > { %v1827_v27 = vcombine.high %v1826_v7, %v1826_v7  ;;  %v1904_v12 = vrot.slane %v1517_v28, %v7596_v34  ;;  %v2812_v63 = vadd.f32 %v2776_v37, %v2758_v30  ;;  %v7209_v57 = vpop.f32.mrf.mxu0  ;;  %v12011_v33 = vrot.slane %v8595_v1, 4 }
 0x160   : > { %v2813_v31 = vadd.f32 %v2777_v0, %v2759_v38  ;;  %v2841_v62 = vrot.slane %v2651_v14, 6  ;;  %v12012_v45 = vrot.slane %v8401_v59, 7  ;;  %v12013_v48 = vrot.slane %v8346_v21, 9  ;;  %v12016_v14 = vld [vmem:[#allocation8_spill] sm:$0xff]  ;;  %v12019_v57 = vld [vmem:[#allocation5_spill] sm:$0xff] }
 0x161   : > { %v2811_v16 = vadd.f32 %v12011_v33, %v2757_v11  ;;  %v12015_v35 = vrot.slane %v8403_v39, 4  ;;  %v2890_v19 = vadd.f32 %v2872_v47, %v1827_v27  ;;  %v1905_v32 = vcombine.high %v1904_v12, %v1904_v12  ;;  %v1522_v4 = vpop.f32.mrf.mxu0  ;;  %v12018_v38 = vld [vmem:[#allocation4_spill] sm:$0xff]  ;;  %v12022_v27 = vld [vmem:[#allocation6_spill] sm:$0xff] }
 0x162   : > { %v2433_v20 = vsel %vm8258_vm11, %v12013_v48, %v12012_v45  ;;  %v2891_v30 = vadd.f32 %v2873_v36, %v1904_v12  ;;  %v2707_v3 = vadd.f32 %v2648_v25, %v2611_v17  ;;  %v2876_v1 = vadd.f32 %v2840_v53, %v2812_v63  ;;  %v12023_v63 = vld [vmem:[#allocation21_spill] sm:$0xff]  ;;  %v12025_v33 = vld [vmem:[#allocation24_spill] sm:$0xff] }
 0x163   : > { %v2560_v40 = vadd.f32 %v12015_v35, %v12014_v58  ;;  %v2875_v2 = vadd.f32 %v2839_v49, %v2811_v16  ;;  %v2469_v9 = vrot.slane %v2433_v20, 2  ;;  %v12017_v7 = vrot.slane %v12016_v14, 6  ;;  %v7212_v36 = vpop.f32.mrf.mxu0  ;;  %v12028_v45 = vld [vmem:[#allocation25_spill] sm:$0xff] }
 0x164   : > { %v8834_v37 = vadd.f32 %v12018_v38, %v2890_v19  ;;  %v2892_v0 = vadd.f32 %v2874_v44, %v1905_v32  ;;  %v1976_v28 = vcombine.high %v1522_v4, %v1522_v4  ;;  %v2877_v11 = vadd.f32 %v2841_v62, %v2813_v31  ;;  %v12026_v62 = vld [vmem:[#allocation22_spill] sm:$0xff] }
 0x165   : > { %v2614_v51 = vadd.f32 %v12017_v7, %v2560_v40  ;;  %v8837_v39 = vadd.f32 %v12019_v57, %v2891_v30  ;;  %v1983_v47 = vrot.slane %v1522_v4, %v7596_v34  ;;  %v2505_v25 = vadd.f32 %v2469_v9, %v8346_v21  ;;  %v1527_v35 = vpop.f32.mrf.mxu0 }
 0x166   : > { %v12020_v17 = vrot.slane %v8632_v52, 7  ;;  %v12021_v49 = vrot.slane %v8630_v42, 9  ;;  %v8848_v12 = vadd.f32 %v12022_v27, %v2892_v0  ;;  %v1990_v44 = vrot.slane %v1976_v28, %v7596_v34 }
 0x167   : > { %v12024_v31 = vrot.slane %v12023_v63, 7  ;;  %v12027_v21 = vrot.slane %v12026_v62, 7  ;;  %v1991_v20 = vcombine.high %v1983_v47, %v1983_v47  ;;  %v2893_v58 = vadd.f32 %v2875_v2, %v1983_v47  ;;  %v12032_v2 = vld [vmem:[#allocation7_spill] sm:$0xff] }
 0x168   : > { %v2655_v53 = vsel %vm8258_vm11, %v12021_v49, %v12020_v17  ;;  %v12029_v40 = vrot.slane %v8401_v59, 4  ;;  %v12030_v32 = vrot.slane %v8612_v41, 2  ;;  %v2895_v4 = vadd.f32 %v2877_v11, %v1990_v44  ;;  %v7215_v41 = vpop.f32.mrf.mxu0 }
 0x169   : > { %v2658_v16 = vsel %vm8258_vm11, %v12025_v33, %v12024_v31  ;;  %v8861_v48 = vsel %vm8258_vm11, %v12028_v45, %v12027_v21  ;;  %v2064_v9 = vcombine.high %v1527_v35, %v1527_v35  ;;  %v8868_v14 = vrot.slane %v1527_v35, %v7596_v34  ;;  %v12043_v41 = vld [vmem:[#allocation23_spill] sm:$0xff] }
 0x16a   : > { %v2559_v19 = vadd.f32 %v12029_v40, %v2505_v25  ;;  %v2760_v30 = vadd.f32 %v12030_v32, %v2706_v18  ;;  %v12031_v7 = vrot.slane %v8614_v8, 2  ;;  %v2894_v28 = vadd.f32 %v2876_v1, %v1991_v20  ;;  %v1532_v31 = vpop.f32.mrf.mxu0 }
 0x16b   : > { %v8873_v36 = vadd.f32 %v12018_v38, %v2893_v58  ;;  %v12033_v47 = vrot.slane %v12032_v2, 6  ;;  %v12034_v59 = vrot.slane %v8616_v50, 2  ;;  %v8880_v18 = vadd.f32 %v12022_v27, %v2895_v4 }
 0x16c   : > { %v2761_v0 = vadd.f32 %v12031_v7, %v2707_v3  ;;  %v2078_v11 = vrot.slane %v2064_v9, %v7596_v34  ;;  %v2079_v8 = vcombine.high %v8868_v14, %v8868_v14  ;;  %v2779_v3 = vrot.slane %v8632_v52, 4  ;;  %v7218_v4 = vpop.f32.mrf.mxu0 }
 0x16d   : > { %v2613_v17 = vadd.f32 %v12033_v47, %v2559_v19  ;;  %v2762_v25 = vadd.f32 %v12034_v59, %v2708_v26  ;;  %v8887_v1 = vadd.f32 %v12019_v57, %v2894_v28  ;;  %v2951_v49 = vmax.f32 %v8834_v37, %v8873_v36  ;;  %v12039_v28 = vld [vmem:[#allocation14_spill] sm:$0xff]  ;;  %v12051_v37 = vld [vmem:[#allocation11_spill] sm:$0xff]  ;;  %v12052_v36 = vld [vmem:[#allocation9_spill] sm:$0xff] }
 0x16e   : > { %v12035_v50 = vrot.slane %v8630_v42, 4  ;;  %v2953_v33 = vmax.f32 %v8848_v12, %v8880_v18  ;;  %v2080_v21 = vcombine.high %v2078_v11, %v2078_v11  ;;  %v2815_v45 = vadd.f32 %v2779_v3, %v2761_v0 }
 0x16f   : > { %v2709_v44 = vadd.f32 %v2655_v53, %v2613_v17  ;;  %v12036_v20 = vrot.slane %v12023_v63, 4  ;;  %v2952_v35 = vmax.f32 %v8837_v39, %v8887_v1  ;;  %v2842_v40 = vrot.slane %v2655_v53, 6  ;;  %v12045_v1 = vld [vmem:[#allocation26_spill] sm:$0xff] }
 0x170   : > { %v2814_v26 = vadd.f32 %v12035_v50, %v2760_v30  ;;  %v2843_v19 = vrot.slane %v2658_v16, 6  ;;  %v2844_v32 = vrot.slane %v8861_v48, 6  ;;  %v8902_v42 = vrot.slane %v2828_v46, 2 }
 0x171   : > { %v2816_v58 = vadd.f32 %v12036_v20, %v2762_v25  ;;  %v2710_v30 = vadd.f32 %v2658_v16, %v2614_v51  ;;  %v8906_v9 = vrot.slane %v2831_v22, 2  ;;  %v12037_v39 = vmov 0.0   ;;  %v8956_v51 = vpop.f32.mrf.mxu0  ;;  %v12038_v16 = vld [vmem:[#allocation13_spill] sm:$0xff] }
 0x172   : > { %v2878_v14 = vadd.f32 %v2842_v40, %v2814_v26  ;;  %v2879_v7 = vadd.f32 %v2843_v19, %v2815_v45  ;;  %3064 = vst.msk [vmem:[#allocation3 + $0x10] sm:$0xff] %vm3060_vm12, %v12037_v39  ;;  %3066 = vst.msk [vmem:[#allocation3 + $0x20] sm:$0xff] %vm3060_vm12, %v12037_v39  ;;  %v2151_v53 = vcombine.high %v1532_v31, %v1532_v31  ;;  %v12040_v2 = vrot.slane %v12039_v28, 6 }
 0x173   : > { %v2880_v0 = vadd.f32 %v2844_v32, %v2816_v58  ;;  %3065 = vst.msk [vmem:[#allocation3 + $0x18] sm:$0xf] %vm3062_vm13, %v12037_v39  ;;  %3067 = vst.msk [vmem:[#allocation3 + $0x28] sm:$0xf] %vm3062_vm13, %v12037_v39  ;;  %v12041_v17 = vrot.slane %v8661_v55, 7  ;;  %v12042_v59 = vrot.slane %v8659_v6, 9  ;;  %v7221_v40 = vpop.f32.mrf.mxu0 }
 0x174   : > { %3068 = vst.msk [vmem:[#allocation3 + $0x30] sm:$0xff] %vm3060_vm12, %v12037_v39  ;;  %3070 = vst.msk [vmem:[#allocation3 + $0x40] sm:$0xff] %vm3060_vm12, %v12037_v39  ;;  %v2616_v47 = vadd.f32 %v12040_v2, %v12038_v16  ;;  %v12044_v3 = vrot.slane %v12043_v41, 7  ;;  %v2896_v26 = vadd.f32 %v2878_v14, %v2079_v8  ;;  %v2897_v31 = vadd.f32 %v2879_v7, %v2078_v11 }
 0x175   : > { %3069 = vst.msk [vmem:[#allocation3 + $0x38] sm:$0xf] %vm3062_vm13, %v12037_v39  ;;  %3071 = vst.msk [vmem:[#allocation3 + $0x48] sm:$0xf] %vm3062_vm13, %v12037_v39  ;;  %v2665_v25 = vsel %vm8258_vm11, %v12042_v59, %v12041_v17  ;;  %v2898_v45 = vadd.f32 %v2880_v0, %v2080_v21  ;;  %v12046_v20 = vrot.slane %v8632_v52, 2  ;;  %v2158_v19 = vrot.slane %v2151_v53, %v7596_v34  ;;  %v1542_v21 = vpop.f32.mrf.mxu0 }
 0x176   : > { %3072 = vst.msk [vmem:[#allocation3 + $0x50] sm:$0xff] %vm3060_vm12, %v12037_v39  ;;  %3061 = vst.msk [vmem:[#allocation3] sm:$0xff] %vm3060_vm12, %v12037_v39  ;;  %v8972_v50 = vsel %vm8258_vm11, %v12045_v1, %v12044_v3  ;;  %v2712_v32 = vadd.f32 %v2665_v25, %v2616_v47  ;;  %v12047_v4 = vrot.slane %v12023_v63, 2  ;;  %v2845_v28 = vrot.slane %v2665_v25, 6  ;;  %v12050_v1 = vld [vmem:[#allocation16_spill] sm:$0xff] }
 0x177   : > { %3073 = vst.msk [vmem:[#allocation3 + $0x58] sm:$0xf] %vm3062_vm13, %v12037_v39  ;;  %3063 = vst.msk [vmem:[#allocation3 + $0x8] sm:$0xf] %vm3062_vm13, %v12037_v39  ;;  %v2763_v58 = vadd.f32 %v12046_v20, %v2709_v44  ;;  %v2939_v2 = vadd.f32 %v12018_v38, %v2896_v26  ;;  %v2940_v17 = vadd.f32 %v12019_v57, %v2897_v31  ;;  %v12048_v11 = vrot.slane %v8659_v6, 4  ;;  %v7224_v47 = vpop.f32.mrf.mxu0 }
 0x178   : > { %3074 = vst.msk [vmem:[#allocation3 + $0x60] sm:$0xff] %vm3060_vm12, %v12037_v39  ;;  %3076 = vst.msk [vmem:[#allocation3 + $0x70] sm:$0xff] %vm3060_vm12, %v12037_v39  ;;  %v2764_v16 = vadd.f32 %v12047_v4, %v2710_v30  ;;  %v2941_v59 = vadd.f32 %v12022_v27, %v2898_v45  ;;  %v2159_v52 = vcombine.high %v2158_v19, %v2158_v19  ;;  %v12049_v44 = vrot.slane %v8661_v55, 4 }
 0x179   : > { %3075 = vst.msk [vmem:[#allocation3 + $0x68] sm:$0xf] %vm3062_vm13, %v12037_v39  ;;  %3077 = vst.msk [vmem:[#allocation3 + $0x78] sm:$0xf] %vm3062_vm13, %v12037_v39  ;;  %v2817_v8 = vadd.f32 %v12048_v11, %v2763_v58  ;;  %v2846_v7 = vrot.slane %v8972_v50, 6  ;;  %v2230_v63 = vcombine.high %v8956_v51, %v8956_v51  ;;  %v2954_v30 = vmax.f32 %v2951_v49, %v2939_v2  ;;  %v9002_v58 = vpop.f32.mrf.mxu0 }
 0x17a   : > { %3078 = vst.msk [vmem:[#allocation3 + $0x80] sm:$0xff] %vm3060_vm12, %v12037_v39  ;;  %3080 = vst.msk [vmem:[#allocation3 + $0x90] sm:$0xff] %vm3060_vm12, %v12037_v39  ;;  %v2818_v14 = vadd.f32 %v12049_v44, %v2764_v16  ;;  %v2955_v0 = vmax.f32 %v2952_v35, %v2940_v17  ;;  %v2956_v6 = vmax.f32 %v2953_v33, %v2941_v59  ;;  %v2582_v26 = vrot.slane %v12050_v1, 6  ;;  %v12054_v33 = vld [vmem:[#allocation17_spill] sm:$0xff] }
 0x17b   : > { %3079 = vst.msk [vmem:[#allocation3 + $0x88] sm:$0xf] %vm3062_vm13, %v12037_v39  ;;  %3081 = vst.msk [vmem:[#allocation3 + $0x98] sm:$0xf] %vm3062_vm13, %v12037_v39  ;;  %v2881_v53 = vadd.f32 %v2845_v28, %v2817_v8  ;;  %v2244_v3 = vrot.slane %v2230_v63, %v7596_v34  ;;  %v2237_v20 = vrot.slane %v8956_v51, %v7596_v34  ;;  %v12053_v49 = vrot.slane %v12052_v36, 6 }
 0x17c   : > { %3082 = vst.msk [vmem:[#allocation3 + $0xa0] sm:$0xff] %vm3060_vm12, %v12037_v39  ;;  %3084 = vst.msk [vmem:[#allocation3 + $0xb0] sm:$0xff] %vm3060_vm12, %v12037_v39  ;;  %v2882_v25 = vadd.f32 %v2846_v7, %v2818_v14  ;;  %v2965_v31 = vcombine.low %v2954_v30, %v2955_v0  ;;  %v2983_v45 = vcombine.low %v2955_v0, %v2956_v6  ;;  %v12055_v4 = vrot.slane %v12043_v41, 7 }
 0x17d   : > { %3083 = vst.msk [vmem:[#allocation3 + $0xa8] sm:$0xf] %vm3062_vm13, %v12037_v39  ;;  %3085 = vst.msk [vmem:[#allocation3 + $0xb8] sm:$0xf] %vm3062_vm13, %v12037_v39  ;;  %v2615_v35 = vadd.f32 %v12053_v49, %v12051_v37  ;;  %v2899_v12 = vadd.f32 %v2881_v53, %v2158_v19  ;;  %v2618_v40 = vadd.f32 %v2582_v26, %v12054_v33  ;;  %v12056_v51 = vrot.slane %v8684_v23, 9  ;;  %v7227_v19 = vpop.f32.mrf.mxu0  ;;  %v12060_v26 = vld [vmem:[#allocation12_spill] sm:$0xff] }
 0x17e   : > { %v9004_v18 = vadd.f32 %v2882_v25, %v2159_v52  ;;  %v2669_v16 = vrot.slane %v12055_v4, 2  ;;  %v2972_v28 = vrot.slane %v2965_v31, %v7596_v34  ;;  %v2990_v2 = vrot.slane %v2983_v45, %v7596_v34  ;;  %v12062_v37 = vld [vmem:[#allocation15_spill] sm:$0xff] }
 0x17f   : > { %v2245_v17 = vcombine.high %v2244_v3, %v2244_v3  ;;  %v9017_v59 = vsel %vm8258_vm11, %v12056_v51, %v2674_v5  ;;  %v12057_v11 = vrot.slane %v8682_v54, 7  ;;  %v2711_v52 = vadd.f32 %v8861_v48, %v2615_v35  ;;  %v1552_v53 = vpop.f32.mrf.mxu0 }
 0x180   : > { %v12058_v44 = vrot.slane %v8661_v55, 2  ;;  %v2783_v7 = vrot.slane %v12043_v41, 4  ;;  %v2975_v63 = vsel %vm2974_vm14, %v2972_v28, -inf  ;;  %v2993_v30 = vsel %vm2992_vm15, %v2990_v2, -inf }
 0x181   : > { %v2671_v8 = vsel %vm8258_vm11, %v2669_v16, %v12057_v11  ;;  %v2976_v47 = vrot.slane %v2975_v63, 4  ;;  %v2994_v25 = vrot.slane %v2993_v30, 4  ;;  %v12059_v3 = vrot.slane %v12026_v62, 2  ;;  %v7230_v35 = vpop.f32.mrf.mxu0 }
 0x182   : > { %v2766_v14 = vadd.f32 %v12058_v44, %v2712_v32  ;;  %v2714_v0 = vadd.f32 %v2671_v8, %v2618_v40  ;;  %v2847_v6 = vrot.slane %v2671_v8, 6  ;;  %v9034_v55 = vadd.f32 %v12018_v38, %v2899_v12 }
 0x183   : > { %v2765_v1 = vadd.f32 %v12059_v3, %v2711_v52  ;;  %v2848_v32 = vrot.slane %v9017_v59, 6  ;;  %v12061_v31 = vrot.slane %v12052_v36, 4  ;;  %v2581_v49 = vrot.slane %v12062_v37, 6  ;;  %v1556_v28 = vpop.f32.mrf.mxu0 }
 0x184   : > { %v2820_v48 = vadd.f32 %v2784_v56, %v2766_v14  ;;  %v2977_v33 = vmax.f32 %v2975_v63, %v2976_v47  ;;  %v2995_v40 = vmax.f32 %v2993_v30, %v2994_v25  ;;  %v9042_v4 = vrot.slane %v1542_v21, %v7596_v34 }
 0x185   : > { %v2563_v45 = vadd.f32 %v12061_v31, %v12060_v26  ;;  %v2819_v62 = vadd.f32 %v2783_v7, %v2765_v1  ;;  %v2676_v12 = vrot.slane %v2674_v5, 2  ;;  %v2677_v16 = vrot.slane %v8701_v13, 7  ;;  %v7233_v44 = vpop.f32.mrf.mxu0  ;;  %v12063_v5 = vld [vmem:[#allocation19_spill] sm:$0xff] }
 0x186   : > { %v2884_v23 = vadd.f32 %v2848_v32, %v2820_v48  ;;  %v2978_v2 = vrot.slane %v2977_v33, 2  ;;  %v2996_v36 = vrot.slane %v2995_v40, 2  ;;  %v2731_v19 = vrot.slane %v12043_v41, 2 }
 0x187   : > { %v2617_v56 = vadd.f32 %v2581_v49, %v2563_v45  ;;  %v2883_v51 = vadd.f32 %v2847_v6, %v2819_v62  ;;  %v2678_v8 = vsel %vm8258_vm11, %v2676_v12, %v2677_v16  ;;  %v2679_v52 = vrot.slane %v2677_v16, 2  ;;  %v1560_v3 = vpop.f32.mrf.mxu0 }
 0x188   : > { %v2902_v11 = vadd.f32 %v2884_v23, %v2245_v17  ;;  %v2979_v14 = vmax.f32 %v2977_v33, %v2978_v2  ;;  %v2997_v7 = vmax.f32 %v2995_v40, %v2996_v36  ;;  %v2716_v30 = vadd.f32 %v2678_v8, %v12063_v5 }
 0x189   : > { %v2713_v21 = vadd.f32 %v8972_v50, %v2617_v56  ;;  %v2901_v63 = vadd.f32 %v2883_v51, %v2237_v20  ;;  %v2305_v53 = vcombine.high %v9042_v4, %v9042_v4  ;;  %v12064_v6 = vrot.slane %v8703_v10, 7  ;;  %v12066_v20 = vld [vmem:[#allocation20_spill] sm:$0xff]  ;;  %v7236_v35 = vpop.f32.mrf.mxu0 }
 0x18a   : > { %v12065_v47 = vrot.slane %v8682_v54, 2  ;;  %v2980_v50 = vrot.slane %v2979_v14, 1  ;;  %v2998_v1 = vrot.slane %v2997_v7, 1  ;;  %v9061_v48 = vadd.f32 %v12018_v38, %v2902_v11 }
 0x18b   : > { %v2681_v41 = vsel %vm8258_vm11, %v2679_v52, %v12064_v6  ;;  %v2767_v17 = vadd.f32 %v2731_v19, %v2713_v21  ;;  %v12067_v26 = vrot.slane %v8701_v13, 2  ;;  %v2785_v45 = vrot.slane %v8686_v60, 4 }
 0x18c   : > { %v2768_v25 = vadd.f32 %v12065_v47, %v2714_v0  ;;  %v2717_v32 = vadd.f32 %v2681_v41, %v12066_v20  ;;  %v2786_v37 = vrot.slane %v8701_v13, 4  ;;  %v2849_v49 = vrot.slane %v2678_v8, 6  ;;  %v12068_v13 = vld [vmem:[#allocation18_spill] sm:$0xff]  ;;  %v3371_v20 = vld [vmem:[%s11880_s4 + $0xa8] sm:$0xff] }
 0x18d   : > { %v2770_v31 = vadd.f32 %v12067_v26, %v2716_v30  ;;  %v2981_v33 = vmax.f32 %v2979_v14, %v2980_v50  ;;  %v2999_v54 = vmax.f32 %v2997_v7, %v2998_v1  ;;  %v9069_v0 = vadd.f32 %v12022_v27, %v2901_v63  ;;  %v3290_v7 = vld [vmem:[#allocation3] sm:$0xff] }
 0x18e   : > { %v2850_v40 = vrot.slane %v2681_v41, 6  ;;  %v2821_v62 = vadd.f32 %v2785_v45, %v2767_v17  ;;  %v2822_v23 = vadd.f32 %v2786_v37, %v2768_v25  ;;  %v2341_v56 = vcombine.high %v9002_v58, %v9002_v58  ;;  %v3370_v26 = vld [vmem:[%s11880_s4 + $0xa0] sm:$0xff] }
 0x18f   : > { %v2348_v12 = vrot.slane %v9002_v58, %v7596_v34  ;;  %3110 = vst.msk [vmem:[#allocation3 + $0x11] sm:$0x1f] %vm3109_vm2, %v2981_v33  ;;  %3111 = vst.msk [vmem:[#allocation3 + $0x21] sm:$0x1f] %vm3109_vm2, %v2981_v33  ;;  %v2715_v58 = vadd.f32 %v9017_v59, %v12068_v13  ;;  %v2733_v16 = vrot.slane %v8686_v60, 2  ;;  %v12069_v28 = vrot.slane %v8703_v10, 2 }
 0x190   : > { %3112 = vst.msk [vmem:[#allocation3 + $0x31] sm:$0x1f] %vm3109_vm2, %v2981_v33  ;;  %3113 = vst.msk [vmem:[#allocation3 + $0x41] sm:$0x1f] %vm3109_vm2, %v2981_v33  ;;  %v12070_v36 = vrot.slane %v8722_v43, 4  ;;  %v2885_v19 = vadd.f32 %v2849_v49, %v2821_v62  ;;  %v2886_v11 = vadd.f32 %v2850_v40, %v2822_v23  ;;  %v2355_v8 = vrot.slane %v2341_v56, %v7596_v34  ;;  %v3361_v40 = vld [vmem:[%s11880_s4 + $0x58] sm:$0xff] }
 0x191   : > { %3114 = vst.msk [vmem:[#allocation3 + $0x51] sm:$0x1f] %vm3109_vm2, %v2981_v33  ;;  %3115 = vst.msk [vmem:[#allocation3 + $0x16] sm:$0x1f] %vm3109_vm2, %v2999_v54  ;;  %v2771_v2 = vadd.f32 %v12069_v28, %v2717_v32  ;;  %v2356_v52 = vcombine.high %v2348_v12, %v2348_v12  ;;  %v2769_v21 = vadd.f32 %v2733_v16, %v2715_v58  ;;  %v12071_v44 = vrot.slane %v8724_v61, 4  ;;  %v3352_v56 = vld [vmem:[%s11880_s4 + $0x10] sm:$0xff] }
 0x192   : > { %3116 = vst.msk [vmem:[#allocation3 + $0x26] sm:$0x1f] %vm3109_vm2, %v2999_v54  ;;  %3117 = vst.msk [vmem:[#allocation3 + $0x36] sm:$0x1f] %vm3109_vm2, %v2999_v54  ;;  %v2824_v51 = vadd.f32 %v12070_v36, %v2770_v31  ;;  %v12072_v59 = vrot.slane %v8705_v15, 9  ;;  %v2832_v10 = vsel %vm8258_vm11, %v8902_v42, %v2831_v22  ;;  %v2903_v63 = vadd.f32 %v2885_v19, %v9042_v4  ;;  %v3373_v36 = vld [vmem:[%s11880_s4 + $0xb8] sm:$0xff] }
 0x193   : > { %3118 = vst.msk [vmem:[#allocation3 + $0x46] sm:$0x1f] %vm3109_vm2, %v2999_v54  ;;  %3119 = vst.msk [vmem:[#allocation3 + $0x56] sm:$0x1f] %vm3109_vm2, %v2999_v54  ;;  %v2825_v14 = vadd.f32 %v12071_v44, %v2771_v2  ;;  %v2904_v5 = vadd.f32 %v2886_v11, %v2305_v53  ;;  %v2835_v43 = vsel %vm8258_vm11, %v8906_v9, %v8743_v24  ;;  %v12073_v6 = vrot.slane %v8705_v15, 4  ;;  %v3362_v54 = vld [vmem:[%s11880_s4 + $0x60] sm:$0xff] }
 0x194   : > { %v2829_v60 = vsel %vm8258_vm11, %v12072_v59, %v2828_v46  ;;  %v2852_v46 = vrot.slane %v2832_v10, 6  ;;  %v2853_v17 = vrot.slane %v2835_v43, 6  ;;  %v2957_v61 = vmax.f32 %v9034_v55, %v9061_v48  ;;  %v3291_v9 = vld [vmem:[#allocation3 + $0x8] sm:$0xf] }
 0x195   : > { %v2851_v30 = vrot.slane %v2829_v60, 6  ;;  %v2823_v41 = vadd.f32 %v12073_v6, %v2769_v21  ;;  %v2943_v22 = vadd.f32 %v12019_v57, %v9004_v18  ;;  %v2946_v42 = vadd.f32 %v12019_v57, %v2903_v63  ;;  %v3379_v55 = vld [vmem:[%s11880_s4 + $0xe8] sm:$0xff]  ;;  %v3364_v21 = vld [vmem:[%s11880_s4 + $0x70] sm:$0xff]  ;;  %v3354_v6 = vld [vmem:[%s11880_s4 + $0x20] sm:$0xff] }
 0x196   : > { %v2947_v4 = vadd.f32 %v12022_v27, %v2904_v5  ;;  %v3338_v53 = vcombine.high %v3290_v7, %v3290_v7  ;;  %v2888_v29 = vadd.f32 %v2852_v46, %v2824_v51  ;;  %v2889_v24 = vadd.f32 %v2853_v17, %v2825_v14  ;;  %v3372_v51 = vld [vmem:[%s11880_s4 + $0xb0] sm:$0xff]  ;;  %v3363_v10 = vld [vmem:[%s11880_s4 + $0x68] sm:$0xff] }
 0x197   : > { %v2887_v47 = vadd.f32 %v2851_v30, %v2823_v41  ;;  %v2958_v25 = vmax.f32 %v2943_v22, %v2946_v42  ;;  %v3355_v43 = vld [vmem:[%s11880_s4 + $0x28] sm:$0xff]  ;;  %v9211_v42 = vld [vmem:[%s11880_s4 + $0x118] sm:$0xff] }
 0x198   : > { %v2959_v15 = vmax.f32 %v9069_v0, %v2947_v4  ;;  %v9120_v3 = vcombine.low %v3290_v7, %v3338_v53  ;;  %v3292_v50 = vld [vmem:[#allocation3 + $0x10] sm:$0xff]  ;;  %v2906_v1 = vadd.f32 %v2888_v29, %v2356_v52  ;;  %v2907_v48 = vadd.f32 %v2889_v24, %v2355_v8  ;;  %v3293_v33 = vld [vmem:[#allocation3 + $0x18] sm:$0xf]  ;;  %v3383_v30 = vld [vmem:[%s11880_s4 + $0x108] sm:$0xff] }
 0x199   : > { %v2905_v18 = vadd.f32 %v2887_v47, %v2348_v12  ;;  %v3339_v32 = vcombine.high %v3292_v50, %v3292_v50  ;;  %v9133_v31 = vcombine.low %v3291_v9, %v3292_v50  ;;  %v3294_v45 = vld [vmem:[#allocation3 + $0x20] sm:$0xff]  ;;  %v3381_v12 = vld [vmem:[%s11880_s4 + $0xf8] sm:$0xff]  ;;  %v3295_v19 = vld [vmem:[#allocation3 + $0x28] sm:$0xf] }
 0x19a   : > { %6819 = vmatmul.mubr.msk.f32.vlgmr.msra.gmra.mxu0 %vm3060_vm12, %v9120_v3  ;;  %v2949_v49 = vadd.f32 %v12019_v57, %v2906_v1  ;;  %v2950_v35 = vadd.f32 %v12022_v27, %v2907_v48  ;;  %v3353_v27 = vld [vmem:[%s11880_s4 + $0x18] sm:$0xff]  ;;  %v3340_v23 = vcombine.high %v3294_v45, %v3294_v45  ;;  %v3296_v11 = vld [vmem:[#allocation3 + $0x30] sm:$0xff]  ;;  %v3298_v5 = vld [vmem:[#allocation3 + $0x40] sm:$0xff] }
 0x19b   : > { %v2948_v37 = vadd.f32 %v12018_v38, %v2905_v18  ;;  %3632 = vmatpush1.msra.mxu0 %v3379_v55  ;;  %3510 = vmatprep.mubr.f32.mxu0 %v12037_v39  ;;  %v9142_v0 = vcombine.low %v3339_v32, %v3293_v33  ;;  %v9186_v59 = vcombine.low %v3295_v19, %v3296_v11  ;;  %v3297_v17 = vld [vmem:[#allocation3 + $0x38] sm:$0xf]  ;;  %v3375_v47 = vld [vmem:[%s11880_s4 + $0xc8] sm:$0xff]  ;;  %v3300_v18 = vld [vmem:[#allocation3 + $0x50] sm:$0xff] }
 0x19c   : > { %3633 = vmatprep.subr.mxu0 %v3371_v20  ;;  %v2961_v62 = vmax.f32 %v2958_v25, %v2949_v49  ;;  %v2962_v57 = vmax.f32 %v2959_v15, %v2950_v35  ;;  %v9163_v2 = vcombine.low %v3294_v45, %v3340_v23  ;;  %v3341_v60 = vcombine.high %v3296_v11, %v3296_v11  ;;  %v3374_v25 = vld [vmem:[%s11880_s4 + $0xc0] sm:$0xff]  ;;  %v3299_v50 = vld [vmem:[#allocation3 + $0x48] sm:$0xf]  ;;  %v3365_v32 = vld [vmem:[%s11880_s4 + $0x78] sm:$0xff] }
 0x19d   : > { %v2960_v38 = vmax.f32 %v2957_v61, %v2948_v37  ;;  %3634 = vmatpush1.msra.mxu0 %v3370_v26  ;;  %6821 = vmatmul.mubr.msk.f32.vlgmr.msra.gmra.mxu1 %vm3060_vm12, %v9142_v0  ;;  %v3342_v22 = vcombine.high %v3298_v5, %v3298_v5  ;;  %v3366_v1 = vld [vmem:[%s11880_s4 + $0x80] sm:$0xff]  ;;  %v9247_v48 = vcombine.low %v3299_v50, %v3300_v18  ;;  %v3357_v26 = vld [vmem:[%s11880_s4 + $0x38] sm:$0xff]  ;;  %v3356_v49 = vld [vmem:[%s11880_s4 + $0x30] sm:$0xff] }
 0x19e   : > { %6820 = vmatmul.mubr.msk.f32.gmra.mxu0 %vm3060_vm12, %v9133_v31  ;;  %3635 = vmatprep.subr.mxu0 %v3362_v54  ;;  %v3019_v58 = vcombine.low %v2961_v62, %v2962_v57  ;;  %v9206_v61 = vcombine.low %v3341_v60, %v3297_v17  ;;  %v3343_v20 = vcombine.high %v3300_v18, %v3300_v18  ;;  %v3301_v45 = vld [vmem:[#allocation3 + $0x58] sm:$0xf]  ;;  %v3284_v35 = vld [vmem:[%s11879_s3 + $0x2e8] sm:$0x3f] }
 0x19f   : > { %v3002_v13 = vcombine.low %v2960_v38, %v2961_v62  ;;  %3636 = vmatpush1.msra.mxu0 %v3361_v40  ;;  %3671 = vmatprep.mubr.f32.mxu0 %v12037_v39  ;;  %v9223_v9 = vcombine.low %v3298_v5, %v3342_v22  ;;  %v3313_v60 = vld [vmem:[#allocation3 + $0xb8] sm:$0xf]  ;;  %v3367_v5 = vld [vmem:[%s11880_s4 + $0x88] sm:$0xff]  ;;  %v3265_v22 = vld [vmem:[%s11879_s3 + $0x250] sm:$0xff] }
 0x1a0   : > { %3637 = vmatprep.subr.mxu0 %v3353_v27  ;;  %v3026_v28 = vrot.slane %v3019_v58, %v7596_v34  ;;  %3803 = vmatpush1.msra.mxu1 %v3381_v12  ;;  %v9261_v37 = vcombine.low %v3343_v20, %v3301_v45  ;;  %v3266_v17 = vld [vmem:[%s11879_s3 + $0x258] sm:$0xff]  ;;  %v3220_v50 = vld [vmem:[%s11879_s3 + $0xe8] sm:$0xff]  ;;  %v3203_v20 = vld [vmem:[%s11879_s3 + $0x60] sm:$0xff] }
 0x1a1   : > { %v3009_v16 = vrot.slane %v3002_v13, %v7596_v34  ;;  %3638 = vmatpush1.msra.mxu0 %v3352_v56  ;;  %3522 = vmatprep.mubr.f32.mxu1 %v12037_v39  ;;  %v3384_v34 = vld [vmem:[%s11880_s4 + $0x110] sm:$0xff]  ;;  %v3212_v18 = vld [vmem:[%s11879_s3 + $0xa8] sm:$0xff] }
 0x1a2   : > { %6837 = vmatmul.mubr.msk.f32.vlgmr.msra.gmra.mxu0 %vm3060_vm12, %v9120_v3  ;;  %v3028_v52 = vsel %vm2992_vm15, %v3026_v28, -inf  ;;  %6822 = vmatmul.mubr.msk.f32.gmra.mxu1 %vm3060_vm12, %v9163_v2  ;;  %v3193_v45 = vld [vmem:[%s11879_s3 + $0x10] sm:$0xff] }
 0x1a3   : > { %v3011_v8 = vsel %vm2974_vm14, %v3009_v16, -inf  ;;  %3677 = vmatprep.mubr.f32.mxu0 %v12037_v39  ;;  %v3029_v14 = vrot.slane %v3028_v52, 4  ;;  %3528 = vmatprep.mubr.f32.mxu1 %v12037_v39 }
 0x1a4   : > { %v3012_v44 = vrot.slane %v3011_v8, 4  ;;  %3804 = vmatprep.subr.mxu1 %v3373_v36  ;;  %3971 = vmatprep.subr.mxu0 %v3384_v34 }
 0x1a5   : > { %3805 = vmatpush1.msra.mxu1 %v3372_v51  ;;  %v3030_v63 = vmax.f32 %v3028_v52, %v3029_v14  ;;  %3972 = vmatpush1.msra.mxu0 %v3383_v30  ;;  %v3282_v30 = vld [vmem:[%s11879_s3 + $0x2d8] sm:$0x3f] }
 0x1a6   : > { %v3013_v7 = vmax.f32 %v3011_v8, %v3012_v44  ;;  %6838 = vmatmul.mubr.msk.f32.gmra.mxu0 %vm3060_vm12, %v9133_v31  ;;  %3806 = vmatprep.subr.mxu1 %v3364_v21  ;;  %v3312_v44 = vld [vmem:[#allocation3 + $0xb0] sm:$0xff] }
 0x1a7   : > { %6823 = vmatmul.mubr.msk.f32.gmra.mxu1 %vm3060_vm12, %v9186_v59  ;;  %3683 = vmatprep.mubr.f32.mxu0 %v12037_v39  ;;  %v3031_v46 = vrot.slane %v3030_v63, 2  ;;  %v3349_v14 = vcombine.high %v3312_v44, %v3312_v44 }
 0x1a8   : > { %v3014_v41 = vrot.slane %v3013_v7, 2  ;;  %3534 = vmatprep.mubr.f32.mxu1 %v12037_v39  ;;  %3807 = vmatpush1.msra.mxu1 %v3363_v10 }
 0x1a9   : > { %3808 = vmatprep.subr.mxu1 %v3355_v43  ;;  %v3032_v53 = vmax.f32 %v3030_v63, %v3031_v46  ;;  %3973 = vmatprep.subr.mxu0 %v3375_v47  ;;  %v3376_v63 = vld [vmem:[%s11880_s4 + $0xd0] sm:$0xff]  ;;  %v3358_v43 = vld [vmem:[%s11880_s4 + $0x40] sm:$0xff]  ;;  %v3274_v46 = vld [vmem:[%s11879_s3 + $0x298] sm:$0xff] }
 0x1aa   : > { %v3015_v4 = vmax.f32 %v3013_v7, %v3014_v41  ;;  %6839 = vmatmul.mubr.msk.f32.gmra.mxu0 %vm3060_vm12, %v9142_v0  ;;  %3809 = vmatpush1.msra.mxu1 %v3354_v6  ;;  %v9339_v7 = vcombine.low %v3349_v14, %v3313_v60  ;;  %v3283_v6 = vld [vmem:[%s11879_s3 + $0x2e0] sm:$0x3f]  ;;  %v3210_v14 = vld [vmem:[%s11879_s3 + $0x98] sm:$0xff] }
 0x1ab   : > { %6824 = vmatmul.mubr.msk.f32.gmra.mxu1 %vm3060_vm12, %v9206_v61  ;;  %3689 = vmatprep.mubr.f32.mxu0 %v12037_v39  ;;  %v3033_v24 = vrot.slane %v3032_v53, 1  ;;  %v3275_v41 = vld [vmem:[%s11879_s3 + $0x2a0] sm:$0xff] }
 0x1ac   : > { %v3016_v29 = vrot.slane %v3015_v4, 1  ;;  %3540 = vmatprep.mubr.f32.mxu1 %v12037_v39  ;;  %7237 = vmatprep.subr.mxu1 %v9211_v42  ;;  %v3247_v47 = vld [vmem:[%s11879_s3 + $0x1c0] sm:$0xff] }
 0x1ad   : > { %v3034_v55 = vmax.f32 %v3032_v53, %v3033_v24  ;;  %3974 = vmatpush1.msra.mxu0 %v3374_v25  ;;  %v3248_v53 = vld [vmem:[%s11879_s3 + $0x1c8] sm:$0xff]  ;;  %v3238_v24 = vld [vmem:[%s11879_s3 + $0x178] sm:$0xff] }
 0x1ae   : > { %v3017_v15 = vmax.f32 %v3015_v4, %v3016_v29  ;;  %6840 = vmatmul.mubr.msk.f32.gmra.mxu0 %vm3060_vm12, %v9163_v2  ;;  %3975 = vmatprep.subr.mxu0 %v3366_v1  ;;  %v3256_v4 = vld [vmem:[%s11879_s3 + $0x208] sm:$0xff]  ;;  %v3239_v29 = vld [vmem:[%s11879_s3 + $0x180] sm:$0xff]  ;;  %v3230_v25 = vld [vmem:[%s11879_s3 + $0x138] sm:$0xff] }
 0x1af   : > { %6825 = vmatmul.mubr.msk.f32.gmra.mxu1 %vm3060_vm12, %v9223_v9  ;;  %3695 = vmatprep.mubr.f32.mxu0 %v12037_v39  ;;  %3126 = vst.msk [vmem:[#allocation3 + $0x66] sm:$0x1f] %vm3109_vm2, %v3034_v55  ;;  %3127 = vst.msk [vmem:[#allocation3 + $0x76] sm:$0x1f] %vm3109_vm2, %v3034_v55  ;;  %v3211_v1 = vld [vmem:[%s11879_s3 + $0xa0] sm:$0xff] }
 0x1b0   : > { %3121 = vst.msk [vmem:[#allocation3 + $0x61] sm:$0x1f] %vm3109_vm2, %v3017_v15  ;;  %3122 = vst.msk [vmem:[#allocation3 + $0x71] sm:$0x1f] %vm3109_vm2, %v3017_v15  ;;  %3546 = vmatprep.mubr.f32.mxu1 %v12037_v39  ;;  %3976 = vmatpush1.msra.mxu0 %v3365_v32  ;;  %v3202_v32 = vld [vmem:[%s11879_s3 + $0x58] sm:$0xff] }
 0x1b1   : > { %3123 = vst.msk [vmem:[#allocation3 + $0x81] sm:$0x1f] %vm3109_vm2, %v3017_v15  ;;  %3124 = vst.msk [vmem:[#allocation3 + $0x91] sm:$0x1f] %vm3109_vm2, %v3017_v15  ;;  %3977 = vmatprep.subr.mxu0 %v3357_v26  ;;  %v3194_v26 = vld [vmem:[%s11879_s3 + $0x18] sm:$0xff] }
 0x1b2   : > { %3125 = vst.msk [vmem:[#allocation3 + $0xa1] sm:$0x1f] %vm3109_vm2, %v3017_v15  ;;  %3128 = vst.msk [vmem:[#allocation3 + $0x86] sm:$0x1f] %vm3109_vm2, %v3034_v55  ;;  %6841 = vmatmul.mubr.msk.f32.gmra.mxu0 %vm3060_vm12, %v9186_v59  ;;  %v3229_v15 = vld [vmem:[%s11879_s3 + $0x130] sm:$0xff] }
 0x1b3   : > { %3129 = vst.msk [vmem:[#allocation3 + $0x96] sm:$0x1f] %vm3109_vm2, %v3034_v55  ;;  %3130 = vst.msk [vmem:[#allocation3 + $0xa6] sm:$0x1f] %vm3109_vm2, %v3034_v55  ;;  %6826 = vmatmul.mubr.msk.f32.gmra.mxu1 %vm3060_vm12, %v9247_v48  ;;  %3701 = vmatprep.mubr.f32.mxu0 %v12037_v39  ;;  %v3221_v55 = vld [vmem:[%s11879_s3 + $0xf0] sm:$0xff] }
 0x1b4   : > { %3552 = vmatprep.mubr.f32.mxu1 %v12037_v39  ;;  %3978 = vmatpush1.msra.mxu0 %v3356_v49  ;;  %v3288_v49 = vld [vmem:[%s11879_s3 + $0x308] sm:$0x3f] }
 0x1b5   : > { %6929 = vmatprep.subr.msk.mxu0 %vm870_vm0, %v3284_v35  ;;  %v3281_v35 = vld [vmem:[%s11879_s3 + $0x2d0] sm:$0x3f] }
 0x1b6   : > { %6842 = vmatmul.mubr.msk.f32.gmra.mxu0 %vm3060_vm12, %v9206_v61  ;;  %v3303_v38 = vld [vmem:[#allocation3 + $0x68] sm:$0xf]  ;;  %v3305_v56 = vld [vmem:[#allocation3 + $0x78] sm:$0xf] }
 0x1b7   : > { %6827 = vmatmul.mubr.msk.f32.gmra.mxu1 %vm3060_vm12, %v9261_v37  ;;  %3707 = vmatprep.mubr.f32.mxu0 %v12037_v39  ;;  %v3302_v33 = vld [vmem:[#allocation3 + $0x60] sm:$0xff]  ;;  %v3304_v62 = vld [vmem:[#allocation3 + $0x70] sm:$0xff] }
 0x1b8   : > { %3558 = vmatprep.mubr.f32.mxu1 %v12037_v39  ;;  %v3344_v54 = vcombine.high %v3302_v33, %v3302_v33  ;;  %v9286_v57 = vcombine.low %v3303_v38, %v3304_v62  ;;  %v3345_v27 = vcombine.high %v3304_v62, %v3304_v62  ;;  %v3264_v38 = vld [vmem:[%s11879_s3 + $0x248] sm:$0xff] }
 0x1b9   : > { %v3306_v23 = vld [vmem:[#allocation3 + $0x80] sm:$0xff]  ;;  %v3307_v16 = vld [vmem:[#allocation3 + $0x88] sm:$0xf] }
 0x1ba   : > { %6843 = vmatmul.mubr.msk.f32.gmra.mxu0 %vm3060_vm12, %v9223_v9  ;;  %v9278_v40 = vcombine.low %v3302_v33, %v3344_v54  ;;  %v9294_v12 = vcombine.low %v3345_v27, %v3305_v56  ;;  %v3346_v13 = vcombine.high %v3306_v23, %v3306_v23  ;;  %v3308_v28 = vld [vmem:[#allocation3 + $0x90] sm:$0xff]  ;;  %v3310_v19 = vld [vmem:[#allocation3 + $0xa0] sm:$0xff]  ;;  %v3309_v11 = vld [vmem:[#allocation3 + $0x98] sm:$0xf] }
 0x1bb   : > { %3713 = vmatprep.mubr.f32.mxu0 %v12037_v39  ;;  %v9310_v36 = vcombine.low %v3307_v16, %v3308_v28  ;;  %v3347_v51 = vcombine.high %v3308_v28, %v3308_v28  ;;  %v3348_v8 = vcombine.high %v3310_v19, %v3310_v19  ;;  %v3311_v21 = vld [vmem:[#allocation3 + $0xa8] sm:$0xf]  ;;  %v3273_v33 = vld [vmem:[%s11879_s3 + $0x290] sm:$0xff]  ;;  %v3131_v54 = vld [vmem:[#allocation2] sm:$0xff] }
 0x1bc   : > { %6828 = vmatmul.mubr.msk.f32.gmra.mxu1 %vm3060_vm12, %v9278_v40  ;;  %v9302_v58 = vcombine.low %v3306_v23, %v3346_v13  ;;  %v9334_v10 = vcombine.low %v3311_v21, %v3312_v44  ;;  %v3179_v62 = vcombine.high %v3131_v54, %v3131_v54  ;;  %v3254_v27 = vld [vmem:[%s11879_s3 + $0x1f8] sm:$0xff]  ;;  %v3132_v13 = vld [vmem:[#allocation2 + $0x8] sm:$0xf]  ;;  %v3237_v16 = vld [vmem:[%s11879_s3 + $0x170] sm:$0xff] }
 0x1bd   : > { %3564 = vmatprep.mubr.f32.mxu1 %v12037_v39  ;;  %v9318_v34 = vcombine.low %v3347_v51, %v3309_v11  ;;  %v9326_v52 = vcombine.low %v3310_v19, %v3348_v8  ;;  %v3246_v23 = vld [vmem:[%s11879_s3 + $0x1b8] sm:$0xff]  ;;  %v3236_v28 = vld [vmem:[%s11879_s3 + $0x168] sm:$0xff]  ;;  %v3227_v11 = vld [vmem:[%s11879_s3 + $0x120] sm:$0xff] }
 0x1be   : > { %6844 = vmatmul.mubr.msk.f32.gmra.mxu0 %vm3060_vm12, %v9247_v48  ;;  %v9580_v56 = vcombine.low %v3131_v54, %v3179_v62  ;;  %v3228_v51 = vld [vmem:[%s11879_s3 + $0x128] sm:$0xff]  ;;  %v3135_v8 = vld [vmem:[#allocation2 + $0x20] sm:$0xff]  ;;  %v3218_v44 = vld [vmem:[%s11879_s3 + $0xd8] sm:$0xff] }
 0x1bf   : > { %3719 = vmatprep.mubr.f32.mxu0 %v12037_v39  ;;  %v3219_v21 = vld [vmem:[%s11879_s3 + $0xe0] sm:$0xff]  ;;  %v3276_v54 = vld [vmem:[%s11879_s3 + $0x2a8] sm:$0xff] }
 0x1c0   : > { %6829 = vmatmul.mubr.msk.f32.gmra.mxu1 %vm3060_vm12, %v9286_v57  ;;  %v3267_v62 = vld [vmem:[%s11879_s3 + $0x260] sm:$0xff] }
 0x1c1   : > { %3570 = vmatprep.mubr.f32.mxu1 %v12037_v39 }
 0x1c2   : > { %6845 = vmatmul.mubr.msk.f32.gmra.mxu0 %vm3060_vm12, %v9261_v37 }
 0x1c3   : > { %3725 = vmatprep.mubr.f32.mxu0 %v12037_v39 }
 0x1c4   : > { %6830 = vmatmul.mubr.msk.f32.gmra.mxu1 %vm3060_vm12, %v9294_v12 }
 0x1c5   : > { %3576 = vmatprep.mubr.f32.mxu1 %v12037_v39 }
 0x1c6   : > { %6846 = vmatmul.mubr.msk.f32.gmra.mxu0 %vm3060_vm12, %v9278_v40 }
 0x1c7   : > { %3731 = vmatprep.mubr.f32.mxu0 %v12037_v39 }
 0x1c8   : > { %6831 = vmatmul.mubr.msk.f32.gmra.mxu1 %vm3060_vm12, %v9302_v58 }
 0x1c9   : > { %3582 = vmatprep.mubr.f32.mxu1 %v12037_v39 }
 0x1ca   : > { %6847 = vmatmul.mubr.msk.f32.gmra.mxu0 %vm3060_vm12, %v9286_v57 }
 0x1cb   : > { %3737 = vmatprep.mubr.f32.mxu0 %v12037_v39 }
 0x1cc   : > { %6832 = vmatmul.mubr.msk.f32.gmra.mxu1 %vm3060_vm12, %v9310_v36 }
 0x1cd   : > { %3588 = vmatprep.mubr.f32.mxu1 %v12037_v39 }
 0x1ce   : > { %6848 = vmatmul.mubr.msk.f32.gmra.mxu0 %vm3060_vm12, %v9294_v12 }
 0x1cf   : > { %3743 = vmatprep.mubr.f32.mxu0 %v12037_v39 }
 0x1d0   : > { %6833 = vmatmul.mubr.msk.f32.gmra.mxu1 %vm3060_vm12, %v9318_v34 }
 0x1d1   : > { %3594 = vmatprep.mubr.f32.mxu1 %v12037_v39 }
 0x1d2   : > { %6849 = vmatmul.mubr.msk.f32.gmra.mxu0 %vm3060_vm12, %v9302_v58 }
 0x1d3   : > { %3749 = vmatprep.mubr.f32.mxu0 %v12037_v39 }
 0x1d4   : > { %6834 = vmatmul.mubr.msk.f32.gmra.mxu1 %vm3060_vm12, %v9326_v52 }
 0x1d5   : > { %3598 = vmatprep.mubr.f32.mxu1 %v12037_v39 }
 0x1d6   : > { %6850 = vmatmul.mubr.msk.f32.gmra.mxu0 %vm3060_vm12, %v9310_v36 }
 0x1d7   : > { %3755 = vmatprep.mubr.f32.mxu0 %v12037_v39 }
 0x1d8   : > { %6835 = vmatmul.mubr.msk.f32.gmra.mxu1 %vm3060_vm12, %v9334_v10 }
 0x1d9   : > { %3602 = vmatprep.mubr.f32.mxu1 %v12037_v39 }
 0x1da   : > { %6851 = vmatmul.mubr.msk.f32.gmra.mxu0 %vm3060_vm12, %v9318_v34 }
 0x1db   : > { %3761 = vmatprep.mubr.f32.mxu0 %v12037_v39 }
 0x1dc   : > { %6836 = vmatmul.mubr.msk.f32.gmra.mxu1 %vm3060_vm12, %v9339_v7 }
 0x1dd   : > { %3842 = vmatprep.mubr.f32.mxu1 %v12037_v39 }
 0x1de   : > { %6852 = vmatmul.mubr.msk.f32.gmra.mxu0 %vm3060_vm12, %v9326_v52 }
 0x1df   : > { %3767 = vmatprep.mubr.f32.mxu0 %v12037_v39 }
 0x1e0   : > { %6855 = vmatmul.mubr.msk.f32.vlgmr.msra.gmra.mxu1 %vm3060_vm12, %v9120_v3 }
 0x1e1   : > { %7238 = vmatpush3.msra.mxu1 %v9211_v42  ;;  %3846 = vmatprep.mubr.f32.mxu1 %v12037_v39  ;;  %v3257_v42 = vld [vmem:[%s11879_s3 + $0x210] sm:$0xff] }
 0x1e2   : > { %6853 = vmatmul.mubr.msk.f32.gmra.mxu0 %vm3060_vm12, %v9334_v10  ;;  %7239 = vmatprep.subr.mxu1 %v3376_v63 }
 0x1e3   : > { %3773 = vmatprep.mubr.f32.mxu0 %v12037_v39  ;;  %7240 = vmatpush3.msra.mxu1 %v3376_v63  ;;  %v3181_v63 = vcombine.high %v3135_v8, %v3135_v8 }
 0x1e4   : > { %6856 = vmatmul.mubr.msk.f32.gmra.mxu1 %vm3060_vm12, %v9133_v31  ;;  %7241 = vmatprep.subr.mxu1 %v3367_v5 }
 0x1e5   : > { %3852 = vmatprep.mubr.f32.mxu1 %v12037_v39  ;;  %7242 = vmatpush3.msra.mxu1 %v3367_v5  ;;  %v3200_v5 = vld [vmem:[%s11879_s3 + $0x48] sm:$0xff] }
 0x1e6   : > { %6854 = vmatmul.mubr.msk.f32.gmra.mxu0 %vm3060_vm12, %v9339_v7  ;;  %7243 = vmatprep.subr.mxu1 %v3358_v43 }
 0x1e7   : > { %4011 = vmatprep.mubr.f32.mxu0 %v12037_v39  ;;  %7244 = vmatpush3.msra.mxu1 %v3358_v43  ;;  %v3192_v43 = vld [vmem:[%s11879_s3 + $0x8] sm:$0xff] }
 0x1e8   : > { %6857 = vmatmul.mubr.msk.f32.gmra.mxu1 %vm3060_vm12, %v9142_v0  ;;  %6909 = vmatprep.subr.msk.mxu1 %vm870_vm0, %v3282_v30  ;;  %v9643_v30 = vcombine.low %v3135_v8, %v3181_v63  ;;  %v3232_v8 = vld [vmem:[%s11879_s3 + $0x148] sm:$0xff]  ;;  %v3231_v63 = vld [vmem:[%s11879_s3 + $0x140] sm:$0xff] }
 0x1e9   : > { %3858 = vmatprep.mubr.f32.mxu1 %v12037_v39 }
 0x1ea   : > { %6873 = vmatmul.mubr.msk.f32.vlgmr.msra.gmra.mxu0 %vm3060_vm12, %v9120_v3 }
 0x1eb   : > { %4015 = vmatprep.mubr.f32.mxu0 %v12037_v39  ;;  %6930 = vmatpush1.msk.msra.mxu0 %vm870_vm0, %v3283_v6  ;;  %v3136_v6 = vld [vmem:[#allocation2 + $0x28] sm:$0xf] }
 0x1ec   : > { %6858 = vmatmul.mubr.msk.f32.gmra.mxu1 %vm3060_vm12, %v9163_v2  ;;  %4526 = vmatprep.subr.mxu0 %v3275_v41  ;;  %v3137_v41 = vld [vmem:[#allocation2 + $0x30] sm:$0xff] }
 0x1ed   : > { %3864 = vmatprep.mubr.f32.mxu1 %v12037_v39  ;;  %4527 = vmatpush1.msra.mxu0 %v3274_v46  ;;  %v3287_v46 = vld [vmem:[%s11879_s3 + $0x300] sm:$0x3f] }
 0x1ee   : > { %6874 = vmatmul.mubr.msk.f32.gmra.mxu0 %vm3060_vm12, %v9133_v31  ;;  %4528 = vmatprep.subr.mxu0 %v3266_v17  ;;  %v3279_v17 = vld [vmem:[%s11879_s3 + $0x2c0] sm:$0xff] }
 0x1ef   : > { %4019 = vmatprep.mubr.f32.mxu0 %v12037_v39  ;;  %4529 = vmatpush1.msra.mxu0 %v3265_v22  ;;  %v9664_v22 = vcombine.low %v3136_v6, %v3137_v41  ;;  %v3223_v6 = vld [vmem:[%s11879_s3 + $0x100] sm:$0xff] }
 0x1f0   : > { %6859 = vmatmul.mubr.msk.f32.gmra.mxu1 %vm3060_vm12, %v9186_v59  ;;  %4530 = vmatprep.subr.mxu0 %v3257_v42  ;;  %v3182_v42 = vcombine.high %v3137_v41, %v3137_v41 }
 0x1f1   : > { %3870 = vmatprep.mubr.f32.mxu1 %v12037_v39  ;;  %4531 = vmatpush1.msra.mxu0 %v3256_v4  ;;  %v3139_v4 = vld [vmem:[#allocation2 + $0x40] sm:$0xff] }
 0x1f2   : > { %6875 = vmatmul.mubr.msk.f32.gmra.mxu0 %vm3060_vm12, %v9142_v0  ;;  %4532 = vmatprep.subr.mxu0 %v3248_v53  ;;  %v3270_v53 = vld [vmem:[%s11879_s3 + $0x278] sm:$0xff] }
 0x1f3   : > { %4023 = vmatprep.mubr.f32.mxu0 %v12037_v39  ;;  %4533 = vmatpush1.msra.mxu0 %v3247_v47  ;;  %v3269_v47 = vld [vmem:[%s11879_s3 + $0x270] sm:$0xff] }
 0x1f4   : > { %6860 = vmatmul.mubr.msk.f32.gmra.mxu1 %vm3060_vm12, %v9206_v61  ;;  %4534 = vmatprep.subr.mxu0 %v3239_v29  ;;  %v3261_v29 = vld [vmem:[%s11879_s3 + $0x230] sm:$0xff] }
 0x1f5   : > { %3876 = vmatprep.mubr.f32.mxu1 %v12037_v39  ;;  %4535 = vmatpush1.msra.mxu0 %v3238_v24 }
 0x1f6   : > { %6876 = vmatmul.mubr.msk.f32.gmra.mxu0 %vm3060_vm12, %v9163_v2  ;;  %4536 = vmatprep.subr.mxu0 %v3230_v25  ;;  %v3183_v25 = vcombine.high %v3139_v4, %v3139_v4 }
 0x1f7   : > { %4029 = vmatprep.mubr.f32.mxu0 %v12037_v39  ;;  %4537 = vmatpush1.msra.mxu0 %v3229_v15  ;;  %v3251_v15 = vld [vmem:[%s11879_s3 + $0x1e0] sm:$0xff] }
 0x1f8   : > { %6861 = vmatmul.mubr.msk.f32.gmra.mxu1 %vm3060_vm12, %v9223_v9  ;;  %4538 = vmatprep.subr.mxu0 %v3221_v55  ;;  %v3243_v55 = vld [vmem:[%s11879_s3 + $0x1a0] sm:$0xff] }
 0x1f9   : > { %3882 = vmatprep.mubr.f32.mxu1 %v12037_v39  ;;  %4539 = vmatpush1.msra.mxu0 %v3220_v50  ;;  %v9708_v50 = vcombine.low %v3139_v4, %v3183_v25  ;;  %v3148_v4 = vld [vmem:[#allocation2 + $0x88] sm:$0xf]  ;;  %v3214_v25 = vld [vmem:[%s11879_s3 + $0xb8] sm:$0xff] }
 0x1fa   : > { %6877 = vmatmul.mubr.msk.f32.gmra.mxu0 %vm3060_vm12, %v9186_v59  ;;  %4540 = vmatprep.subr.mxu0 %v3212_v18  ;;  %v3140_v18 = vld [vmem:[#allocation2 + $0x48] sm:$0xf] }
 0x1fb   : > { %4035 = vmatprep.mubr.f32.mxu0 %v12037_v39  ;;  %4541 = vmatpush1.msra.mxu0 %v3211_v1  ;;  %v3141_v1 = vld [vmem:[#allocation2 + $0x50] sm:$0xff] }
 0x1fc   : > { %6862 = vmatmul.mubr.msk.f32.gmra.mxu1 %vm3060_vm12, %v9247_v48  ;;  %4542 = vmatprep.subr.mxu0 %v3203_v20  ;;  %v3233_v20 = vld [vmem:[%s11879_s3 + $0x150] sm:$0xff] }
 0x1fd   : > { %3888 = vmatprep.mubr.f32.mxu1 %v12037_v39  ;;  %4543 = vmatpush1.msra.mxu0 %v3202_v32  ;;  %v3225_v32 = vld [vmem:[%s11879_s3 + $0x110] sm:$0xff] }
 0x1fe   : > { %6878 = vmatmul.mubr.msk.f32.gmra.mxu0 %vm3060_vm12, %v9206_v61  ;;  %4544 = vmatprep.subr.mxu0 %v3194_v26  ;;  %v3285_v26 = vld [vmem:[%s11879_s3 + $0x2f0] sm:$0x3f] }
 0x1ff   : > { %4041 = vmatprep.mubr.f32.mxu0 %v12037_v39  ;;  %4545 = vmatpush1.msra.mxu0 %v3193_v45  ;;  %v3184_v45 = vcombine.high %v3141_v1, %v3141_v1 }
 0x200   : > { %6863 = vmatmul.mubr.msk.f32.gmra.mxu1 %vm3060_vm12, %v9261_v37  ;;  %6969 = vmatprep.subr.msk.mxu0 %vm870_vm0, %v3288_v49  ;;  %v3142_v49 = vld [vmem:[#allocation2 + $0x58] sm:$0xf] }
 0x201   : > { %3894 = vmatprep.mubr.f32.mxu1 %v12037_v39 }
 0x202   : > { %6879 = vmatmul.mubr.msk.f32.gmra.mxu0 %vm3060_vm12, %v9223_v9 }
 0x203   : > { %4047 = vmatprep.mubr.f32.mxu0 %v12037_v39 }
 0x204   : > { %6864 = vmatmul.mubr.msk.f32.gmra.mxu1 %vm3060_vm12, %v9278_v40 }
 0x205   : > { %3900 = vmatprep.mubr.f32.mxu1 %v12037_v39 }
 0x206   : > { %6880 = vmatmul.mubr.msk.f32.gmra.mxu0 %vm3060_vm12, %v9247_v48 }
 0x207   : > { %4053 = vmatprep.mubr.f32.mxu0 %v12037_v39 }
 0x208   : > { %6865 = vmatmul.mubr.msk.f32.gmra.mxu1 %vm3060_vm12, %v9286_v57 }
 0x209   : > { %3906 = vmatprep.mubr.f32.mxu1 %v12037_v39 }
 0x20a   : > { %6881 = vmatmul.mubr.msk.f32.gmra.mxu0 %vm3060_vm12, %v9261_v37 }
 0x20b   : > { %4059 = vmatprep.mubr.f32.mxu0 %v12037_v39 }
 0x20c   : > { %6866 = vmatmul.mubr.msk.f32.gmra.mxu1 %vm3060_vm12, %v9294_v12 }
 0x20d   : > { %3912 = vmatprep.mubr.f32.mxu1 %v12037_v39 }
 0x20e   : > { %6882 = vmatmul.mubr.msk.f32.gmra.mxu0 %vm3060_vm12, %v9278_v40 }
 0x20f   : > { %4065 = vmatprep.mubr.f32.mxu0 %v12037_v39 }
 0x210   : > { %6867 = vmatmul.mubr.msk.f32.gmra.mxu1 %vm3060_vm12, %v9302_v58 }
 0x211   : > { %3918 = vmatprep.mubr.f32.mxu1 %v12037_v39 }
 0x212   : > { %6883 = vmatmul.mubr.msk.f32.gmra.mxu0 %vm3060_vm12, %v9286_v57 }
 0x213   : > { %4071 = vmatprep.mubr.f32.mxu0 %v12037_v39 }
 0x214   : > { %6868 = vmatmul.mubr.msk.f32.gmra.mxu1 %vm3060_vm12, %v9310_v36 }
 0x215   : > { %3924 = vmatprep.mubr.f32.mxu1 %v12037_v39 }
 0x216   : > { %6884 = vmatmul.mubr.msk.f32.gmra.mxu0 %vm3060_vm12, %v9294_v12 }
 0x217   : > { %4077 = vmatprep.mubr.f32.mxu0 %v12037_v39 }
 0x218   : > { %6869 = vmatmul.mubr.msk.f32.gmra.mxu1 %vm3060_vm12, %v9318_v34 }
 0x219   : > { %3930 = vmatprep.mubr.f32.mxu1 %v12037_v39 }
 0x21a   : > { %6885 = vmatmul.mubr.msk.f32.gmra.mxu0 %vm3060_vm12, %v9302_v58 }
 0x21b   : > { %4083 = vmatprep.mubr.f32.mxu0 %v12037_v39 }
 0x21c   : > { %6870 = vmatmul.mubr.msk.f32.gmra.mxu1 %vm3060_vm12, %v9326_v52 }
 0x21d   : > { %3936 = vmatprep.mubr.f32.mxu1 %v12037_v39 }
 0x21e   : > { %6886 = vmatmul.mubr.msk.f32.gmra.mxu0 %vm3060_vm12, %v9310_v36 }
 0x21f   : > { %4089 = vmatprep.mubr.f32.mxu0 %v12037_v39 }
 0x220   : > { %6871 = vmatmul.mubr.msk.f32.gmra.mxu1 %vm3060_vm12, %v9334_v10 }
 0x221   : > { %3942 = vmatprep.mubr.f32.mxu1 %v12037_v39 }
 0x222   : > { %6887 = vmatmul.mubr.msk.f32.gmra.mxu0 %vm3060_vm12, %v9318_v34 }
 0x223   : > { %4095 = vmatprep.mubr.f32.mxu0 %v12037_v39 }
 0x224   : > { %6872 = vmatmul.mubr.msk.f32.gmra.mxu1 %vm3060_vm12, %v9339_v7 }
 0x225   : > { %7245 = vmatprep.mubr.msk.f32.mxu1 %vm3060_vm12, %v9120_v3  ;;  %v3272_v3 = vld [vmem:[%s11879_s3 + $0x288] sm:$0xff] }
 0x226   : > { %6888 = vmatmul.mubr.msk.f32.gmra.mxu0 %vm3060_vm12, %v9326_v52 }
 0x227   : > { %4101 = vmatprep.mubr.f32.mxu0 %v12037_v39 }
 0x228   : > { %7246 = vmatmul.mubr.msk.f32.vlgmr.msra.gmra.mxu1 %vm3060_vm12, %v9133_v31  ;;  %v3263_v31 = vld [vmem:[%s11879_s3 + $0x240] sm:$0xff] }
 0x229   : > { %7248 = vmatprep.mubr.msk.f32.mxu1 %vm3060_vm12, %v9142_v0  ;;  %6910 = vmatpush1.msk.msra.mxu1 %vm870_vm0, %v3281_v35  ;;  %v3255_v0 = vld [vmem:[%s11879_s3 + $0x200] sm:$0xff]  ;;  %v3277_v35 = vld [vmem:[%s11879_s3 + $0x2b0] sm:$0xff] }
 0x22a   : > { %6889 = vmatmul.mubr.msk.f32.gmra.mxu0 %vm3060_vm12, %v9334_v10  ;;  %4359 = vmatprep.subr.mxu1 %v3273_v33  ;;  %v3143_v33 = vld [vmem:[#allocation2 + $0x60] sm:$0xff] }
 0x22b   : > { %4107 = vmatprep.mubr.f32.mxu0 %v12037_v39  ;;  %4360 = vmatpush1.msra.mxu1 %v3272_v3  ;;  %v3268_v3 = vld [vmem:[%s11879_s3 + $0x268] sm:$0xff] }
 0x22c   : > { %7249 = vmatmul.mubr.msk.f32.gmra.mxu1 %vm3060_vm12, %v9163_v2  ;;  %4361 = vmatprep.subr.mxu1 %v3264_v38  ;;  %v3245_v2 = vld [vmem:[%s11879_s3 + $0x1b0] sm:$0xff]  ;;  %v9749_v38 = vcombine.low %v3184_v45, %v3142_v49  ;;  %v3196_v49 = vld [vmem:[%s11879_s3 + $0x28] sm:$0xff] }
 0x22d   : > { %7251 = vmatprep.mubr.msk.f32.mxu1 %vm3060_vm12, %v9186_v59  ;;  %4362 = vmatpush1.msra.mxu1 %v3263_v31  ;;  %v3133_v59 = vld [vmem:[#allocation2 + $0x10] sm:$0xff]  ;;  %v3185_v31 = vcombine.high %v3143_v33, %v3143_v33 }
 0x22e   : > { %6890 = vmatmul.mubr.msk.f32.gmra.mxu0 %vm3060_vm12, %v9339_v7  ;;  %4363 = vmatprep.subr.mxu1 %v3255_v0  ;;  %v9601_v19 = vcombine.low %v3132_v13, %v3133_v59  ;;  %v3259_v0 = vld [vmem:[%s11879_s3 + $0x220] sm:$0xff]  ;;  %v3249_v13 = vld [vmem:[%s11879_s3 + $0x1d0] sm:$0xff] }
 0x22f   : > { %4578 = vmatprep.mubr.f32.mxu0 %v12037_v39  ;;  %4364 = vmatpush1.msra.mxu1 %v3254_v27  ;;  %v3258_v27 = vld [vmem:[%s11879_s3 + $0x218] sm:$0xff] }
 0x230   : > { %7252 = vmatmul.mubr.msk.f32.gmra.mxu1 %vm3060_vm12, %v9206_v61  ;;  %4365 = vmatprep.subr.mxu1 %v3246_v23  ;;  %v3180_v61 = vcombine.high %v3133_v59, %v3133_v59  ;;  %v3250_v23 = vld [vmem:[%s11879_s3 + $0x1d8] sm:$0xff]  ;;  %v3144_v59 = vld [vmem:[#allocation2 + $0x68] sm:$0xf] }
 0x231   : > { %7254 = vmatprep.mubr.msk.f32.mxu1 %vm3060_vm12, %v9223_v9  ;;  %4366 = vmatpush1.msra.mxu1 %v3245_v2  ;;  %v3134_v9 = vld [vmem:[#allocation2 + $0x18] sm:$0xf]  ;;  %v9769_v2 = vcombine.low %v3143_v33, %v3185_v31 }
 0x232   : > { %6931 = vmatmul.mubr.msk.f32.vlgmr.msra.gmra.mxu0 %vm843_vm1, %v9580_v56  ;;  %4367 = vmatprep.subr.mxu1 %v3237_v16  ;;  %v9622_v60 = vcombine.low %v3180_v61, %v3134_v9  ;;  %v3145_v16 = vld [vmem:[#allocation2 + $0x70] sm:$0xff]  ;;  %v3224_v61 = vld [vmem:[%s11879_s3 + $0x108] sm:$0xff] }
 0x233   : > { %4584 = vmatprep.mubr.f32.mxu0 %v12037_v39  ;;  %4368 = vmatpush1.msra.mxu1 %v3236_v28  ;;  %v3241_v28 = vld [vmem:[%s11879_s3 + $0x190] sm:$0xff]  ;;  %v3186_v9 = vcombine.high %v3145_v16, %v3145_v16 }
 0x234   : > { %7255 = vmatmul.mubr.msk.f32.gmra.mxu1 %vm3060_vm12, %v9247_v48  ;;  %4369 = vmatprep.subr.mxu1 %v3228_v51  ;;  %v3209_v48 = vld [vmem:[%s11879_s3 + $0x90] sm:$0xff]  ;;  %v3240_v51 = vld [vmem:[%s11879_s3 + $0x188] sm:$0xff] }
 0x235   : > { %7257 = vmatprep.mubr.msk.f32.mxu1 %vm3060_vm12, %v9261_v37  ;;  %4370 = vmatpush1.msra.mxu1 %v3227_v11  ;;  %v3201_v37 = vld [vmem:[%s11879_s3 + $0x50] sm:$0xff]  ;;  %v9789_v11 = vcombine.low %v3144_v59, %v3145_v16  ;;  %v3152_v16 = vld [vmem:[#allocation2 + $0xa8] sm:$0xf] }
 0x236   : > { %6932 = vmatmul.mubr.msk.f32.gmra.mxu0 %vm843_vm1, %v9601_v19  ;;  %4371 = vmatprep.subr.mxu1 %v3219_v21  ;;  %v3146_v21 = vld [vmem:[#allocation2 + $0x78] sm:$0xf] }
 0x237   : > { %4590 = vmatprep.mubr.f32.mxu0 %v12037_v39  ;;  %4372 = vmatpush1.msra.mxu1 %v3218_v44  ;;  %v3147_v44 = vld [vmem:[#allocation2 + $0x80] sm:$0xff] }
 0x238   : > { %7258 = vmatmul.mubr.msk.f32.gmra.mxu1 %vm3060_vm12, %v9278_v40  ;;  %4373 = vmatprep.subr.mxu1 %v3210_v14  ;;  %v3191_v40 = vld [vmem:[%s11879_s3] sm:$0xff]  ;;  %v3216_v14 = vld [vmem:[%s11879_s3 + $0xc8] sm:$0xff] }
 0x239   : > { %7260 = vmatprep.mubr.msk.f32.mxu1 %vm3060_vm12, %v9286_v57  ;;  %4374 = vmatpush1.msra.mxu1 %v3209_v48  ;;  %v3286_v57 = vld [vmem:[%s11879_s3 + $0x2f8] sm:$0x3f]  ;;  %v3215_v48 = vld [vmem:[%s11879_s3 + $0xc0] sm:$0xff] }
 0x23a   : > { %6933 = vmatmul.mubr.msk.f32.gmra.mxu0 %vm843_vm1, %v9622_v60  ;;  %4375 = vmatprep.subr.mxu1 %v3201_v37 }
 0x23b   : > { %4596 = vmatprep.mubr.f32.mxu0 %v12037_v39  ;;  %4376 = vmatpush1.msra.mxu1 %v3200_v5  ;;  %v9811_v5 = vcombine.low %v3186_v9, %v3146_v21 }
 0x23c   : > { %7261 = vmatmul.mubr.msk.f32.gmra.mxu1 %vm3060_vm12, %v9294_v12  ;;  %4377 = vmatprep.subr.mxu1 %v3192_v43  ;;  %v3278_v12 = vld [vmem:[%s11879_s3 + $0x2b8] sm:$0xff]  ;;  %v3187_v43 = vcombine.high %v3147_v44, %v3147_v44 }
 0x23d   : > { %7263 = vmatprep.mubr.msk.f32.mxu1 %vm3060_vm12, %v9302_v58  ;;  %4378 = vmatpush1.msra.mxu1 %v3191_v40  ;;  %v3138_v58 = vld [vmem:[#allocation2 + $0x38] sm:$0xf]  ;;  %v3207_v40 = vld [vmem:[%s11879_s3 + $0x80] sm:$0xff] }
 0x23e   : > { %6934 = vmatmul.mubr.msk.f32.gmra.mxu0 %vm843_vm1, %v9643_v30  ;;  %6949 = vmatprep.subr.msk.mxu1 %vm870_vm0, %v3286_v57  ;;  %v9687_v24 = vcombine.low %v3182_v42, %v3138_v58  ;;  %v3206_v57 = vld [vmem:[%s11879_s3 + $0x78] sm:$0xff]  ;;  %v9835_v42 = vcombine.low %v3147_v44, %v3187_v43 }
 0x23f   : > { %4602 = vmatprep.mubr.f32.mxu0 %v12037_v39  ;;  %6970 = vmatpush1.msk.msra.mxu0 %vm870_vm0, %v3287_v46  ;;  %v3198_v46 = vld [vmem:[%s11879_s3 + $0x38] sm:$0xff] }
 0x240   : > { %7264 = vmatmul.mubr.msk.f32.gmra.mxu1 %vm3060_vm12, %v9310_v36  ;;  %4866 = vmatprep.subr.mxu0 %v3279_v17  ;;  %v3260_v36 = vld [vmem:[%s11879_s3 + $0x228] sm:$0xff] }
 0x241   : > { %7266 = vmatprep.mubr.msk.f32.mxu1 %vm3060_vm12, %v9318_v34  ;;  %4867 = vmatpush1.msra.mxu0 %v3278_v12  ;;  %v3252_v34 = vld [vmem:[%s11879_s3 + $0x1e8] sm:$0xff]  ;;  %v3197_v12 = vld [vmem:[%s11879_s3 + $0x30] sm:$0xff] }
 0x242   : > { %6935 = vmatmul.mubr.msk.f32.gmra.mxu0 %vm843_vm1, %v9664_v22  ;;  %4868 = vmatprep.subr.mxu0 %v3270_v53  ;;  %v3149_v53 = vld [vmem:[#allocation2 + $0x90] sm:$0xff] }
 0x243   : > { %4608 = vmatprep.mubr.f32.mxu0 %v12037_v39  ;;  %4869 = vmatpush1.msra.mxu0 %v3269_v47  ;;  %v3222_v47 = vld [vmem:[%s11879_s3 + $0xf8] sm:$0xff] }
 0x244   : > { %7267 = vmatmul.mubr.msk.f32.gmra.mxu1 %vm3060_vm12, %v9326_v52  ;;  %4870 = vmatprep.subr.mxu0 %v3261_v29  ;;  %v3242_v52 = vld [vmem:[%s11879_s3 + $0x198] sm:$0xff] }
 0x245   : > { %7269 = vmatprep.mubr.msk.f32.mxu1 %vm3060_vm12, %v9334_v10  ;;  %4871 = vmatpush1.msra.mxu0 %v3260_v36  ;;  %v3234_v10 = vld [vmem:[%s11879_s3 + $0x158] sm:$0xff] }
 0x246   : > { %6936 = vmatmul.mubr.msk.f32.gmra.mxu0 %vm843_vm1, %v9687_v24  ;;  %4872 = vmatprep.subr.mxu0 %v3252_v34 }
 0x247   : > { %4614 = vmatprep.mubr.f32.mxu0 %v12037_v39  ;;  %4873 = vmatpush1.msra.mxu0 %v3251_v15  ;;  %v9860_v15 = vcombine.low %v3148_v4, %v3149_v53 }
 0x248   : > { %7270 = vmatmul.mubr.msk.f32.gmra.mxu1 %vm3060_vm12, %v9339_v7  ;;  %4874 = vmatprep.subr.mxu0 %v3243_v55  ;;  %v9731_v7 = vcombine.low %v3140_v18, %v3141_v1  ;;  %v3188_v55 = vcombine.high %v3149_v53, %v3149_v53  ;;  %v3150_v1 = vld [vmem:[#allocation2 + $0x98] sm:$0xf] }
 0x249   : > { %4411 = vmatprep.mubr.f32.mxu1 %v12037_v39  ;;  %4875 = vmatpush1.msra.mxu0 %v3242_v52  ;;  %v3213_v52 = vld [vmem:[%s11879_s3 + $0xb0] sm:$0xff] }
 0x24a   : > { %6937 = vmatmul.mubr.msk.f32.gmra.mxu0 %vm843_vm1, %v9708_v50  ;;  %4876 = vmatprep.subr.mxu0 %v3234_v10  ;;  %v3151_v10 = vld [vmem:[#allocation2 + $0xa0] sm:$0xff]  ;;  %v9888_v33 = vcombine.low %v3188_v55, %v3150_v1 }
 0x24b   : > { %4620 = vmatprep.mubr.f32.mxu0 %v12037_v39  ;;  %4877 = vmatpush1.msra.mxu0 %v3233_v20  ;;  %v3205_v20 = vld [vmem:[%s11879_s3 + $0x70] sm:$0xff] }
 0x24c   : > { %6911 = vmatmul.mubr.msk.f32.vlgmr.msra.gmra.mxu1 %vm843_vm1, %v9580_v56  ;;  %4878 = vmatprep.subr.mxu0 %v3225_v32 }
 0x24d   : > { %6950 = vmatpush1.msk.msra.mxu1 %vm870_vm0, %v3285_v26  ;;  %4417 = vmatprep.mubr.f32.mxu1 %v12037_v39  ;;  %v3204_v26 = vld [vmem:[%s11879_s3 + $0x68] sm:$0xff] }
 0x24e   : > { %6938 = vmatmul.mubr.msk.f32.gmra.mxu0 %vm843_vm1, %v9731_v7  ;;  %4697 = vmatprep.subr.mxu1 %v3277_v35 }
 0x24f   : > { %4626 = vmatprep.mubr.f32.mxu0 %v12037_v39  ;;  %4698 = vmatpush1.msra.mxu1 %v3276_v54  ;;  %v3189_v54 = vcombine.high %v3151_v10, %v3151_v10 }
 0x250   : > { %6912 = vmatmul.mubr.msk.f32.gmra.mxu1 %vm843_vm1, %v9601_v19  ;;  %4699 = vmatprep.subr.mxu1 %v3268_v3  ;;  %v3195_v3 = vld [vmem:[%s11879_s3 + $0x20] sm:$0xff] }
 0x251   : > { %4423 = vmatprep.mubr.f32.mxu1 %v12037_v39  ;;  %4700 = vmatpush1.msra.mxu1 %v3267_v62  ;;  %v9899_v62 = vld [vmem:[%s11879_s3 + $0x310] sm:$0x3f] }
 0x252   : > { %6939 = vmatmul.mubr.msk.f32.gmra.mxu0 %vm843_vm1, %v9749_v38  ;;  %4701 = vmatprep.subr.mxu1 %v3259_v0 }
 0x253   : > { %4632 = vmatprep.mubr.f32.mxu0 %v12037_v39  ;;  %4702 = vmatpush1.msra.mxu1 %v3258_v27 }
 0x254   : > { %6913 = vmatmul.mubr.msk.f32.gmra.mxu1 %vm843_vm1, %v9622_v60  ;;  %4703 = vmatprep.subr.mxu1 %v3250_v23 }
 0x255   : > { %4429 = vmatprep.mubr.f32.mxu1 %v12037_v39  ;;  %4704 = vmatpush1.msra.mxu1 %v3249_v13  ;;  %v9912_v13 = vcombine.low %v3151_v10, %v3189_v54 }
 0x256   : > { %6940 = vmatmul.mubr.msk.f32.gmra.mxu0 %vm843_vm1, %v9769_v2  ;;  %4705 = vmatprep.subr.mxu1 %v3241_v28  ;;  %v3153_v28 = vld [vmem:[#allocation2 + $0xb0] sm:$0xff] }
 0x257   : > { %4638 = vmatprep.mubr.f32.mxu0 %v12037_v39  ;;  %4706 = vmatpush1.msra.mxu1 %v3240_v51  ;;  %v3190_v21 = vcombine.high %v3153_v28, %v3153_v28 }
 0x258   : > { %6914 = vmatmul.mubr.msk.f32.gmra.mxu1 %vm843_vm1, %v9643_v30  ;;  %4879 = vmatpush1.msra.mxu0 %v3224_v61 }
 0x259   : > { %4435 = vmatprep.mubr.f32.mxu1 %v12037_v39  ;;  %4707 = vmatprep.subr.mxu1 %v3232_v8  ;;  %v9930_v8 = vcombine.low %v3152_v16, %v3153_v28 }
 0x25a   : > { %v9807_v37 = vpop.f32.mrf.mxu0  ;;  %6941 = vmatmul.mubr.msk.f32.gmra.mxu0 %vm843_vm1, %v9789_v11  ;;  %4880 = vmatprep.subr.mxu0 %v3216_v14  ;;  %v3154_v14 = vld [vmem:[#allocation2 + $0xb8] sm:$0xf] }
 0x25b   : > { %4644 = vmatprep.mubr.f32.mxu0 %v12037_v39  ;;  %4708 = vmatpush1.msra.mxu1 %v3231_v63 }
 0x25c   : > { %v9820_v41 = vpop.f32.mrf.mxu0  ;;  %6915 = vmatmul.mubr.msk.f32.gmra.mxu1 %vm843_vm1, %v9664_v22  ;;  %4881 = vmatpush1.msra.mxu0 %v3215_v48 }
 0x25d   : > { %4441 = vmatprep.mubr.f32.mxu1 %v12037_v39  ;;  %4882 = vmatprep.subr.mxu0 %v3207_v40  ;;  %v9840_v58 = vpop.f32.mrf.mxu1  ;;  %v9946_v40 = vcombine.low %v3190_v21, %v3154_v14 }
 0x25e   : > { %v9831_v17 = vpop.f32.mrf.mxu0  ;;  %6942 = vmatmul.mubr.msk.f32.gmra.mxu0 %vm843_vm1, %v9811_v5  ;;  %4709 = vmatprep.subr.mxu1 %v3223_v6 }
 0x25f   : > { %4650 = vmatprep.mubr.f32.mxu0 %v12037_v39  ;;  %4883 = vmatpush1.msra.mxu0 %v3206_v57  ;;  %v9853_v36 = vpop.f32.mrf.mxu1 }
 0x260   : > { %v9846_v29 = vpop.f32.mrf.mxu0  ;;  %6916 = vmatmul.mubr.msk.f32.gmra.mxu1 %vm843_vm1, %v9687_v24  ;;  %4884 = vmatprep.subr.mxu0 %v3198_v46 }
 0x261   : > { %4447 = vmatprep.mubr.f32.mxu1 %v12037_v39  ;;  %4885 = vmatpush1.msra.mxu0 %v3197_v12 }
 0x262   : > { %v9856_v34 = vpop.f32.mrf.mxu0  ;;  %6943 = vmatmul.mubr.msk.f32.gmra.mxu0 %vm843_vm1, %v9835_v42  ;;  %4710 = vmatpush1.msra.mxu1 %v3222_v47  ;;  %v9865_v18 = vpop.f32.mrf.mxu1 }
 0x263   : > { %4656 = vmatprep.mubr.f32.mxu0 %v12037_v39  ;;  %4711 = vmatprep.subr.mxu1 %v3214_v25 }
 0x264   : > { %v9871_v32 = vpop.f32.mrf.mxu0  ;;  %6917 = vmatmul.mubr.msk.f32.gmra.mxu1 %vm843_vm1, %v9708_v50  ;;  %v9878_v45 = vpop.f32.mrf.mxu1 }
 0x265   : > { %4453 = vmatprep.mubr.f32.mxu1 %v12037_v39  ;;  %4712 = vmatpush1.msra.mxu1 %v3213_v52 }
 0x266   : > { %v9884_v35 = vpop.f32.mrf.mxu0  ;;  %6944 = vmatmul.mubr.msk.f32.gmra.mxu0 %vm843_vm1, %v9860_v15  ;;  %4713 = vmatprep.subr.mxu1 %v3205_v20 }
 0x267   : > { %v9893_v31 = vpop.f32.mrf.mxu1  ;;  %4662 = vmatprep.mubr.f32.mxu0 %v12037_v39  ;;  %4714 = vmatpush1.msra.mxu1 %v3204_v26 }
 0x268   : > { %v9901_v0 = vpop.f32.mrf.mxu0  ;;  %6918 = vmatmul.mubr.msk.f32.gmra.mxu1 %vm843_vm1, %v9731_v7  ;;  %4715 = vmatprep.subr.mxu1 %v3196_v49 }
 0x269   : > { %v9905_v27 = vpop.f32.mrf.mxu1  ;;  %4459 = vmatprep.mubr.f32.mxu1 %v12037_v39  ;;  %4716 = vmatpush1.msra.mxu1 %v3195_v3 }
 0x26a   : > { %v9908_v23 = vpop.f32.mrf.mxu0  ;;  %6945 = vmatmul.mubr.msk.f32.gmra.mxu0 %vm843_vm1, %v9888_v33  ;;  %7272 = vmatprep.subr.msk.mxu1 %vm870_vm0, %v9899_v62 }
 0x26b   : > { %v9916_v59 = vpop.f32.mrf.mxu1  ;;  %4668 = vmatprep.mubr.f32.mxu0 %v12037_v39 }
 0x26c   : > { %v9919_v51 = vpop.f32.mrf.mxu0  ;;  %6919 = vmatmul.mubr.msk.f32.gmra.mxu1 %vm843_vm1, %v9749_v38 }
 0x26d   : > { %v9923_v61 = vpop.f32.mrf.mxu1  ;;  %4465 = vmatprep.mubr.f32.mxu1 %v12037_v39 }
 0x26e   : > { %v9926_v9 = vpop.f32.mrf.mxu0  ;;  %6946 = vmatmul.mubr.msk.f32.gmra.mxu0 %vm843_vm1, %v9912_v13 }
 0x26f   : > { %v9932_v44 = vpop.f32.mrf.mxu1  ;;  %4674 = vmatprep.mubr.f32.mxu0 %v12037_v39 }
 0x270   : > { %12074 = vst [vmem:[#allocation10_spill] sm:$0xff] %v9932_v44  ;;  %v9935_v63 = vpop.f32.mrf.mxu0  ;;  %6920 = vmatmul.mubr.msk.f32.gmra.mxu1 %vm843_vm1, %v9769_v2 }
 0x271   : > { %v9939_v48 = vpop.f32.mrf.mxu1  ;;  %4471 = vmatprep.mubr.f32.mxu1 %v12037_v39 }
 0x272   : > { %12075 = vst [vmem:[#allocation8_spill] sm:$0xff] %v9939_v48  ;;  %v9942_v43 = vpop.f32.mrf.mxu0  ;;  %6947 = vmatmul.mubr.msk.f32.gmra.mxu0 %vm843_vm1, %v9930_v8 }
 0x273   : > { %v9948_v6 = vpop.f32.mrf.mxu1  ;;  %4680 = vmatprep.mubr.f32.mxu0 %v12037_v39 }
 0x274   : > { %12076 = vst [vmem:[#allocation4_spill] sm:$0xff] %v9948_v6  ;;  %v9951_v57 = vpop.f32.mrf.mxu0  ;;  %6921 = vmatmul.mubr.msk.f32.gmra.mxu1 %vm843_vm1, %v9789_v11 }
 0x275   : > { %v9955_v46 = vpop.f32.mrf.mxu1  ;;  %4477 = vmatprep.mubr.f32.mxu1 %v12037_v39 }
 0x276   : > { %12077 = vst [vmem:[#allocation5_spill] sm:$0xff] %v9955_v46  ;;  %v9958_v12 = vpop.f32.mrf.mxu0  ;;  %6948 = vmatmul.mubr.msk.f32.gmra.mxu0 %vm843_vm1, %v9946_v40 }
 0x277   : > { %v9962_v4 = vpop.f32.mrf.mxu1  ;;  %4918 = vmatprep.mubr.f32.mxu0 %v12037_v39 }
 0x278   : > { %12078 = vst [vmem:[#allocation6_spill] sm:$0xff] %v9962_v4  ;;  %v9965_v53 = vpop.f32.mrf.mxu0  ;;  %6922 = vmatmul.mubr.msk.f32.gmra.mxu1 %vm843_vm1, %v9811_v5 }
 0x279   : > { %v9969_v47 = vpop.f32.mrf.mxu1  ;;  %4483 = vmatprep.mubr.f32.mxu1 %v12037_v39 }
 0x27a   : > { %12079 = vst [vmem:[#allocation21_spill] sm:$0xff] %v9969_v47  ;;  %v9972_v25 = vpop.f32.mrf.mxu0  ;;  %6971 = vmatmul.mubr.msk.f32.vlgmr.msra.gmra.mxu0 %vm843_vm1, %v9580_v56 }
 0x27b   : > { %4922 = vmatprep.mubr.f32.mxu0 %v12037_v39 }
 0x27c   : > { %v9977_v55 = vpop.f32.mrf.mxu1  ;;  %v9979_v52 = vpop.f32.mrf.mxu0  ;;  %6923 = vmatmul.mubr.msk.f32.gmra.mxu1 %vm843_vm1, %v9835_v42 }
 0x27d   : > { %12080 = vst [vmem:[#allocation24_spill] sm:$0xff] %v9977_v55  ;;  %4489 = vmatprep.mubr.f32.mxu1 %v12037_v39 }
 0x27e   : > { %v9984_v1 = vpop.f32.mrf.mxu1  ;;  %v9986_v10 = vpop.f32.mrf.mxu0  ;;  %6972 = vmatmul.mubr.msk.f32.gmra.mxu0 %vm843_vm1, %v9601_v19 }
 0x27f   : > { %12081 = vst [vmem:[#allocation22_spill] sm:$0xff] %v9984_v1  ;;  %4926 = vmatprep.mubr.f32.mxu0 %v12037_v39 }
 0x280   : > { %v9991_v20 = vpop.f32.mrf.mxu1  ;;  %v9993_v26 = vpop.f32.mrf.mxu0  ;;  %6924 = vmatmul.mubr.msk.f32.gmra.mxu1 %vm843_vm1, %v9860_v15 }
 0x281   : > { %12082 = vst [vmem:[#allocation25_spill] sm:$0xff] %v9991_v20  ;;  %4495 = vmatprep.mubr.f32.mxu1 %v12037_v39 }
 0x282   : > { %v9998_v49 = vpop.f32.mrf.mxu1  ;;  %v10000_v54 = vpop.f32.mrf.mxu0  ;;  %6973 = vmatmul.mubr.msk.f32.gmra.mxu0 %vm843_vm1, %v9622_v60 }
 0x283   : > { %12083 = vst [vmem:[#allocation7_spill] sm:$0xff] %v9998_v49  ;;  %4930 = vmatprep.mubr.f32.mxu0 %v12037_v39 }
 0x284   : > { %v10005_v3 = vpop.f32.mrf.mxu1  ;;  %v10007_v16 = vpop.f32.mrf.mxu0  ;;  %6925 = vmatmul.mubr.msk.f32.gmra.mxu1 %vm843_vm1, %v9888_v33 }
 0x285   : > { %12084 = vst [vmem:[#allocation13_spill] sm:$0xff] %v10005_v3  ;;  %4501 = vmatprep.mubr.f32.mxu1 %v12037_v39 }
 0x286   : > { %v10012_v28 = vpop.f32.mrf.mxu1  ;;  %v10014_v21 = vpop.f32.mrf.mxu0  ;;  %6974 = vmatmul.mubr.msk.f32.gmra.mxu0 %vm843_vm1, %v9643_v30 }
 0x287   : > { %12085 = vst [vmem:[#allocation14_spill] sm:$0xff] %v10012_v28  ;;  %4936 = vmatprep.mubr.f32.mxu0 %v12037_v39 }
 0x288   : > { %v10019_v14 = vpop.f32.mrf.mxu1  ;;  %v10021_v49 = vpop.f32.mrf.mxu0  ;;  %6926 = vmatmul.mubr.msk.f32.gmra.mxu1 %vm843_vm1, %v9912_v13 }
 0x289   : > { %12086 = vst [vmem:[#allocation23_spill] sm:$0xff] %v10019_v14  ;;  %4505 = vmatprep.mubr.f32.mxu1 %v12037_v39 }
 0x28a   : > { %v10026_v3 = vpop.f32.mrf.mxu1  ;;  %v10028_v20 = vpop.f32.mrf.mxu0  ;;  %6975 = vmatmul.mubr.msk.f32.gmra.mxu0 %vm843_vm1, %v9664_v22 }
 0x28b   : > { %12087 = vst [vmem:[#allocation26_spill] sm:$0xff] %v10026_v3  ;;  %4942 = vmatprep.mubr.f32.mxu0 %v12037_v39 }
 0x28c   : > { %v10033_v28 = vpop.f32.mrf.mxu1  ;;  %v10035_v1 = vpop.f32.mrf.mxu0  ;;  %6927 = vmatmul.mubr.msk.f32.gmra.mxu1 %vm843_vm1, %v9930_v8 }
 0x28d   : > { %12088 = vst [vmem:[#allocation16_spill] sm:$0xff] %v10033_v28  ;;  %4509 = vmatprep.mubr.f32.mxu1 %v12037_v39 }
 0x28e   : > { %v10040_v14 = vpop.f32.mrf.mxu1  ;;  %v10042_v55 = vpop.f32.mrf.mxu0  ;;  %6976 = vmatmul.mubr.msk.f32.gmra.mxu0 %vm843_vm1, %v9687_v24 }
 0x28f   : > { %12089 = vst [vmem:[#allocation11_spill] sm:$0xff] %v10040_v14  ;;  %4948 = vmatprep.mubr.f32.mxu0 %v12037_v39 }
 0x290   : > { %v10047_v3 = vpop.f32.mrf.mxu1  ;;  %v10049_v47 = vpop.f32.mrf.mxu0  ;;  %6928 = vmatmul.mubr.msk.f32.gmra.mxu1 %vm843_vm1, %v9946_v40 }
 0x291   : > { %12090 = vst [vmem:[#allocation9_spill] sm:$0xff] %v10047_v3  ;;  %4749 = vmatprep.mubr.f32.mxu1 %v12037_v39  ;;  %v3280_v3 = vld [vmem:[%s11879_s3 + $0x2c8] sm:$0xff] }
 0x292   : > { %v10054_v28 = vpop.f32.mrf.mxu1  ;;  %v10056_v4 = vpop.f32.mrf.mxu0  ;;  %6977 = vmatmul.mubr.msk.f32.gmra.mxu0 %vm843_vm1, %v9708_v50 }
 0x293   : > { %12091 = vst [vmem:[#allocation17_spill] sm:$0xff] %v10054_v28  ;;  %4954 = vmatprep.mubr.f32.mxu0 %v12037_v39  ;;  %v3271_v28 = vld [vmem:[%s11879_s3 + $0x280] sm:$0xff] }
 0x294   : > { %v3596_v14 = vpop.f32.mrf.mxu1  ;;  %v10064_v46 = vpop.f32.mrf.mxu0  ;;  %6951 = vmatmul.mubr.msk.f32.vlgmr.msra.gmra.mxu1 %vm843_vm1, %v9580_v56 }
 0x295   : > { %12092 = vst [vmem:[#allocation12_spill] sm:$0xff] %v10064_v46  ;;  %7273 = vmatpush3.msk.msra.mxu1 %vm870_vm0, %v9899_v62  ;;  %4753 = vmatprep.mubr.f32.mxu1 %v12037_v39  ;;  %v3262_v62 = vld [vmem:[%s11879_s3 + $0x238] sm:$0xff]  ;;  %vm5685_vm0 = vcmask 1041408  }
 0x296   : > { %v3597_v6 = vpop.f32.mrf.mxu1  ;;  %v10074_v48 = vpop.f32.mrf.mxu0  ;;  %6978 = vmatmul.mubr.msk.f32.gmra.mxu0 %vm843_vm1, %v9731_v7  ;;  %7274 = vmatprep.subr.mxu1 %v3280_v3  ;;  %vm10372_vm4 = vmor %vm5685_vm0, %vm5686_vm3 }
 0x297   : > { %12093 = vst [vmem:[#allocation15_spill] sm:$0xff] %v10074_v48  ;;  %4960 = vmatprep.mubr.f32.mxu0 %v12037_v39  ;;  %7275 = vmatpush3.msra.mxu1 %v3280_v3  ;;  %v3253_v6 = vld [vmem:[%s11879_s3 + $0x1f0] sm:$0xff] }
 0x298   : > { %v3600_v14 = vpop.f32.mrf.mxu1  ;;  %v10082_v46 = vpop.f32.mrf.mxu0  ;;  %6952 = vmatmul.mubr.msk.f32.gmra.mxu1 %vm843_vm1, %v9601_v19  ;;  %7276 = vmatprep.subr.mxu1 %v3271_v28 }
 0x299   : > { %12094 = vst [vmem:[#allocation19_spill] sm:$0xff] %v10082_v46  ;;  %4759 = vmatprep.mubr.f32.mxu1 %v12037_v39  ;;  %7277 = vmatpush3.msra.mxu1 %v3271_v28  ;;  %v3244_v14 = vld [vmem:[%s11879_s3 + $0x1a8] sm:$0xff] }
 0x29a   : > { %v3601_v48 = vpop.f32.mrf.mxu1  ;;  %v10090_v3 = vpop.f32.mrf.mxu0  ;;  %6979 = vmatmul.mubr.msk.f32.gmra.mxu0 %vm843_vm1, %v9749_v38  ;;  %7278 = vmatprep.subr.mxu1 %v3262_v62 }
 0x29b   : > { %12095 = vst [vmem:[#allocation20_spill] sm:$0xff] %v10090_v3  ;;  %4966 = vmatprep.mubr.f32.mxu0 %v12037_v39  ;;  %7279 = vmatpush3.msra.mxu1 %v3262_v62  ;;  %v3235_v48 = vld [vmem:[%s11879_s3 + $0x160] sm:$0xff] }
 0x29c   : > { %v3604_v46 = vpop.f32.mrf.mxu1  ;;  %v10098_v28 = vpop.f32.mrf.mxu0  ;;  %6953 = vmatmul.mubr.msk.f32.gmra.mxu1 %vm843_vm1, %v9622_v60  ;;  %7280 = vmatprep.subr.mxu1 %v3253_v6 }
 0x29d   : > { %12096 = vst [vmem:[#allocation18_spill] sm:$0xff] %v10098_v28  ;;  %4765 = vmatprep.mubr.f32.mxu1 %v12037_v39  ;;  %7281 = vmatpush3.msra.mxu1 %v3253_v6  ;;  %v3226_v46 = vld [vmem:[%s11879_s3 + $0x118] sm:$0xff] }
 0x29e   : > { %v3605_v3 = vpop.f32.mrf.mxu1  ;;  %v10106_v62 = vpop.f32.mrf.mxu0  ;;  %6980 = vmatmul.mubr.msk.f32.gmra.mxu0 %vm843_vm1, %v9769_v2  ;;  %7282 = vmatprep.subr.mxu1 %v3244_v14 }
 0x29f   : > { %12097 = vst [vmem:[#allocation27_spill] sm:$0xff] %v10106_v62  ;;  %4972 = vmatprep.mubr.f32.mxu0 %v12037_v39  ;;  %7283 = vmatpush3.msra.mxu1 %v3244_v14  ;;  %v3217_v3 = vld [vmem:[%s11879_s3 + $0xd0] sm:$0xff] }
 0x2a0   : > { %v10114_v28 = vpop.f32.mrf.mxu0  ;;  %v3844_v6 = vpop.f32.mrf.mxu1  ;;  %6954 = vmatmul.mubr.msk.f32.gmra.mxu1 %vm843_vm1, %v9643_v30  ;;  %7284 = vmatprep.subr.mxu1 %v3235_v48 }
 0x2a1   : > { %12098 = vst [vmem:[#allocation28_spill] sm:$0xff] %v10114_v28  ;;  %4771 = vmatprep.mubr.f32.mxu1 %v12037_v39  ;;  %7285 = vmatpush3.msra.mxu1 %v3235_v48  ;;  %v3208_v6 = vld [vmem:[%s11879_s3 + $0x88] sm:$0xff] }
 0x2a2   : > { %v10122_v62 = vpop.f32.mrf.mxu0  ;;  %v3845_v14 = vpop.f32.mrf.mxu1  ;;  %6981 = vmatmul.mubr.msk.f32.gmra.mxu0 %vm843_vm1, %v9789_v11  ;;  %7286 = vmatprep.subr.mxu1 %v3226_v46 }
 0x2a3   : > { %12099 = vst [vmem:[#allocation29_spill] sm:$0xff] %v10122_v62  ;;  %4978 = vmatprep.mubr.f32.mxu0 %v12037_v39  ;;  %7287 = vmatpush3.msra.mxu1 %v3226_v46  ;;  %v3199_v14 = vld [vmem:[%s11879_s3 + $0x40] sm:$0xff] }
 0x2a4   : > { %v10130_v28 = vpop.f32.mrf.mxu0  ;;  %v10132_v48 = vpop.f32.mrf.mxu1  ;;  %6955 = vmatmul.mubr.msk.f32.gmra.mxu1 %vm843_vm1, %v9664_v22  ;;  %7288 = vmatprep.subr.mxu1 %v3217_v3 }
 0x2a5   : > { %12100 = vst [vmem:[#allocation30_spill] sm:$0xff] %v10130_v28  ;;  %12101 = vst [vmem:[#allocation31_spill] sm:$0xff] %v10132_v48  ;;  %4777 = vmatprep.mubr.f32.mxu1 %v12037_v39  ;;  %7289 = vmatpush3.msra.mxu1 %v3217_v3 }
 0x2a6   : > { %v3775_v46 = vpop.f32.mrf.mxu0  ;;  %v10140_v62 = vpop.f32.mrf.mxu1  ;;  %6982 = vmatmul.mubr.msk.f32.gmra.mxu0 %vm843_vm1, %v9811_v5  ;;  %7290 = vmatprep.subr.mxu1 %v3208_v6 }
 0x2a7   : > { %12102 = vst [vmem:[#allocation32_spill] sm:$0xff] %v10140_v62  ;;  %4984 = vmatprep.mubr.f32.mxu0 %v12037_v39  ;;  %7291 = vmatpush3.msra.mxu1 %v3208_v6 }
 0x2a8   : > { %v3776_v48 = vpop.f32.mrf.mxu0  ;;  %v10145_v28 = vpop.f32.mrf.mxu1  ;;  %6956 = vmatmul.mubr.msk.f32.gmra.mxu1 %vm843_vm1, %v9687_v24  ;;  %7292 = vmatprep.subr.mxu1 %v3199_v14 }
 0x2a9   : > { %12103 = vst [vmem:[#allocation33_spill] sm:$0xff] %v10145_v28  ;;  %4783 = vmatprep.mubr.f32.mxu1 %v12037_v39  ;;  %7293 = vmatpush3.msra.mxu1 %v3199_v14 }
 0x2aa   : > { %v10150_v3 = vpop.f32.mrf.mxu1  ;;  %v4013_v46 = vpop.f32.mrf.mxu0  ;;  %6983 = vmatmul.mubr.msk.f32.gmra.mxu0 %vm843_vm1, %v9835_v42 }
 0x2ab   : > { %12104 = vst [vmem:[#allocation34_spill] sm:$0xff] %v10150_v3  ;;  %4990 = vmatprep.mubr.f32.mxu0 %v12037_v39 }
 0x2ac   : > { %v10155_v62 = vpop.f32.mrf.mxu1  ;;  %v4014_v6 = vpop.f32.mrf.mxu0  ;;  %6957 = vmatmul.mubr.msk.f32.gmra.mxu1 %vm843_vm1, %v9708_v50 }
 0x2ad   : > { %12105 = vst [vmem:[#allocation35_spill] sm:$0xff] %v10155_v62  ;;  %4789 = vmatprep.mubr.f32.mxu1 %v12037_v39 }
 0x2ae   : > { %v10160_v48 = vpop.f32.mrf.mxu1  ;;  %v4017_v28 = vpop.f32.mrf.mxu0  ;;  %6984 = vmatmul.mubr.msk.f32.gmra.mxu0 %vm843_vm1, %v9860_v15 }
 0x2af   : > { %12106 = vst [vmem:[#allocation36_spill] sm:$0xff] %v10160_v48  ;;  %4996 = vmatprep.mubr.f32.mxu0 %v12037_v39 }
 0x2b0   : > { %v10165_v14 = vpop.f32.mrf.mxu1  ;;  %v4018_v46 = vpop.f32.mrf.mxu0  ;;  %6958 = vmatmul.mubr.msk.f32.gmra.mxu1 %vm843_vm1, %v9731_v7 }
 0x2b1   : > { %12107 = vst [vmem:[#allocation37_spill] sm:$0xff] %v10165_v14  ;;  %4795 = vmatprep.mubr.f32.mxu1 %v12037_v39 }
 0x2b2   : > { %v10170_v6 = vpop.f32.mrf.mxu1  ;;  %v4021_v62 = vpop.f32.mrf.mxu0  ;;  %6985 = vmatmul.mubr.msk.f32.gmra.mxu0 %vm843_vm1, %v9888_v33 }
 0x2b3   : > { %12108 = vst [vmem:[#allocation38_spill] sm:$0xff] %v10170_v6  ;;  %5002 = vmatprep.mubr.f32.mxu0 %v12037_v39 }
 0x2b4   : > { %v10175_v28 = vpop.f32.mrf.mxu1  ;;  %v4022_v48 = vpop.f32.mrf.mxu0  ;;  %6959 = vmatmul.mubr.msk.f32.gmra.mxu1 %vm843_vm1, %v9749_v38 }
 0x2b5   : > { %12109 = vst [vmem:[#allocation39_spill] sm:$0xff] %v10175_v28  ;;  %4801 = vmatprep.mubr.f32.mxu1 %v12037_v39 }
 0x2b6   : > { %v10180_v46 = vpop.f32.mrf.mxu1  ;;  %v10182_v14 = vpop.f32.mrf.mxu0  ;;  %6986 = vmatmul.mubr.msk.f32.gmra.mxu0 %vm843_vm1, %v9912_v13 }
 0x2b7   : > { %12110 = vst [vmem:[#allocation40_spill] sm:$0xff] %v10180_v46  ;;  %12111 = vst [vmem:[#allocation41_spill] sm:$0xff] %v10182_v14  ;;  %5008 = vmatprep.mubr.f32.mxu0 %v12037_v39 }
 0x2b8   : > { %v10187_v62 = vpop.f32.mrf.mxu1  ;;  %v10189_v6 = vpop.f32.mrf.mxu0  ;;  %6960 = vmatmul.mubr.msk.f32.gmra.mxu1 %vm843_vm1, %v9769_v2 }
 0x2b9   : > { %12112 = vst [vmem:[#allocation42_spill] sm:$0xff] %v10187_v62  ;;  %12113 = vst [vmem:[#allocation43_spill] sm:$0xff] %v10189_v6  ;;  %4807 = vmatprep.mubr.f32.mxu1 %v12037_v39 }
 0x2ba   : > { %v10194_v48 = vpop.f32.mrf.mxu1  ;;  %v10196_v28 = vpop.f32.mrf.mxu0  ;;  %6987 = vmatmul.mubr.msk.f32.gmra.mxu0 %vm843_vm1, %v9930_v8 }
 0x2bb   : > { %12114 = vst [vmem:[#allocation44_spill] sm:$0xff] %v10194_v48  ;;  %12115 = vst [vmem:[#allocation45_spill] sm:$0xff] %v10196_v28  ;;  %5014 = vmatprep.mubr.f32.mxu0 %v12037_v39 }
 0x2bc   : > { %v10201_v46 = vpop.f32.mrf.mxu1  ;;  %v10203_v3 = vpop.f32.mrf.mxu0  ;;  %6961 = vmatmul.mubr.msk.f32.gmra.mxu1 %vm843_vm1, %v9789_v11 }
 0x2bd   : > { %12116 = vst [vmem:[#allocation46_spill] sm:$0xff] %v10201_v46  ;;  %12117 = vst [vmem:[#allocation47_spill] sm:$0xff] %v10203_v3  ;;  %4813 = vmatprep.mubr.f32.mxu1 %v12037_v39 }
 0x2be   : > { %v10208_v62 = vpop.f32.mrf.mxu1  ;;  %v10210_v6 = vpop.f32.mrf.mxu0  ;;  %6988 = vmatmul.mubr.msk.f32.gmra.mxu0 %vm843_vm1, %v9946_v40 }
 0x2bf   : > { %12118 = vst [vmem:[#allocation48_spill] sm:$0xff] %v10208_v62  ;;  %12119 = vst [vmem:[#allocation49_spill] sm:$0xff] %v10210_v6 }
 0x2c0   : > { %v10214_v48 = vpop.f32.mrf.mxu1  ;;  %v10216_v28 = vpop.f32.mrf.mxu0  ;;  %6962 = vmatmul.mubr.msk.f32.gmra.mxu1 %vm843_vm1, %v9811_v5 }
 0x2c1   : > { %12120 = vst [vmem:[#allocation50_spill] sm:$0xff] %v10214_v48  ;;  %12121 = vst [vmem:[#allocation51_spill] sm:$0xff] %v10216_v28  ;;  %4819 = vmatprep.mubr.f32.mxu1 %v12037_v39 }
 0x2c2   : > { %v10221_v46 = vpop.f32.mrf.mxu1  ;;  %v10223_v3 = vpop.f32.mrf.mxu0 }
 0x2c3   : > { %12122 = vst [vmem:[#allocation52_spill] sm:$0xff] %v10221_v46  ;;  %12123 = vst [vmem:[#allocation53_spill] sm:$0xff] %v10223_v3 }
 0x2c4   : > { %v10225_v14 = vpop.f32.mrf.mxu1  ;;  %v10227_v62 = vpop.f32.mrf.mxu0  ;;  %6963 = vmatmul.mubr.msk.f32.gmra.mxu1 %vm843_vm1, %v9835_v42 }
 0x2c5   : > { %12124 = vst [vmem:[#allocation54_spill] sm:$0xff] %v10225_v14  ;;  %12125 = vst [vmem:[#allocation55_spill] sm:$0xff] %v10227_v62  ;;  %4825 = vmatprep.mubr.f32.mxu1 %v12037_v39 }
 0x2c6   : > { %v10232_v48 = vpop.f32.mrf.mxu1  ;;  %v10234_v28 = vpop.f32.mrf.mxu0 }
 0x2c7   : > { %12126 = vst [vmem:[#allocation56_spill] sm:$0xff] %v10232_v48  ;;  %12127 = vst [vmem:[#allocation57_spill] sm:$0xff] %v10234_v28 }
 0x2c8   : > { %v10236_v6 = vpop.f32.mrf.mxu1  ;;  %v10238_v44 = vpop.f32.mrf.mxu0  ;;  %6964 = vmatmul.mubr.msk.f32.gmra.mxu1 %vm843_vm1, %v9860_v15 }
 0x2c9   : > { %12128 = vst [vmem:[#allocation58_spill] sm:$0xff] %v10236_v6  ;;  %12129 = vst [vmem:[#allocation59_spill] sm:$0xff] %v10238_v44  ;;  %4831 = vmatprep.mubr.f32.mxu1 %v12037_v39 }
 0x2ca   : > { %v10243_v14 = vpop.f32.mrf.mxu1  ;;  %v10245_v46 = vpop.f32.mrf.mxu0 }
 0x2cb   : > { %12130 = vst [vmem:[#allocation60_spill] sm:$0xff] %v10243_v14  ;;  %12131 = vst [vmem:[#allocation61_spill] sm:$0xff] %v10245_v46 }
 0x2cc   : > { %v10247_v62 = vpop.f32.mrf.mxu1  ;;  %v10249_v3 = vpop.f32.mrf.mxu0  ;;  %6965 = vmatmul.mubr.msk.f32.gmra.mxu1 %vm843_vm1, %v9888_v33 }
 0x2cd   : > { %12132 = vst [vmem:[#allocation62_spill] sm:$0xff] %v10247_v62  ;;  %12133 = vst [vmem:[#allocation63_spill] sm:$0xff] %v10249_v3  ;;  %4837 = vmatprep.mubr.f32.mxu1 %v12037_v39 }
 0x2ce   : > { %v10254_v6 = vpop.f32.mrf.mxu1  ;;  %v10256_v48 = vpop.f32.mrf.mxu0 }
 0x2cf   : > { %12134 = vst [vmem:[#allocation64_spill] sm:$0xff] %v10254_v6  ;;  %12135 = vst [vmem:[#allocation65_spill] sm:$0xff] %v10256_v48 }
 0x2d0   : > { %v10258_v44 = vpop.f32.mrf.mxu1  ;;  %v10260_v28 = vpop.f32.mrf.mxu0  ;;  %6966 = vmatmul.mubr.msk.f32.gmra.mxu1 %vm843_vm1, %v9912_v13 }
 0x2d1   : > { %12136 = vst [vmem:[#allocation66_spill] sm:$0xff] %v10258_v44  ;;  %12137 = vst [vmem:[#allocation67_spill] sm:$0xff] %v10260_v28  ;;  %4843 = vmatprep.mubr.f32.mxu1 %v12037_v39 }
 0x2d2   : > { %v10265_v62 = vpop.f32.mrf.mxu1  ;;  %v10267_v14 = vpop.f32.mrf.mxu0 }
 0x2d3   : > { %12138 = vst [vmem:[#allocation68_spill] sm:$0xff] %v10265_v62  ;;  %12139 = vst [vmem:[#allocation69_spill] sm:$0xff] %v10267_v14 }
 0x2d4   : > { %v10269_v3 = vpop.f32.mrf.mxu1  ;;  %v10271_v46 = vpop.f32.mrf.mxu0  ;;  %6967 = vmatmul.mubr.msk.f32.gmra.mxu1 %vm843_vm1, %v9930_v8 }
 0x2d5   : > { %12140 = vst [vmem:[#allocation70_spill] sm:$0xff] %v10269_v3  ;;  %12141 = vst [vmem:[#allocation71_spill] sm:$0xff] %v10271_v46  ;;  %4849 = vmatprep.mubr.f32.mxu1 %v12037_v39 }
 0x2d6   : > { %v10276_v44 = vpop.f32.mrf.mxu1  ;;  %v10278_v6 = vpop.f32.mrf.mxu0 }
 0x2d7   : > { %12142 = vst [vmem:[#allocation72_spill] sm:$0xff] %v10276_v44  ;;  %12143 = vst [vmem:[#allocation73_spill] sm:$0xff] %v10278_v6 }
 0x2d8   : > { %v10280_v28 = vpop.f32.mrf.mxu1  ;;  %v10282_v48 = vpop.f32.mrf.mxu0  ;;  %6968 = vmatmul.mubr.msk.f32.gmra.mxu1 %vm843_vm1, %v9946_v40 }
 0x2d9   : > { %12144 = vst [vmem:[#allocation74_spill] sm:$0xff] %v10280_v28  ;;  %12145 = vst [vmem:[#allocation75_spill] sm:$0xff] %v10282_v48  ;;  %7294 = vmatprep.mubr.msk.f32.mxu1 %vm843_vm1, %v9580_v56 }
 0x2da   : > { %v10288_v3 = vpop.f32.mrf.mxu1  ;;  %v10290_v62 = vpop.f32.mrf.mxu0 }
 0x2db   : > { %12146 = vst [vmem:[#allocation76_spill] sm:$0xff] %v10288_v3  ;;  %12147 = vst [vmem:[#allocation77_spill] sm:$0xff] %v10290_v62 }
 0x2dc   : > { %v10292_v46 = vpop.f32.mrf.mxu1  ;;  %v10294_v39 = vpop.f32.mrf.mxu0  ;;  %7295 = vmatmul.mubr.msk.f32.vlgmr.msra.gmra.mxu1 %vm843_vm1, %v9601_v19 }
 0x2dd   : > { %12148 = vst [vmem:[#allocation78_spill] sm:$0xff] %v10292_v46  ;;  %12149 = vst [vmem:[#allocation79_spill] sm:$0xff] %v10294_v39  ;;  %7297 = vmatprep.mubr.msk.f32.mxu1 %vm843_vm1, %v9622_v60 }
 0x2de   : > { %v10300_v28 = vpop.f32.mrf.mxu1  ;;  %v10302_v44 = vpop.f32.mrf.mxu0 }
 0x2df   : > { %12150 = vst [vmem:[#allocation80_spill] sm:$0xff] %v10300_v28  ;;  %12151 = vst [vmem:[#allocation81_spill] sm:$0xff] %v10302_v44 }
 0x2e0   : > { %v10304_v48 = vpop.f32.mrf.mxu1  ;;  %v10306_v56 = vpop.f32.mrf.mxu0  ;;  %7298 = vmatmul.mubr.msk.f32.gmra.mxu1 %vm843_vm1, %v9643_v30 }
 0x2e1   : > { %12152 = vst [vmem:[#allocation82_spill] sm:$0xff] %v10304_v48  ;;  %12153 = vst [vmem:[#allocation83_spill] sm:$0xff] %v10306_v56  ;;  %7300 = vmatprep.mubr.msk.f32.mxu1 %vm843_vm1, %v9664_v22 }
 0x2e2   : > { %v10312_v46 = vpop.f32.mrf.mxu1  ;;  %v10314_v19 = vpop.f32.mrf.mxu0 }
 0x2e3   : > { %12154 = vst [vmem:[#allocation84_spill] sm:$0xff] %v10312_v46  ;;  %12155 = vst [vmem:[#allocation85_spill] sm:$0xff] %v10314_v19 }
 0x2e4   : > { %v3944_v3 = vpop.f32.mrf.mxu1  ;;  %v10316_v60 = vpop.f32.mrf.mxu0  ;;  %7301 = vmatmul.mubr.msk.f32.gmra.mxu1 %vm843_vm1, %v9687_v24 }
 0x2e5   : > { %12156 = vst [vmem:[#allocation86_spill] sm:$0xff] %v10316_v60  ;;  %7303 = vmatprep.mubr.msk.f32.mxu1 %vm843_vm1, %v9708_v50 }
 0x2e6   : > { %v3945_v48 = vpop.f32.mrf.mxu1  ;;  %v10322_v28 = vpop.f32.mrf.mxu0 }
 0x2e7   : > { %12157 = vst [vmem:[#allocation87_spill] sm:$0xff] %v10322_v28 }
 0x2e8   : > { %v10324_v30 = vpop.f32.mrf.mxu0  ;;  %v7247_v56 = vpop.f32.mrf.mxu1  ;;  %7304 = vmatmul.mubr.msk.f32.gmra.mxu1 %vm843_vm1, %v9731_v7 }
 0x2e9   : > { %12158 = vst [vmem:[#allocation88_spill] sm:$0xff] %v10324_v30  ;;  %7306 = vmatprep.mubr.msk.f32.mxu1 %vm843_vm1, %v9749_v38 }
 0x2ea   : > { %v10330_v22 = vpop.f32.mrf.mxu0  ;;  %v4180_v3 = vpop.f32.mrf.mxu1 }
 0x2eb   : > { %12159 = vst [vmem:[#allocation89_spill] sm:$0xff] %v10330_v22 }
 0x2ec   : > { %v10332_v46 = vpop.f32.mrf.mxu0  ;;  %v10334_v24 = vpop.f32.mrf.mxu1  ;;  %7307 = vmatmul.mubr.msk.f32.gmra.mxu1 %vm843_vm1, %v9769_v2 }
 0x2ed   : > { %12160 = vst [vmem:[#allocation90_spill] sm:$0xff] %v10332_v46  ;;  %12161 = vst [vmem:[#allocation91_spill] sm:$0xff] %v10334_v24  ;;  %7309 = vmatprep.mubr.msk.f32.mxu1 %vm843_vm1, %v9789_v11 }
 0x2ee   : > { %v10340_v50 = vpop.f32.mrf.mxu0  ;;  %v4188_v48 = vpop.f32.mrf.mxu1 }
 0x2ef   : > { %12162 = vst [vmem:[#allocation92_spill] sm:$0xff] %v10340_v50 }
 0x2f0   : > { %v10342_v7 = vpop.f32.mrf.mxu0  ;;  %v10344_v56 = vpop.f32.mrf.mxu1  ;;  %7310 = vmatmul.mubr.msk.f32.gmra.mxu1 %vm843_vm1, %v9811_v5 }
 0x2f1   : > { %12163 = vst [vmem:[#allocation93_spill] sm:$0xff] %v10342_v7  ;;  %12164 = vst [vmem:[#allocation94_spill] sm:$0xff] %v10344_v56  ;;  %7312 = vmatprep.mubr.msk.f32.mxu1 %vm843_vm1, %v9835_v42 }
 0x2f2   : > { %v10350_v38 = vpop.f32.mrf.mxu1  ;;  %v4580_v3 = vpop.f32.mrf.mxu0 }
 0x2f3   : > { %12165 = vst [vmem:[#allocation95_spill] sm:$0xff] %v10350_v38  ;;  %v4581_v11 = vadd.f32 %v4580_v3, %v9856_v34 }
 0x2f4   : > { %v10352_v2 = vpop.f32.mrf.mxu1  ;;  %v4582_v24 = vpop.f32.mrf.mxu0  ;;  %7313 = vmatmul.mubr.msk.f32.gmra.mxu1 %vm843_vm1, %v9860_v15 }
 0x2f5   : > { %12166 = vst [vmem:[#allocation96_spill] sm:$0xff] %v10352_v2  ;;  %v4583_v48 = vadd.f32 %v4582_v24, %v9871_v32  ;;  %7315 = vmatprep.mubr.msk.f32.mxu1 %vm843_vm1, %v9888_v33 }
 0x2f6   : > { %v10360_v5 = vpop.f32.mrf.mxu1  ;;  %v4586_v56 = vpop.f32.mrf.mxu0 }
 0x2f7   : > { %12167 = vst [vmem:[#allocation97_spill] sm:$0xff] %v10360_v5  ;;  %v5316_v42 = vcombine.low %v4581_v11, %v4583_v48  ;;  %v5317_v38 = vcombine.high %v4581_v11, %v4583_v48  ;;  %v4587_v32 = vadd.f32 %v4586_v56, %v9884_v35 }
 0x2f8   : > { %v10362_v7 = vpop.f32.mrf.mxu1  ;;  %v4588_v2 = vpop.f32.mrf.mxu0  ;;  %7316 = vmatmul.mubr.msk.f32.gmra.mxu1 %vm843_vm1, %v9912_v13 }
 0x2f9   : > { %12168 = vst [vmem:[#allocation98_spill] sm:$0xff] %v10362_v7  ;;  %v10366_v15 = vrot.slane %v5316_v42, 10  ;;  %v10368_v34 = vrot.slane %v5317_v38, 6  ;;  %v4589_v33 = vadd.f32 %v4588_v2, %v9901_v0  ;;  %7318 = vmatprep.mubr.msk.f32.mxu1 %vm843_vm1, %v9930_v8 }
 0x2fa   : > { %v10378_v3 = vpop.f32.mrf.mxu1  ;;  %v4592_v11 = vpop.f32.mrf.mxu0 }
 0x2fb   : > { %12171 = vst [vmem:[#allocation99_spill] sm:$0xff] %v10378_v3  ;;  %v5320_v48 = vcombine.low %v4587_v32, %v4589_v33  ;;  %v10380_v13 = vcombine.high %v4587_v32, %v4589_v33  ;;  %v5692_v0 = vrot.slane %v10368_v34, 4  ;;  %v4593_v56 = vadd.f32 %v4592_v11, %v9908_v23 }
 0x2fc   : > { %v10382_v42 = vpop.f32.mrf.mxu1  ;;  %v4594_v38 = vpop.f32.mrf.mxu0  ;;  %7319 = vmatmul.mubr.msk.f32.gmra.mxu1 %vm843_vm1, %v9946_v40  ;;  %vm5512_vm1 = vcmask 1042432  }
 0x2fd   : > { %12172 = vst [vmem:[#allocation100_spill] sm:$0xff] %v10382_v42  ;;  %v10391_v8 = vrot.slane %v5320_v48, 6  ;;  %v4595_v2 = vadd.f32 %v4594_v38, %v9919_v51  ;;  %v7029_v7 = vrot.slane %v10380_v13, 10  ;;  %vm10494_vm6 = vmor %vm5512_vm1, %vm5513_vm5 }
 0x2fe   : > { %v10395_v32 = vpop.f32.mrf.mxu1  ;;  %v4598_v33 = vpop.f32.mrf.mxu0 }
 0x2ff   : > { %12173 = vst [vmem:[#allocation101_spill] sm:$0xff] %v10395_v32  ;;  %v10400_v40 = vsel %vm10372_vm4, %v5692_v0, %v10391_v8  ;;  %v10402_v42 = vcombine.low %v4593_v56, %v4595_v2  ;;  %v10404_v3 = vcombine.high %v4593_v56, %v4595_v2  ;;  %v4599_v51 = vadd.f32 %v4598_v33, %v9926_v9 }
 0x300   : > { %v10406_v35 = vpop.f32.mrf.mxu1  ;;  %v4600_v48 = vpop.f32.mrf.mxu0 }
 0x301   : > { %12174 = vst [vmem:[#allocation102_spill] sm:$0xff] %v10402_v42  ;;  %12175 = vst [vmem:[#allocation103_spill] sm:$0xff] %v10406_v35  ;;  %v5698_v23 = vrot.slane %v10402_v42, 6  ;;  %v4601_v11 = vadd.f32 %v4600_v48, %v9935_v63  ;;  %v5701_v2 = vrot.slane %v10404_v3, 6 }
 0x302   : > { %v10412_v38 = vpop.f32.mrf.mxu1  ;;  %v4604_v32 = vpop.f32.mrf.mxu0 }
 0x303   : > { %12176 = vst [vmem:[#allocation104_spill] sm:$0xff] %v10412_v38  ;;  %v10416_v0 = vsel %vm10372_vm4, %v7029_v7, %v5698_v23  ;;  %v5700_v56 = vrot.slane %v5698_v23, 4  ;;  %v10419_v35 = vcombine.low %v4599_v51, %v4601_v11  ;;  %v10421_v5 = vcombine.high %v4599_v51, %v4601_v11 }
 0x304   : > { %v10423_v50 = vpop.f32.mrf.mxu1  ;;  %v4606_v46 = vpop.f32.mrf.mxu0  ;;  %v4605_v9 = vadd.f32 %v4604_v32, %v9942_v43 }
 0x305   : > { %12177 = vst [vmem:[#allocation105_spill] sm:$0xff] %v10419_v35  ;;  %12178 = vst [vmem:[#allocation106_spill] sm:$0xff] %v10423_v50  ;;  %v4607_v63 = vadd.f32 %v4606_v46, %v9951_v57  ;;  %v10429_v33 = vsel %vm10372_vm4, %v5700_v56, %v5701_v2  ;;  %v7030_v7 = vrot.slane %v10419_v35, 10  ;;  %v5706_v48 = vrot.slane %v10421_v5, 6 }
 0x306   : > { %v10433_v23 = vpop.f32.mrf.mxu1  ;;  %v4610_v38 = vpop.f32.mrf.mxu0 }
 0x307   : > { %12179 = vst [vmem:[#allocation107_spill] sm:$0xff] %v10433_v23  ;;  %v10435_v51 = vcombine.low %v4605_v9, %v4607_v63  ;;  %v10437_v11 = vcombine.high %v4605_v9, %v4607_v63  ;;  %v10443_v57 = vsel %vm10372_vm4, %v7030_v7, %v5706_v48  ;;  %v5708_v46 = vrot.slane %v5706_v48, 4 }
 0x308   : > { %v10439_v50 = vpop.f32.mrf.mxu1  ;;  %v4612_v43 = vpop.f32.mrf.mxu0  ;;  %v4611_v56 = vadd.f32 %v4610_v38, %v9958_v12 }
 0x309   : > { %12180 = vst [vmem:[#allocation108_spill] sm:$0xff] %v10439_v50  ;;  %v5709_v32 = vrot.slane %v10435_v51, 6  ;;  %v4613_v22 = vadd.f32 %v4612_v43, %v9965_v53  ;;  %v7031_v7 = vrot.slane %v10437_v11, 10 }
 0x30a   : > { %v10448_v23 = vpop.f32.mrf.mxu1  ;;  %v4616_v30 = vpop.f32.mrf.mxu0 }
 0x30b   : > { %12181 = vst [vmem:[#allocation109_spill] sm:$0xff] %v10448_v23  ;;  %v10454_v50 = vsel %vm10372_vm4, %v5708_v46, %v5709_v32  ;;  %v10458_v12 = vcombine.low %v4611_v56, %v4613_v22  ;;  %v10460_v53 = vcombine.high %v4611_v56, %v4613_v22  ;;  %v10462_v23 = vrot.slane %v5701_v2, 4 }
 0x30c   : > { %v4413_v38 = vpop.f32.mrf.mxu1  ;;  %v4618_v43 = vpop.f32.mrf.mxu0  ;;  %v4617_v63 = vadd.f32 %v4616_v30, %v9972_v25  ;;  %v10483_v62 = vrot.slane %v5709_v32, 4 }
 0x30d   : > { %12182 = vst [vmem:[#allocation110_spill] sm:$0xff] %v10458_v12  ;;  %v4619_v46 = vadd.f32 %v4618_v43, %v9979_v52  ;;  %v5714_v19 = vrot.slane %v10458_v12, 6  ;;  %v5717_v60 = vrot.slane %v10460_v53, 6  ;;  %v4414_v9 = vadd.f32 %v4413_v38, %v9807_v37 }
 0x30e   : > { %v4415_v22 = vpop.f32.mrf.mxu1  ;;  %v4622_v56 = vpop.f32.mrf.mxu0 }
 0x30f   : > { %v10472_v2 = vcombine.low %v4617_v63, %v4619_v46  ;;  %v10474_v44 = vcombine.high %v4617_v63, %v4619_v46  ;;  %v4416_v25 = vadd.f32 %v4415_v22, %v9820_v41  ;;  %v10480_v30 = vsel %vm10372_vm4, %v7031_v7, %v5714_v19 }
 0x310   : > { %12184 = vst [vmem:[#allocation112_spill] sm:$0xff] %v10480_v30  ;;  %v5716_v43 = vrot.slane %v5714_v19, 4  ;;  %v4419_v28 = vpop.f32.mrf.mxu1  ;;  %v4624_v48 = vpop.f32.mrf.mxu0  ;;  %v4623_v46 = vadd.f32 %v4622_v56, %v9986_v10  ;;  %v10490_v14 = vrot.slane %v5717_v60, 4 }
 0x311   : > { %12183 = vst [vmem:[#allocation111_spill] sm:$0xff] %v10472_v2  ;;  %v5314_v22 = vcombine.low %v4414_v9, %v4416_v25  ;;  %v5315_v52 = vcombine.high %v4414_v9, %v4416_v25  ;;  %v4625_v7 = vadd.f32 %v4624_v48, %v9993_v26  ;;  %v4420_v32 = vadd.f32 %v4419_v28, %v9831_v17 }
 0x312   : > { %v4421_v6 = vpop.f32.mrf.mxu1  ;;  %v4628_v19 = vpop.f32.mrf.mxu0  ;;  %12185 = vst [vmem:[#allocation113_spill] sm:$0xff] %v10490_v14  ;;  %v10502_v38 = vsel %vm10372_vm4, %v5716_v43, %v5717_v60 }
 0x313   : > { %v4422_v10 = vadd.f32 %v4421_v6, %v9846_v29  ;;  %12188 = vst [vmem:[#allocation114_spill] sm:$0xff] %v10502_v38  ;;  %v7008_v9 = vrot.slane %v5314_v22, 9  ;;  %v5517_v26 = vrot.slane %v5315_v52, 5  ;;  %v10504_v48 = vcombine.low %v4623_v46, %v4625_v7 }
 0x314   : > { %v10506_v56 = vcombine.high %v4623_v46, %v4625_v7  ;;  %v4425_v25 = vpop.f32.mrf.mxu1  ;;  %v4630_v39 = vpop.f32.mrf.mxu0  ;;  %v12189_v29 = vrot.slane %v10474_v44, 6  ;;  %v4629_v43 = vadd.f32 %v4628_v19, %v10000_v54 }
 0x315   : > { %v5318_v41 = vcombine.low %v4420_v32, %v4422_v10  ;;  %v10509_v12 = vcombine.high %v4420_v32, %v4422_v10  ;;  %v4631_v17 = vadd.f32 %v4630_v39, %v10007_v16  ;;  %v5518_v28 = vsel %vm10494_vm6, %v7008_v9, %v5517_v26 }
 0x316   : > { %v5724_v6 = vrot.slane %v12189_v29, 4  ;;  %v5725_v60 = vrot.slane %v10504_v48, 6  ;;  %v4427_v46 = vpop.f32.mrf.mxu1  ;;  %v4634_v7 = vpop.f32.mrf.mxu0  ;;  %v5519_v63 = vrot.slane %v5517_v26, 4  ;;  %v5595_v42 = vrot.slane %v5518_v28, 4 }
 0x317   : > { %v5520_v32 = vrot.slane %v5318_v41, 5  ;;  %v4426_v39 = vadd.f32 %v4425_v25, %v9840_v58  ;;  %v10525_v9 = vcombine.low %v4629_v43, %v4631_v17  ;;  %v10529_v26 = vcombine.high %v4629_v43, %v4631_v17 }
 0x318   : > { %v10522_v16 = vsel %vm10372_vm4, %v5724_v6, %v5725_v60  ;;  %v4431_v29 = vpop.f32.mrf.mxu1  ;;  %v4636_v38 = vpop.f32.mrf.mxu0  ;;  %v5655_v54 = vadd.f32 %v5595_v42, %v5314_v22  ;;  %v7033_v28 = vrot.slane %v10506_v56, 10  ;;  %v4428_v6 = vadd.f32 %v4427_v46, %v9853_v36 }
 0x319   : > { %12190 = vst [vmem:[#allocation115_spill] sm:$0xff] %v10522_v16  ;;  %12191 = vst [vmem:[#allocation116_spill] sm:$0xff] %v10525_v9  ;;  %v5521_v19 = vsel %vm10494_vm6, %v5519_v63, %v5520_v32  ;;  %v5657_v35 = vadd.f32 %v5520_v32, %v5318_v41  ;;  %v5730_v30 = vrot.slane %v10525_v9, 6  ;;  %v12192_v42 = vsel %vm10372_vm4, %v10366_v15, %v10368_v34 }
 0x31a   : > { %v5596_v10 = vrot.slane %v5521_v19, 4  ;;  %v4433_v16 = vpop.f32.mrf.mxu1  ;;  %v4640_v58 = vpop.f32.mrf.mxu0  ;;  %v5798_v22 = vadd.f32 %v12192_v42, %v5655_v54  ;;  %v12193_v25 = vrot.slane %v10391_v8, 4  ;;  %v10543_v43 = vrot.slane %v5725_v60, 4 }
 0x31b   : > { %v10547_v36 = vsel %vm10372_vm4, %v7033_v28, %v5730_v30  ;;  %v5323_v46 = vcombine.low %v4426_v39, %v4428_v6  ;;  %v12194_v15 = vrot.slane %v10380_v13, 4  ;;  %v7009_v54 = vrot.slane %v10509_v12, 9 }
 0x31c   : > { %v5800_v17 = vadd.f32 %v12193_v25, %v5657_v35  ;;  %v5656_v32 = vadd.f32 %v5596_v10, %v5315_v52  ;;  %v4437_v19 = vpop.f32.mrf.mxu1  ;;  %v4642_v14 = vpop.f32.mrf.mxu0  ;;  %v12196_v42 = vrot.slane %v10404_v3, 4  ;;  %v5324_v35 = vcombine.high %v4426_v39, %v4428_v6 }
 0x31d   : > { %v10551_v34 = vadd.f32 %v12194_v15, %v5798_v22  ;;  %v5525_v10 = vrot.slane %v5323_v46, 5  ;;  %v4635_v28 = vadd.f32 %v4634_v7, %v10014_v21  ;;  %v4432_v22 = vadd.f32 %v4431_v29, %v9865_v18 }
 0x31e   : > { %v10556_v8 = vadd.f32 %v12196_v42, %v5800_v17  ;;  %v10559_v52 = vadd.f32 %v10400_v40, %v5656_v32  ;;  %v4439_v25 = vpop.f32.mrf.mxu1  ;;  %v4646_v41 = vpop.f32.mrf.mxu0  ;;  %v5528_v13 = vrot.slane %v5324_v35, 5  ;;  %v4637_v15 = vadd.f32 %v4636_v38, %v10021_v49 }
 0x31f   : > { %12195 = vst [vmem:[#allocation117_spill] sm:$0xff] %v10551_v34  ;;  %v4434_v3 = vadd.f32 %v4433_v16, %v9878_v45  ;;  %v5526_v39 = vsel %vm10494_vm6, %v7009_v54, %v5525_v10  ;;  %v5527_v6 = vrot.slane %v5525_v10, 4  ;;  %v4641_v40 = vadd.f32 %v4640_v58, %v10028_v20 }
 0x320   : > { %12197 = vst [vmem:[#allocation118_spill] sm:$0xff] %v10556_v8  ;;  %12198 = vst [vmem:[#allocation119_spill] sm:$0xff] %v10559_v52  ;;  %v4643_v17 = vadd.f32 %v4642_v14, %v10035_v1  ;;  %v4443_v32 = vpop.f32.mrf.mxu1  ;;  %v4648_v42 = vpop.f32.mrf.mxu0  ;;  %v5598_v21 = vrot.slane %v5526_v39, 4  ;;  %v5660_v7 = vadd.f32 %v5528_v13, %v5324_v35  ;;  %v10570_v63 = vcombine.low %v4635_v28, %v4637_v15 }
 0x321   : > { %v10572_v60 = vcombine.high %v4635_v28, %v4637_v15  ;;  %v5529_v18 = vsel %vm10494_vm6, %v5527_v6, %v5528_v13  ;;  %v5329_v45 = vcombine.low %v4432_v22, %v4434_v3  ;;  %v10576_v49 = vcombine.high %v4432_v22, %v4434_v3 }
 0x322   : > { %12199 = vst [vmem:[#allocation120_spill] sm:$0xff] %v10570_v63  ;;  %v10578_v38 = vcombine.low %v4641_v40, %v4643_v17  ;;  %v4445_v16 = vpop.f32.mrf.mxu1  ;;  %v10580_v20 = vpop.f32.mrf.mxu0  ;;  %v5599_v14 = vrot.slane %v5529_v18, 4  ;;  %v5658_v29 = vadd.f32 %v5598_v21, %v10509_v12  ;;  %v5803_v58 = vadd.f32 %v10462_v23, %v5660_v7 }
 0x323   : > { %v10585_v54 = vrot.slane %v5730_v30, 4  ;;  %v11909_v10 = vrot.slane %v10572_v60, 6  ;;  %v7010_v28 = vrot.slane %v5329_v45, 9  ;;  %v12201_v39 = vrot.slane %v10435_v51, 4 }
 0x324   : > { %v4449_v13 = vpop.f32.mrf.mxu1  ;;  %v10589_v22 = vpop.f32.mrf.mxu0  ;;  %v5659_v15 = vadd.f32 %v5599_v14, %v5323_v46  ;;  %v10592_v3 = vadd.f32 %v10416_v0, %v5658_v29  ;;  %v5533_v23 = vrot.slane %v10576_v49, 5  ;;  %v12203_v12 = vrot.slane %v10529_v26, 6 }
 0x325   : > { %v10596_v6 = vadd.f32 %v12201_v39, %v5803_v58  ;;  %v5740_v21 = vrot.slane %v11909_v10, 4  ;;  %v10605_v7 = vcombine.high %v4641_v40, %v4643_v17  ;;  %v5741_v46 = vrot.slane %v10578_v38, 6 }
 0x326   : > { %12200 = vst [vmem:[#allocation121_spill] sm:$0xff] %v10592_v3  ;;  %v10601_v30 = vrot.slane %v12203_v12, 4  ;;  %v4451_v18 = vpop.f32.mrf.mxu1  ;;  %v10608_v0 = vpop.f32.mrf.mxu0  ;;  %v5802_v51 = vadd.f32 %v10429_v33, %v5659_v15  ;;  %v5534_v14 = vsel %vm10494_vm6, %v7010_v28, %v5533_v23  ;;  %v4438_v29 = vadd.f32 %v4437_v19, %v9893_v31  ;;  %v12252_v3 = vld [vmem:[#allocation25_spill] sm:$0xff] }
 0x327   : > { %12202 = vst [vmem:[#allocation122_spill] sm:$0xff] %v10596_v6  ;;  %v4440_v58 = vadd.f32 %v4439_v25, %v9905_v27  ;;  %v5601_v40 = vrot.slane %v5534_v14, 4  ;;  %v10619_v17 = vsel %vm10372_vm4, %v5740_v21, %v5741_v46  ;;  %v12204_v33 = vrot.slane %v10421_v5, 4 }
 0x328   : > { %v10621_v1 = vpop.f32.mrf.mxu1  ;;  %v10623_v10 = vpop.f32.mrf.mxu0  ;;  %v4647_v14 = vadd.f32 %v4646_v41, %v10042_v55  ;;  %v4649_v21 = vadd.f32 %v4648_v42, %v10049_v47  ;;  %v5535_v35 = vrot.slane %v5533_v23, 4  ;;  %v4444_v5 = vadd.f32 %v4443_v32, %v9916_v59 }
 0x329   : > { %v10627_v28 = vadd.f32 %v12204_v33, %v5802_v51  ;;  %v5338_v27 = vcombine.low %v4438_v29, %v4440_v58  ;;  %v5339_v19 = vcombine.high %v4438_v29, %v4440_v58  ;;  %v5661_v25 = vadd.f32 %v5601_v40, %v5329_v45 }
 0x32a   : > { %v10633_v12 = vpop.f32.mrf.mxu1  ;;  %v10635_v39 = vpop.f32.mrf.mxu0  ;;  %v4446_v51 = vadd.f32 %v4445_v16, %v9923_v61  ;;  %v10640_v29 = vrot.slane %v5741_v46, 4  ;;  %v10642_v45 = vcombine.low %v4647_v14, %v4649_v21  ;;  %v10644_v58 = vcombine.high %v4647_v14, %v4649_v21 }
 0x32b   : > { %12205 = vst [vmem:[#allocation123_spill] sm:$0xff] %v10627_v28  ;;  %v5536_v9 = vrot.slane %v5338_v27, 5  ;;  %v5804_v33 = vadd.f32 %v10443_v57, %v5661_v25  ;;  %v12207_v61 = vrot.slane %v10437_v11, 4  ;;  %v7035_v57 = vrot.slane %v10605_v7, 10 }
 0x32c   : > { %12206 = vst [vmem:[#allocation124_spill] sm:$0xff] %v10642_v45  ;;  %v10646_v55 = vpop.f32.mrf.mxu1  ;;  %v10648_v47 = vpop.f32.mrf.mxu0  ;;  %v5347_v23 = vcombine.low %v4444_v5, %v4446_v51  ;;  %v5348_v59 = vcombine.high %v4444_v5, %v4446_v51  ;;  %v5746_v46 = vrot.slane %v10642_v45, 6  ;;  %v7011_v21 = vrot.slane %v5339_v19, 9  ;;  %v12209_v51 = vld [vmem:[#allocation10_spill] sm:$0xff] }
 0x32d   : > { %v5537_v41 = vsel %vm10494_vm6, %v5535_v35, %v5536_v9  ;;  %v5663_v42 = vadd.f32 %v5536_v9, %v5338_v27  ;;  %v10654_v32 = vadd.f32 %v12207_v61, %v5804_v33  ;;  %v4653_v5 = vadd.f32 %v10580_v20, %v10056_v4  ;;  %v12213_v4 = vld [vmem:[#allocation12_spill] sm:$0xff] }
 0x32e   : > { %v5602_v16 = vrot.slane %v5537_v41, 4  ;;  %v10658_v40 = vpop.f32.mrf.mxu1  ;;  %v10660_v25 = vpop.f32.mrf.mxu0  ;;  %v5541_v35 = vrot.slane %v5347_v23, 5  ;;  %v10667_v11 = vsel %vm10372_vm4, %v7035_v57, %v5746_v46  ;;  %v4450_v33 = vadd.f32 %v4449_v13, %v12209_v51  ;;  %v12214_v13 = vld [vmem:[#allocation8_spill] sm:$0xff] }
 0x32f   : > { %12208 = vst [vmem:[#allocation125_spill] sm:$0xff] %v10654_v32  ;;  %v5806_v9 = vadd.f32 %v10483_v62, %v5663_v42  ;;  %v12210_v31 = vrot.slane %v10460_v53, 4  ;;  %v5544_v42 = vrot.slane %v5348_v59, 5  ;;  %v4655_v20 = vadd.f32 %v10589_v22, %v12213_v4 }
 0x330   : > { %v5662_v27 = vadd.f32 %v5602_v16, %v10576_v49  ;;  %v10672_v41 = vpop.f32.mrf.mxu1  ;;  %v10674_v61 = vpop.f32.mrf.mxu0  ;;  %v5542_v62 = vsel %vm10494_vm6, %v7011_v21, %v5541_v35  ;;  %v5543_v49 = vrot.slane %v5541_v35, 4  ;;  %v4452_v51 = vadd.f32 %v4451_v18, %v12214_v13 }
 0x331   : > { %v10678_v14 = vadd.f32 %v12210_v31, %v5806_v9  ;;  %v5604_v16 = vrot.slane %v5542_v62, 4  ;;  %v5666_v21 = vadd.f32 %v5544_v42, %v5348_v59  ;;  %v12215_v9 = vrot.slane %v10474_v44, 6  ;;  %v12217_v59 = vld [vmem:[#allocation113_spill] sm:$0xff] }
 0x332   : > { %v10683_v57 = vadd.f32 %v10454_v50, %v5662_v27  ;;  %v10688_v15 = vpop.f32.mrf.mxu1  ;;  %v10690_v32 = vpop.f32.mrf.mxu0  ;;  %v5545_v31 = vsel %vm10494_vm6, %v5543_v49, %v5544_v42  ;;  %v12216_v50 = vrot.slane %v10472_v2, 10  ;;  %v10701_v18 = vcombine.low %v4653_v5, %v4655_v20 }
 0x333   : > { %12211 = vst [vmem:[#allocation10_spill] sm:$0xff] %v10678_v14  ;;  %v5605_v22 = vrot.slane %v5545_v31, 4  ;;  %v5664_v27 = vadd.f32 %v5604_v16, %v5339_v19  ;;  %v10703_v62 = vcombine.high %v4653_v5, %v4655_v20  ;;  %v5809_v42 = vadd.f32 %v12217_v59, %v5666_v21  ;;  %v12218_v19 = vld [vmem:[#allocation112_spill] sm:$0xff]  ;;  %v12224_v59 = vld [vmem:[#allocation114_spill] sm:$0xff] }
 0x334   : > { %12212 = vst [vmem:[#allocation126_spill] sm:$0xff] %v10683_v57  ;;  %v5723_v35 = vsel %vm10372_vm4, %v12216_v50, %v12215_v9  ;;  %v10705_v4 = vpop.f32.mrf.mxu1  ;;  %v10707_v13 = vpop.f32.mrf.mxu0  ;;  %v5356_v53 = vcombine.low %v4450_v33, %v4452_v51  ;;  %v5357_v14 = vcombine.high %v4450_v33, %v4452_v51  ;;  %v10711_v2 = vrot.slane %v5746_v46, 4  ;;  %v12223_v46 = vld [vmem:[#allocation15_spill] sm:$0xff] }
 0x335   : > { %v5665_v31 = vadd.f32 %v5605_v22, %v5347_v23  ;;  %v10715_v16 = vadd.f32 %v12218_v19, %v5664_v27  ;;  %v12220_v50 = vrot.slane %v10644_v58, 6  ;;  %v12221_v49 = vrot.slane %v10504_v48, 4  ;;  %v12225_v19 = vld [vmem:[#allocation19_spill] sm:$0xff]  ;;  %v12226_v48 = vld [vmem:[#allocation4_spill] sm:$0xff] }
 0x336   : > { %v10717_v5 = vpop.f32.mrf.mxu1  ;;  %v4682_v20 = vpop.f32.mrf.mxu0  ;;  %v7012_v33 = vrot.slane %v5356_v53, 9  ;;  %v4659_v51 = vadd.f32 %v10608_v0, %v12223_v46  ;;  %v5549_v27 = vrot.slane %v5357_v14, 5  ;;  %v12228_v0 = vld [vmem:[#allocation18_spill] sm:$0xff]  ;;  %v12229_v46 = vrot.slane %v10474_v44, 4 }
 0x337   : > { %12219 = vst [vmem:[#allocation12_spill] sm:$0xff] %v10715_v16  ;;  %v10721_v57 = vrot.slane %v12220_v50, 4  ;;  %v10725_v21 = vadd.f32 %v12221_v49, %v5809_v42  ;;  %v5808_v23 = vadd.f32 %v12224_v59, %v5665_v31  ;;  %v4661_v20 = vadd.f32 %v10623_v10, %v12225_v19  ;;  %v12227_v42 = vld [vmem:[#allocation5_spill] sm:$0xff] }
 0x338   : > { %v10733_v9 = vpop.f32.mrf.mxu1  ;;  %v4683_v50 = vpop.f32.mrf.mxu0  ;;  %v4456_v49 = vadd.f32 %v10621_v1, %v12226_v48  ;;  %v4667_v31 = vadd.f32 %v10648_v47, %v12228_v0  ;;  %v5550_v10 = vsel %vm10494_vm6, %v7012_v33, %v5549_v27  ;;  %v12232_v44 = vrot.slane %v10703_v62, 6 }
 0x339   : > { %12222 = vst [vmem:[#allocation8_spill] sm:$0xff] %v10725_v21  ;;  %v4458_v21 = vadd.f32 %v10633_v12, %v12227_v42  ;;  %v10744_v59 = vadd.f32 %v12229_v46, %v5808_v23  ;;  %v10748_v19 = vcombine.low %v4659_v51, %v4661_v20  ;;  %v12231_v50 = vld [vmem:[#allocation20_spill] sm:$0xff]  ;;  %v5607_v48 = vrot.slane %v5550_v10, 4 }
 0x33a   : > { %v4665_v45 = vadd.f32 %v10635_v39, %v12231_v50  ;;  %v10752_v22 = vpop.f32.mrf.mxu1  ;;  %v4920_v1 = vpop.f32.mrf.mxu0  ;;  %v10754_v12 = vcombine.high %v4659_v51, %v4661_v20  ;;  %v5756_v23 = vrot.slane %v12232_v44, 4  ;;  %v5551_v10 = vrot.slane %v5549_v27, 4  ;;  %v12245_v50 = vld [vmem:[#allocation115_spill] sm:$0xff] }
 0x33b   : > { %12230 = vst [vmem:[#allocation113_spill] sm:$0xff] %v10744_v59  ;;  %v5365_v42 = vcombine.low %v4456_v49, %v4458_v21  ;;  %v10756_v47 = vcombine.high %v4456_v49, %v4458_v21  ;;  %v5757_v0 = vrot.slane %v10748_v19, 6  ;;  %v5667_v51 = vadd.f32 %v5607_v48, %v5356_v53  ;;  %v12234_v1 = vld [vmem:[#allocation6_spill] sm:$0xff] }
 0x33c   : > { %v10761_v33 = vcombine.low %v4665_v45, %v4667_v31  ;;  %v10763_v46 = vcombine.high %v4665_v45, %v4667_v31  ;;  %v10765_v59 = vpop.f32.mrf.mxu1  ;;  %v4921_v39 = vpop.f32.mrf.mxu0  ;;  %v7037_v49 = vrot.slane %v10754_v12, 10  ;;  %v4462_v44 = vadd.f32 %v10646_v55, %v12234_v1 }
 0x33d   : > { %v5552_v20 = vrot.slane %v5365_v42, 5  ;;  %v10770_v21 = vsel %vm10372_vm4, %v5756_v23, %v5757_v0  ;;  %v5810_v39 = vadd.f32 %v5723_v35, %v5667_v51  ;;  %v10781_v48 = vrot.slane %v5757_v0, 4 }
 0x33e   : > { %12233 = vst [vmem:[#allocation112_spill] sm:$0xff] %v10761_v33  ;;  %v5762_v45 = vrot.slane %v10761_v33, 6  ;;  %v10776_v31 = vpop.f32.mrf.mxu1  ;;  %v4924_v16 = vpop.f32.mrf.mxu0  ;;  %v12235_v35 = vrot.slane %v10506_v56, 4  ;;  %v7013_v51 = vrot.slane %v10756_v47, 9  ;;  %v12239_v56 = vld [vmem:[#allocation27_spill] sm:$0xff] }
 0x33f   : > { %v5553_v53 = vsel %vm10494_vm6, %v5551_v10, %v5552_v20  ;;  %v5669_v27 = vadd.f32 %v5552_v20, %v5365_v42  ;;  %v12237_v20 = vld [vmem:[#allocation21_spill] sm:$0xff] }
 0x340   : > { %v5608_v6 = vrot.slane %v5553_v53, 4  ;;  %v10786_v55 = vsel %vm10372_vm4, %v7037_v49, %v5762_v45  ;;  %v10788_v1 = vpop.f32.mrf.mxu1  ;;  %v4925_v28 = vpop.f32.mrf.mxu0  ;;  %v10792_v16 = vadd.f32 %v12235_v35, %v5810_v39  ;;  %v4464_v53 = vadd.f32 %v10658_v40, %v12237_v20  ;;  %v12243_v20 = vld [vmem:[#allocation28_spill] sm:$0xff] }
 0x341   : > { %v5812_v42 = vadd.f32 %v10543_v43, %v5669_v27  ;;  %v12238_v49 = vrot.slane %v10529_v26, 6  ;;  %v10808_v39 = vadd.f32 %v10660_v25, %v12239_v56  ;;  %v12240_v27 = vrot.slane %v10529_v26, 4 }
 0x342   : > { %12236 = vst [vmem:[#allocation15_spill] sm:$0xff] %v10792_v16  ;;  %v5668_v10 = vadd.f32 %v5608_v6, %v5357_v14  ;;  %v10810_v35 = vpop.f32.mrf.mxu1  ;;  %v4928_v43 = vpop.f32.mrf.mxu0  ;;  %v12242_v14 = vld [vmem:[#allocation24_spill] sm:$0xff]  ;;  %v10820_v23 = vadd.f32 %v10674_v61, %v12243_v20  ;;  %v5374_v56 = vcombine.low %v4462_v44, %v4464_v53  ;;  %v5375_v0 = vcombine.high %v4462_v44, %v4464_v53 }
 0x343   : > { %v10804_v28 = vsel %vm10372_vm4, %v10585_v54, %v12238_v49  ;;  %v10814_v6 = vadd.f32 %v12240_v27, %v5812_v42  ;;  %v4468_v40 = vadd.f32 %v10672_v41, %v12242_v14  ;;  %v12244_v54 = vld [vmem:[#allocation22_spill] sm:$0xff]  ;;  %v12247_v43 = vrot.slane %v10572_v60, 6 }
 0x344   : > { %v4470_v49 = vadd.f32 %v10688_v15, %v12244_v54  ;;  %v10825_v25 = vadd.f32 %v12245_v50, %v5668_v10  ;;  %v12248_v26 = vrot.slane %v10570_v63, 10  ;;  %v10833_v41 = vpop.f32.mrf.mxu1  ;;  %v4929_v27 = vpop.f32.mrf.mxu0  ;;  %v10839_v14 = vrot.slane %v5762_v45, 4 }
 0x345   : > { %12241 = vst [vmem:[#allocation114_spill] sm:$0xff] %v10814_v6  ;;  %v12249_v44 = vrot.slane %v10763_v46, 6  ;;  %v5557_v20 = vrot.slane %v5374_v56, 5  ;;  %v5560_v54 = vrot.slane %v5375_v0, 5  ;;  %v12250_v6 = vld [vmem:[#allocation29_spill] sm:$0xff] }
 0x346   : > { %12246 = vst [vmem:[#allocation19_spill] sm:$0xff] %v10825_v25  ;;  %v5739_v42 = vsel %vm10372_vm4, %v12248_v26, %v12247_v43  ;;  %v5383_v50 = vcombine.low %v4468_v40, %v4470_v49  ;;  %v5384_v10 = vcombine.high %v4468_v40, %v4470_v49  ;;  %v10845_v43 = vpop.f32.mrf.mxu1  ;;  %v10847_v26 = vpop.f32.mrf.mxu0  ;;  %v10852_v15 = vadd.f32 %v10690_v32, %v12250_v6  ;;  %v12253_v6 = vld [vmem:[#allocation7_spill] sm:$0xff] }
 0x347   : > { %v10843_v53 = vrot.slane %v12249_v44, 4  ;;  %v5558_v45 = vsel %vm10494_vm6, %v7013_v51, %v5557_v20  ;;  %v5559_v40 = vrot.slane %v5557_v20, 4  ;;  %v5672_v49 = vadd.f32 %v5560_v54, %v5375_v0  ;;  %v12251_v44 = vld [vmem:[#allocation30_spill] sm:$0xff] }
 0x348   : > { %v7014_v61 = vrot.slane %v5383_v50, 9  ;;  %v5565_v63 = vrot.slane %v5384_v10, 5  ;;  %v10858_v16 = vadd.f32 %v10707_v13, %v12251_v44  ;;  %v4503_v25 = vpop.f32.mrf.mxu1  ;;  %v10860_v8 = vpop.f32.mrf.mxu0  ;;  %v5610_v34 = vrot.slane %v5558_v45, 4 }
 0x349   : > { %v4474_v32 = vadd.f32 %v10705_v4, %v12252_v3  ;;  %v4476_v52 = vadd.f32 %v10717_v5, %v12253_v6  ;;  %v5561_v51 = vsel %vm10494_vm6, %v5559_v40, %v5560_v54  ;;  %v5815_v0 = vadd.f32 %v10601_v30, %v5672_v49  ;;  %v12255_v40 = vld [vmem:[#allocation13_spill] sm:$0xff] }
 0x34a   : > { %v5566_v27 = vsel %vm10494_vm6, %v7014_v61, %v5565_v63  ;;  %v4504_v20 = vpop.f32.mrf.mxu1  ;;  %v10873_v45 = vpop.f32.mrf.mxu0  ;;  %v5611_v44 = vrot.slane %v5561_v51, 4  ;;  %v5670_v61 = vadd.f32 %v5610_v34, %v10756_v47  ;;  %v12254_v4 = vrot.slane %v10578_v38, 4 }
 0x34b   : > { %v5613_v13 = vrot.slane %v5566_v27, 4  ;;  %v5392_v33 = vcombine.low %v4474_v32, %v4476_v52  ;;  %v5393_v3 = vcombine.high %v4474_v32, %v4476_v52  ;;  %v5567_v6 = vrot.slane %v5565_v63, 4  ;;  %v12256_v52 = vld [vmem:[#allocation14_spill] sm:$0xff] }
 0x34c   : > { %v10878_v5 = vadd.f32 %v12254_v4, %v5815_v0  ;;  %v4480_v30 = vadd.f32 %v10733_v9, %v12255_v40  ;;  %v4507_v27 = vpop.f32.mrf.mxu1  ;;  %v10882_v49 = vpop.f32.mrf.mxu0  ;;  %v5671_v20 = vadd.f32 %v5611_v44, %v5374_v56  ;;  %v10885_v25 = vadd.f32 %v10547_v36, %v5670_v61  ;;  %v12258_v9 = vld [vmem:[#allocation23_spill] sm:$0xff] }
 0x34d   : > { %v5673_v54 = vadd.f32 %v5613_v13, %v5383_v50  ;;  %v5568_v51 = vrot.slane %v5392_v33, 5  ;;  %v7015_v34 = vrot.slane %v5393_v3, 9  ;;  %v4482_v38 = vadd.f32 %v10752_v22, %v12256_v52  ;;  %v12259_v22 = vld [vmem:[#allocation26_spill] sm:$0xff] }
 0x34e   : > { %v12257_v32 = vrot.slane %v10644_v58, 6  ;;  %v4486_v50 = vadd.f32 %v10765_v59, %v12258_v9  ;;  %v4508_v56 = vpop.f32.mrf.mxu1  ;;  %v10898_v0 = vpop.f32.mrf.mxu0  ;;  %v5814_v36 = vadd.f32 %v10804_v28, %v5671_v20  ;;  %v4488_v44 = vadd.f32 %v10776_v31, %v12259_v22 }
 0x34f   : > { %v5816_v47 = vadd.f32 %v5739_v42, %v5673_v54  ;;  %v5569_v42 = vsel %vm10494_vm6, %v5567_v6, %v5568_v51  ;;  %v5675_v13 = vadd.f32 %v5568_v51, %v5392_v33  ;;  %v12260_v61 = vrot.slane %v10605_v7, 4 }
 0x350   : > { %v10894_v63 = vsel %vm10372_vm4, %v10711_v2, %v12257_v32  ;;  %v5614_v2 = vrot.slane %v5569_v42, 4  ;;  %v5401_v54 = vcombine.low %v4480_v30, %v4482_v38  ;;  %v5402_v40 = vcombine.high %v4480_v30, %v4482_v38  ;;  %v4511_v59 = vpop.f32.mrf.mxu1  ;;  %v10909_v27 = vpop.f32.mrf.mxu0 }
 0x351   : > { %v10907_v4 = vadd.f32 %v12260_v61, %v5816_v47  ;;  %v12261_v52 = vrot.slane %v10572_v60, 4  ;;  %v5818_v6 = vadd.f32 %v10640_v29, %v5675_v13  ;;  %v5410_v33 = vcombine.low %v4486_v50, %v4488_v44 }
 0x352   : > { %v5411_v20 = vcombine.high %v4486_v50, %v4488_v44  ;;  %v5674_v51 = vadd.f32 %v5614_v2, %v5384_v10  ;;  %v5573_v31 = vrot.slane %v5401_v54, 5  ;;  %v5576_v32 = vrot.slane %v5402_v40, 5  ;;  %v4512_v38 = vpop.f32.mrf.mxu1  ;;  %v10922_v9 = vpop.f32.mrf.mxu0  ;;  %v12265_v50 = vld [vmem:[#allocation16_spill] sm:$0xff] }
 0x353   : > { %v10913_v28 = vadd.f32 %v12261_v52, %v5814_v36  ;;  %v12262_v7 = vrot.slane %v10703_v62, 6  ;;  %v12263_v47 = vrot.slane %v10701_v18, 10  ;;  %v12264_v60 = vrot.slane %v10644_v58, 4 }
 0x354   : > { %v7016_v29 = vrot.slane %v5410_v33, 9  ;;  %v5581_v36 = vrot.slane %v5411_v20, 5  ;;  %v4492_v10 = vadd.f32 %v10788_v1, %v12265_v50  ;;  %v10931_v42 = vadd.f32 %v10619_v17, %v5674_v51  ;;  %v4751_v61 = vpop.f32.mrf.mxu1  ;;  %v10935_v2 = vpop.f32.mrf.mxu0 }
 0x355   : > { %v5755_v30 = vsel %vm10372_vm4, %v12263_v47, %v12262_v7  ;;  %v10926_v56 = vadd.f32 %v12264_v60, %v5818_v6  ;;  %v5574_v13 = vsel %vm10494_vm6, %v7015_v34, %v5573_v31  ;;  %v5575_v22 = vrot.slane %v5573_v31, 4  ;;  %v12266_v6 = vld [vmem:[#allocation11_spill] sm:$0xff]  ;;  %v12267_v34 = vld [vmem:[#allocation9_spill] sm:$0xff] }
 0x356   : > { %v5678_v44 = vadd.f32 %v5576_v32, %v5402_v40  ;;  %v5616_v59 = vrot.slane %v5574_v13, 4  ;;  %v5582_v58 = vsel %vm10494_vm6, %v7016_v29, %v5581_v36  ;;  %v5583_v52 = vrot.slane %v5581_v36, 4  ;;  %v4752_v31 = vpop.f32.mrf.mxu1  ;;  %v10946_v47 = vpop.f32.mrf.mxu0  ;;  %v12270_v61 = vld [vmem:[#allocation17_spill] sm:$0xff] }
 0x357   : > { %v4494_v7 = vadd.f32 %v10810_v35, %v12266_v6  ;;  %v5577_v17 = vsel %vm10494_vm6, %v5575_v22, %v5576_v32  ;;  %v5619_v51 = vrot.slane %v5582_v58, 4  ;;  %v4498_v40 = vadd.f32 %v10833_v41, %v12267_v34 }
 0x358   : > { %v5821_v1 = vadd.f32 %v10721_v57, %v5678_v44  ;;  %v5617_v38 = vrot.slane %v5577_v17, 4  ;;  %v5676_v60 = vadd.f32 %v5616_v59, %v5393_v3  ;;  %v12268_v36 = vrot.slane %v10748_v19, 4  ;;  %v10959_v22 = vpop.f32.mrf.mxu1  ;;  %v10961_v44 = vpop.f32.mrf.mxu0 }
 0x359   : > { %v5419_v50 = vcombine.low %v4492_v10, %v4494_v7  ;;  %v5420_v29 = vcombine.high %v4492_v10, %v4494_v7  ;;  %v5679_v35 = vadd.f32 %v5619_v51, %v5410_v33  ;;  %v4500_v32 = vadd.f32 %v10845_v43, %v12270_v61  ;;  %v12272_v43 = vld [vmem:[#allocation41_spill] sm:$0xff] }
 0x35a   : > { %v10950_v13 = vadd.f32 %v12268_v36, %v5821_v1  ;;  %v12271_v57 = vrot.slane %v10763_v46, 6  ;;  %v5677_v3 = vadd.f32 %v5617_v38, %v5401_v54  ;;  %v10964_v10 = vadd.f32 %v10667_v11, %v5676_v60  ;;  %v10968_v17 = vpop.f32.mrf.mxu1  ;;  %v12273_v54 = vld [vmem:[#allocation43_spill] sm:$0xff]  ;;  %v10975_v34 = vpop.f32.mrf.mxu0 }
 0x35b   : > { %v5584_v19 = vrot.slane %v5419_v50, 5  ;;  %v7017_v59 = vrot.slane %v5420_v29, 9  ;;  %v5822_v33 = vadd.f32 %v5755_v30, %v5679_v35  ;;  %v5428_v58 = vcombine.low %v4498_v40, %v4500_v32 }
 0x35c   : > { %12269 = vst [vmem:[#allocation4_spill] sm:$0xff] %v10950_v13  ;;  %v5766_v41 = vsel %vm10372_vm4, %v10839_v14, %v12271_v57  ;;  %v5429_v6 = vcombine.high %v4498_v40, %v4500_v32  ;;  %v4933_v7 = vadd.f32 %v10847_v26, %v12272_v43  ;;  %v5820_v14 = vadd.f32 %v10894_v63, %v5677_v3  ;;  %v10981_v60 = vpop.f32.mrf.mxu1  ;;  %v11002_v43 = vpop.f32.mrf.mxu0 }
 0x35d   : > { %v5585_v1 = vsel %vm10494_vm6, %v5583_v52, %v5584_v19  ;;  %v5681_v51 = vadd.f32 %v5584_v19, %v5419_v50  ;;  %v4935_v11 = vadd.f32 %v10860_v8, %v12273_v54  ;;  %v12274_v30 = vrot.slane %v10754_v12, 4 }
 0x35e   : > { %v5620_v40 = vrot.slane %v5585_v1, 4  ;;  %v5589_v38 = vrot.slane %v5428_v58, 5  ;;  %v5592_v26 = vrot.slane %v5429_v6, 5  ;;  %v12276_v63 = vrot.slane %v10703_v62, 4  ;;  %v10994_v57 = vpop.f32.mrf.mxu1 }
 0x35f   : > { %v10979_v31 = vadd.f32 %v12274_v30, %v5822_v33  ;;  %v5824_v52 = vadd.f32 %v10781_v48, %v5681_v51  ;;  %v10988_v50 = vcombine.low %v4933_v7, %v4935_v11  ;;  %v10990_v8 = vcombine.high %v4933_v7, %v4935_v11  ;;  %v12284_v30 = vld [vmem:[#allocation45_spill] sm:$0xff] }
 0x360   : > { %v10985_v36 = vadd.f32 %v12276_v63, %v5820_v14  ;;  %v5680_v35 = vadd.f32 %v5620_v40, %v5411_v20  ;;  %v5590_v12 = vsel %vm10494_vm6, %v7017_v59, %v5589_v38  ;;  %v5591_v61 = vrot.slane %v5589_v38, 4  ;;  %v11013_v14 = vpop.f32.mrf.mxu1  ;;  %v12287_v38 = vld [vmem:[#allocation47_spill] sm:$0xff] }
 0x361   : > { %12275 = vst [vmem:[#allocation5_spill] sm:$0xff] %v10979_v31  ;;  %12277 = vst [vmem:[#allocation18_spill] sm:$0xff] %v10988_v50  ;;  %v5684_v32 = vadd.f32 %v5592_v26, %v5429_v6  ;;  %v12279_v3 = vrot.slane %v10763_v46, 4  ;;  %v5622_v62 = vrot.slane %v5590_v12, 4  ;;  %v7068_v33 = vrot.slane %v10988_v50, 9  ;;  %v12361_v31 = vld [vmem:[#allocation42_spill] sm:$0xff] }
 0x362   : > { %12278 = vst [vmem:[#allocation20_spill] sm:$0xff] %v10990_v8  ;;  %v6260_v48 = vrot.slane %v10990_v8, 5  ;;  %v12281_v20 = vcombine.low %v10852_v15, %v10858_v16  ;;  %v11008_v59 = vadd.f32 %v10770_v21, %v5680_v35  ;;  %v5593_v6 = vsel %vm10494_vm6, %v5591_v61, %v5592_v26  ;;  %v11028_v26 = vpop.f32.mrf.mxu1  ;;  %v4968_v61 = vpop.f32.mrf.mxu0 }
 0x363   : > { %v10998_v19 = vadd.f32 %v12279_v3, %v5824_v52  ;;  %v5827_v46 = vadd.f32 %v10843_v53, %v5684_v32  ;;  %v12283_v1 = vcombine.high %v10808_v39, %v10820_v23  ;;  %v5623_v54 = vrot.slane %v5593_v6, 4 }
 0x364   : > { %v5857_v7 = vrot.slane %v12281_v20, 4  ;;  %12282 = vst [vmem:[#allocation21_spill] sm:$0xff] %v11008_v59  ;;  %v5682_v11 = vadd.f32 %v5622_v62, %v5420_v29  ;;  %v4939_v16 = vadd.f32 %v10873_v45, %v12284_v30  ;;  %v11024_v21 = vsel %vm10494_vm6, %v7068_v33, %v6260_v48  ;;  %v12289_v29 = vld [vmem:[#allocation49_spill] sm:$0xff]  ;;  %v12290_v45 = vld [vmem:[#allocation51_spill] sm:$0xff] }
 0x365   : > { %12280 = vst [vmem:[#allocation6_spill] sm:$0xff] %v10998_v19  ;;  %v5856_v51 = vrot.slane %v12283_v1, 4  ;;  %12286 = vst [vmem:[#allocation24_spill] sm:$0xff] %v11024_v21  ;;  %v6262_v40 = vrot.slane %v6260_v48, 4  ;;  %v4941_v53 = vadd.f32 %v10882_v49, %v12287_v38  ;;  %v5683_v63 = vadd.f32 %v5623_v54, %v5428_v58  ;;  %v12293_v62 = vld [vmem:[#allocation53_spill] sm:$0xff]  ;;  %v12294_v33 = vld [vmem:[#allocation55_spill] sm:$0xff]  ;;  %v11045_v48 = vpop.f32.mrf.mxu1  ;;  %v4970_v38 = vpop.f32.mrf.mxu0 }
 0x366   : > { %v11020_v15 = vadd.f32 %v5857_v7, %v5827_v46  ;;  %v11031_v52 = vadd.f32 %v10786_v55, %v5682_v11  ;;  %v4945_v35 = vadd.f32 %v10898_v0, %v12289_v29  ;;  %v4947_v12 = vadd.f32 %v10909_v27, %v12290_v45  ;;  %v12297_v7 = vld [vmem:[#allocation57_spill] sm:$0xff] }
 0x367   : > { %v11037_v32 = vcombine.low %v4939_v16, %v4941_v53  ;;  %v11039_v3 = vcombine.high %v4939_v16, %v4941_v53  ;;  %v4951_v49 = vadd.f32 %v10922_v9, %v12293_v62  ;;  %v4953_v58 = vadd.f32 %v10935_v2, %v12294_v33  ;;  %v12299_v9 = vld [vmem:[#allocation31_spill] sm:$0xff]  ;;  %v11060_v2 = vpop.f32.mrf.mxu1 }
 0x368   : > { %12285 = vst [vmem:[#allocation27_spill] sm:$0xff] %v11020_v15  ;;  %12288 = vst [vmem:[#allocation28_spill] sm:$0xff] %v11031_v52  ;;  %v5826_v55 = vadd.f32 %v5766_v41, %v5683_v63  ;;  %v11047_v20 = vcombine.low %v4945_v35, %v4947_v12  ;;  %v11049_v0 = vcombine.high %v4945_v35, %v4947_v12  ;;  %v12301_v16 = vld [vmem:[#allocation59_spill] sm:$0xff]  ;;  %v12302_v35 = vld [vmem:[#allocation32_spill] sm:$0xff] }
 0x369   : > { %12291 = vst [vmem:[#allocation22_spill] sm:$0xff] %v11037_v32  ;;  %12292 = vst [vmem:[#allocation115_spill] sm:$0xff] %v11039_v3  ;;  %v4957_v27 = vadd.f32 %v10946_v47, %v12297_v7  ;;  %v11916_v6 = vrot.slane %v11037_v32, 5  ;;  %v11054_v46 = vcombine.low %v4951_v49, %v4953_v58  ;;  %v11056_v1 = vcombine.high %v4951_v49, %v4953_v58  ;;  %v11073_v45 = vpop.f32.mrf.mxu1  ;;  %v12313_v58 = vld [vmem:[#allocation63_spill] sm:$0xff]  ;;  %v12315_v49 = vld [vmem:[#allocation34_spill] sm:$0xff] }
 0x36a   : > { %12295 = vst [vmem:[#allocation29_spill] sm:$0xff] %v11047_v20  ;;  %12296 = vst [vmem:[#allocation30_spill] sm:$0xff] %v11049_v0  ;;  %v4756_v54 = vadd.f32 %v10959_v22, %v12299_v9  ;;  %v11062_v11 = vadd.f32 %v5856_v51, %v5826_v55  ;;  %v7069_v41 = vrot.slane %v11039_v3, 9  ;;  %v6268_v30 = vrot.slane %v11047_v20, 5 }
 0x36b   : > { %12298 = vst [vmem:[#allocation25_spill] sm:$0xff] %v11054_v46  ;;  %v4959_v47 = vadd.f32 %v10961_v44, %v12301_v16  ;;  %v11917_v53 = vrot.slane %v11049_v0, 5  ;;  %v7070_v63 = vrot.slane %v11054_v46, 9  ;;  %v6276_v29 = vrot.slane %v11056_v1, 5  ;;  %v11095_v7 = vpop.f32.mrf.mxu1 }
 0x36c   : > { %12300 = vst [vmem:[#allocation7_spill] sm:$0xff] %v11062_v11  ;;  %v4758_v22 = vadd.f32 %v10968_v17, %v12302_v35  ;;  %v11079_v51 = vsel %vm10494_vm6, %v6262_v40, %v11916_v6  ;;  %v11083_v44 = vsel %vm10494_vm6, %v7069_v41, %v6268_v30  ;;  %v6270_v12 = vrot.slane %v6268_v30, 4  ;;  %v12316_v35 = vld [vmem:[#allocation119_spill] sm:$0xff]  ;;  %v12317_v30 = vld [vmem:[#allocation102_spill] sm:$0xff] }
 0x36d   : > { %12303 = vst [vmem:[#allocation13_spill] sm:$0xff] %v11079_v51  ;;  %12304 = vst [vmem:[#allocation14_spill] sm:$0xff] %v11083_v44  ;;  %v11085_v62 = vcombine.low %v4957_v27, %v4959_v47  ;;  %v11091_v17 = vsel %vm10494_vm6, %v7070_v63, %v6276_v29  ;;  %v11093_v55 = vcombine.high %v4957_v27, %v4959_v47  ;;  %v11109_v63 = vpop.f32.mrf.mxu0  ;;  %v12314_v27 = vld [vmem:[#allocation33_spill] sm:$0xff]  ;;  %v12318_v46 = vrot.slane %v12317_v30, 4 }
 0x36e   : > { %12307 = vst [vmem:[#allocation26_spill] sm:$0xff] %v11091_v17  ;;  %v12309_v40 = vcombine.low %v10808_v39, %v10820_v23  ;;  %v11106_v41 = vsel %vm10494_vm6, %v6270_v12, %v11917_v53  ;;  %v5322_v16 = vcombine.high %v4756_v54, %v4758_v22  ;;  %v6278_v23 = vrot.slane %v6276_v29, 4  ;;  %v11114_v39 = vpop.f32.mrf.mxu1  ;;  %v12312_v12 = vld [vmem:[#allocation61_spill] sm:$0xff] }
 0x36f   : > { %12305 = vst [vmem:[#allocation23_spill] sm:$0xff] %v11085_v62  ;;  %12308 = vst [vmem:[#allocation16_spill] sm:$0xff] %v11093_v55  ;;  %v4963_v53 = vadd.f32 %v10975_v34, %v12312_v12  ;;  %v4965_v54 = vadd.f32 %v11002_v43, %v12313_v58  ;;  %v7071_v22 = vrot.slane %v11093_v55, 9  ;;  %v4762_v47 = vadd.f32 %v10981_v60, %v12314_v27  ;;  %v12322_v58 = vld [vmem:[#allocation65_spill] sm:$0xff]  ;;  %v12323_v60 = vld [vmem:[#allocation67_spill] sm:$0xff]  ;;  %v4976_v55 = vpop.f32.mrf.mxu0 }
 0x370   : > { %v11100_v9 = vrot.slane %v12309_v40, 4  ;;  %12311 = vst [vmem:[#allocation9_spill] sm:$0xff] %v11106_v41  ;;  %v4764_v29 = vadd.f32 %v10994_v57, %v12315_v49  ;;  %v5889_v40 = vadd.f32 %v12318_v46, %v12316_v35  ;;  %v11130_v44 = vpop.f32.mrf.mxu1  ;;  %v12319_v6 = vrot.slane %v11085_v62, 5  ;;  %v12324_v30 = vld [vmem:[#allocation121_spill] sm:$0xff] }
 0x371   : > { %v11138_v43 = vcombine.low %v4963_v53, %v4965_v54  ;;  %v4969_v12 = vadd.f32 %v4968_v61, %v12322_v58  ;;  %v4971_v27 = vadd.f32 %v4970_v38, %v12323_v60  ;;  %v7038_v57 = vrot.slane %v5322_v16, 9  ;;  %v12325_v46 = vld [vmem:[#allocation105_spill] sm:$0xff]  ;;  %v4980_v41 = vpop.f32.mrf.mxu0 }
 0x372   : > { %12310 = vst [vmem:[#allocation11_spill] sm:$0xff] %v11100_v9  ;;  %v11136_v34 = vsel %vm10494_vm6, %v6278_v23, %v12319_v6  ;;  %v5327_v49 = vcombine.low %v4762_v47, %v4764_v29  ;;  %v5328_v17 = vcombine.high %v4762_v47, %v4764_v29  ;;  %v12326_v35 = vrot.slane %v12325_v46, 4  ;;  %v11147_v3 = vpop.f32.mrf.mxu1  ;;  %v12352_v9 = vld [vmem:[#allocation110_spill] sm:$0xff] }
 0x373   : > { %12320 = vst [vmem:[#allocation17_spill] sm:$0xff] %v11136_v34  ;;  %12321 = vst [vmem:[#allocation41_spill] sm:$0xff] %v11138_v43  ;;  %v7048_v8 = vrot.slane %v5322_v16, 10  ;;  %v6284_v6 = vrot.slane %v11138_v43, 5  ;;  %v11150_v23 = vcombine.low %v4969_v12, %v4971_v27  ;;  %v11152_v15 = vcombine.high %v4969_v12, %v4971_v27 }
 0x374   : > { %v11145_v51 = vadd.f32 %v12326_v35, %v12324_v30  ;;  %v11154_v61 = vcombine.high %v4963_v53, %v4965_v54  ;;  %v5920_v38 = vrot.slane %v5327_v49, 5  ;;  %v5923_v58 = vrot.slane %v5328_v17, 5  ;;  %v11156_v47 = vpop.f32.mrf.mxu1  ;;  %v12329_v35 = vld [vmem:[#allocation36_spill] sm:$0xff] }
 0x375   : > { %12327 = vst [vmem:[#allocation43_spill] sm:$0xff] %v11150_v23  ;;  %12328 = vst [vmem:[#allocation45_spill] sm:$0xff] %v11152_v15  ;;  %v6060_v60 = vrot.slane %v5327_v49, 6  ;;  %v6286_v30 = vrot.slane %v6284_v6, 4  ;;  %v6063_v46 = vrot.slane %v5328_v17, 6  ;;  %v4770_v16 = vadd.f32 %v11028_v26, %v12329_v35  ;;  %v12330_v49 = vld [vmem:[#allocation117_spill] sm:$0xff]  ;;  %v4982_v26 = vpop.f32.mrf.mxu0 }
 0x376   : > { %v5921_v43 = vsel %vm10494_vm6, %v7038_v57, %v5920_v38  ;;  %v5922_v12 = vrot.slane %v5920_v38, 4  ;;  %v5925_v27 = vrot.slane %v5923_v58, 4  ;;  %v7072_v53 = vrot.slane %v11150_v23, 9  ;;  %v11164_v54 = vpop.f32.mrf.mxu1  ;;  %v12331_v57 = vld [vmem:[#allocation118_spill] sm:$0xff] }
 0x377   : > { %v6028_v21 = vadd.f32 %v5921_v43, %v12330_v49  ;;  %v6061_v29 = vsel %vm10372_vm4, %v7048_v8, %v6060_v60  ;;  %v6062_v34 = vrot.slane %v6060_v60, 4  ;;  %v6292_v17 = vrot.slane %v11152_v15, 5  ;;  %v12333_v60 = vld [vmem:[#allocation35_spill] sm:$0xff] }
 0x378   : > { %v5924_v35 = vsel %vm10494_vm6, %v5922_v12, %v5923_v58  ;;  %v6030_v38 = vadd.f32 %v5925_v27, %v12331_v57  ;;  %v6138_v11 = vrot.slane %v6061_v29, 4  ;;  %v11174_v20 = vpop.f32.mrf.mxu1  ;;  %v11178_v23 = vsel %vm10494_vm6, %v7071_v22, %v6284_v6  ;;  %v12338_v6 = vld [vmem:[#allocation69_spill] sm:$0xff] }
 0x379   : > { %12332 = vst [vmem:[#allocation47_spill] sm:$0xff] %v11178_v23  ;;  %v6029_v43 = vadd.f32 %v5924_v35, %v5889_v40  ;;  %v6064_v8 = vsel %vm10372_vm4, %v6062_v34, %v6063_v46  ;;  %v4768_v49 = vadd.f32 %v11013_v14, %v12333_v60  ;;  %v12334_v15 = vrot.slane %v11154_v61, 5 }
 0x37a   : > { %v6139_v29 = vrot.slane %v6064_v8, 4  ;;  %v11190_v12 = vadd.f32 %v6138_v11, %v6028_v21  ;;  %v11192_v27 = vadd.f32 %v6063_v46, %v6030_v38  ;;  %v11194_v22 = vpop.f32.mrf.mxu1  ;;  %v11198_v40 = vsel %vm10494_vm6, %v7072_v53, %v6292_v17  ;;  %v12341_v21 = vld [vmem:[#allocation71_spill] sm:$0xff]  ;;  %v12342_v46 = vld [vmem:[#allocation38_spill] sm:$0xff] }
 0x37b   : > { %v11188_v58 = vsel %vm10494_vm6, %v6286_v30, %v12334_v15  ;;  %12337 = vst [vmem:[#allocation53_spill] sm:$0xff] %v11198_v40  ;;  %v5333_v34 = vcombine.low %v4768_v49, %v4770_v16  ;;  %v5334_v14 = vcombine.high %v4768_v49, %v4770_v16  ;;  %v4975_v35 = vadd.f32 %v11109_v63, %v12338_v6  ;;  %v12340_v15 = vld [vmem:[#allocation37_spill] sm:$0xff]  ;;  %v4986_v16 = vpop.f32.mrf.mxu0 }
 0x37c   : > { %12335 = vst [vmem:[#allocation49_spill] sm:$0xff] %v11188_v58  ;;  %12336 = vst [vmem:[#allocation51_spill] sm:$0xff] %v11190_v12  ;;  %v11202_v57 = vadd.f32 %v6139_v29, %v6029_v43  ;;  %v4774_v30 = vadd.f32 %v11045_v48, %v12340_v15  ;;  %v4977_v11 = vadd.f32 %v4976_v55, %v12341_v21  ;;  %v11209_v8 = vpop.f32.mrf.mxu1  ;;  %v12348_v15 = vld [vmem:[#allocation75_spill] sm:$0xff]  ;;  %v12353_v52 = vrot.slane %v12352_v9, 4 }
 0x37d   : > { %v4776_v38 = vadd.f32 %v11060_v2, %v12342_v46  ;;  %v7039_v60 = vrot.slane %v5333_v34, 9  ;;  %v5928_v53 = vrot.slane %v5334_v14, 5  ;;  %v7049_v12 = vrot.slane %v5333_v34, 10  ;;  %v4988_v23 = vpop.f32.mrf.mxu0 }
 0x37e   : > { %12339 = vst [vmem:[#allocation55_spill] sm:$0xff] %v11202_v57  ;;  %v6068_v50 = vrot.slane %v5334_v14, 6  ;;  %v11211_v49 = vcombine.low %v4975_v35, %v4977_v11  ;;  %v11213_v63 = vcombine.high %v4975_v35, %v4977_v11  ;;  %v11217_v48 = vpop.f32.mrf.mxu1  ;;  %v6294_v14 = vrot.slane %v6292_v17, 4 }
 0x37f   : > { %v5342_v43 = vcombine.low %v4774_v30, %v4776_v38  ;;  %v11215_v29 = vcombine.high %v4774_v30, %v4776_v38  ;;  %v5929_v6 = vsel %vm10494_vm6, %v7039_v60, %v5928_v53  ;;  %v5930_v11 = vrot.slane %v5928_v53, 4  ;;  %v12346_v53 = vld [vmem:[#allocation39_spill] sm:$0xff] }
 0x380   : > { %12343 = vst [vmem:[#allocation57_spill] sm:$0xff] %v11213_v63  ;;  %v6069_v34 = vsel %vm10372_vm4, %v7049_v12, %v6068_v50  ;;  %v6031_v35 = vadd.f32 %v5929_v6, %v11145_v51  ;;  %v11227_v30 = vpop.f32.mrf.mxu1  ;;  %v6070_v46 = vrot.slane %v6068_v50, 4  ;;  %v7073_v58 = vrot.slane %v11213_v63, 9  ;;  %v12345_v12 = vld [vmem:[#allocation73_spill] sm:$0xff]  ;;  %v12349_v63 = vld [vmem:[#allocation40_spill] sm:$0xff] }
 0x381   : > { %v6141_v21 = vrot.slane %v6069_v34, 4  ;;  %v5931_v38 = vrot.slane %v5342_v43, 5  ;;  %v6071_v55 = vrot.slane %v5342_v43, 6  ;;  %v4981_v17 = vadd.f32 %v4980_v41, %v12345_v12  ;;  %v12347_v34 = vld [vmem:[#allocation123_spill] sm:$0xff] }
 0x382   : > { %v11234_v57 = vpop.f32.mrf.mxu1  ;;  %v4780_v43 = vadd.f32 %v11073_v45, %v12346_v53  ;;  %v4983_v60 = vadd.f32 %v4982_v26, %v12348_v15  ;;  %v4782_v41 = vadd.f32 %v11095_v7, %v12349_v63  ;;  %v7040_v40 = vrot.slane %v11215_v29, 9  ;;  %v11254_v53 = vpop.f32.mrf.mxu0 }
 0x383   : > { %v11229_v2 = vadd.f32 %v6141_v21, %v6031_v35  ;;  %v5932_v51 = vsel %vm10494_vm6, %v5930_v11, %v5931_v38  ;;  %v5933_v6 = vrot.slane %v5931_v38, 4  ;;  %v6072_v50 = vsel %vm10372_vm4, %v6070_v46, %v6071_v55  ;;  %v12350_v11 = vld [vmem:[#allocation122_spill] sm:$0xff] }
 0x384   : > { %v6032_v35 = vadd.f32 %v5932_v51, %v12347_v34  ;;  %v6142_v21 = vrot.slane %v6072_v50, 4  ;;  %v11246_v12 = vpop.f32.mrf.mxu1  ;;  %v12351_v46 = vld [vmem:[#allocation126_spill] sm:$0xff]  ;;  %v11258_v26 = vcombine.low %v4981_v17, %v4983_v60  ;;  %v11260_v15 = vcombine.high %v4981_v17, %v4983_v60 }
 0x385   : > { %12344 = vst [vmem:[#allocation31_spill] sm:$0xff] %v11229_v2  ;;  %v6033_v38 = vadd.f32 %v5933_v6, %v12350_v11  ;;  %v7050_v2 = vrot.slane %v11215_v29, 10  ;;  %v5895_v45 = vadd.f32 %v12353_v52, %v12351_v46  ;;  %v5351_v7 = vcombine.low %v4780_v43, %v4782_v41  ;;  %v12359_v52 = vld [vmem:[#allocation79_spill] sm:$0xff]  ;;  %v12360_v46 = vld [vmem:[#allocation77_spill] sm:$0xff] }
 0x386   : > { %v11256_v51 = vadd.f32 %v6142_v21, %v6032_v35  ;;  %12355 = vst [vmem:[#allocation32_spill] sm:$0xff] %v11258_v26  ;;  %12356 = vst [vmem:[#allocation61_spill] sm:$0xff] %v11260_v15  ;;  %v11262_v63 = vpop.f32.mrf.mxu1  ;;  %v12357_v50 = vrot.slane %v11211_v49, 5  ;;  %v5352_v9 = vcombine.high %v4780_v43, %v4782_v41  ;;  %v4989_v34 = vadd.f32 %v4988_v23, %v12359_v52  ;;  %v4994_v43 = vpop.f32.mrf.mxu0  ;;  %v12364_v52 = vld [vmem:[#allocation125_spill] sm:$0xff] }
 0x387   : > { %v6203_v6 = vadd.f32 %v6071_v55, %v6033_v38  ;;  %v6300_v35 = vrot.slane %v11258_v26, 5  ;;  %v5936_v21 = vrot.slane %v5351_v7, 5  ;;  %v6076_v11 = vrot.slane %v5351_v7, 6 }
 0x388   : > { %12354 = vst [vmem:[#allocation59_spill] sm:$0xff] %v11256_v51  ;;  %v11268_v29 = vsel %vm10494_vm6, %v6294_v14, %v12357_v50  ;;  %v4987_v60 = vadd.f32 %v4986_v16, %v12360_v46  ;;  %v11273_v17 = vpop.f32.mrf.mxu1  ;;  %v5939_v19 = vrot.slane %v5352_v9, 5  ;;  %v4786_v13 = vadd.f32 %v11114_v39, %v12361_v31  ;;  %v12362_v14 = vld [vmem:[#allocation44_spill] sm:$0xff] }
 0x389   : > { %12358 = vst [vmem:[#allocation63_spill] sm:$0xff] %v11268_v29  ;;  %v4788_v55 = vadd.f32 %v11130_v44, %v12362_v14  ;;  %v6302_v41 = vrot.slane %v6300_v35, 4  ;;  %v5937_v23 = vsel %vm10494_vm6, %v7040_v40, %v5936_v21  ;;  %v5938_v38 = vrot.slane %v5936_v21, 4 }
 0x38a   : > { %v11282_v7 = vcombine.low %v4987_v60, %v4989_v34  ;;  %v11284_v16 = vpop.f32.mrf.mxu1  ;;  %v5941_v50 = vrot.slane %v5939_v19, 4  ;;  %v6034_v46 = vadd.f32 %v5937_v23, %v12364_v52  ;;  %v6077_v51 = vsel %vm10372_vm4, %v7050_v2, %v6076_v11  ;;  %v12368_v2 = vld [vmem:[#allocation10_spill] sm:$0xff] }
 0x38b   : > { %v6079_v31 = vrot.slane %v5352_v9, 6  ;;  %v11291_v44 = vsel %vm10494_vm6, %v7073_v58, %v6300_v35  ;;  %v5940_v39 = vsel %vm10494_vm6, %v5938_v38, %v5939_v19  ;;  %v6078_v40 = vrot.slane %v6076_v11, 4  ;;  %v4998_v58 = vpop.f32.mrf.mxu0 }
 0x38c   : > { %12363 = vst [vmem:[#allocation33_spill] sm:$0xff] %v11282_v7  ;;  %12365 = vst [vmem:[#allocation34_spill] sm:$0xff] %v11291_v44  ;;  %v6144_v21 = vrot.slane %v6077_v51, 4  ;;  %v11295_v14 = vpop.f32.mrf.mxu1  ;;  %v12366_v26 = vrot.slane %v11260_v15, 5  ;;  %v6035_v52 = vadd.f32 %v5940_v39, %v5895_v45  ;;  %v6036_v9 = vadd.f32 %v5941_v50, %v12368_v2  ;;  %v12377_v2 = vld [vmem:[#allocation81_spill] sm:$0xff]  ;;  %v12380_v44 = vld [vmem:[#allocation46_spill] sm:$0xff] }
 0x38d   : > { %v11304_v33 = vcombine.high %v4987_v60, %v4989_v34  ;;  %v6080_v35 = vsel %vm10372_vm4, %v6078_v40, %v6079_v31  ;;  %v7074_v51 = vrot.slane %v11282_v7, 9  ;;  %v5360_v11 = vcombine.low %v4786_v13, %v4788_v55  ;;  %v12371_v60 = vld [vmem:[#allocation12_spill] sm:$0xff]  ;;  %v12378_v7 = vld [vmem:[#allocation83_spill] sm:$0xff] }
 0x38e   : > { %v11301_v23 = vsel %vm10494_vm6, %v6302_v41, %v12366_v26  ;;  %v11308_v19 = vadd.f32 %v6144_v21, %v6034_v46  ;;  %v11311_v38 = vpop.f32.mrf.mxu1  ;;  %v6145_v15 = vrot.slane %v6080_v35, 4  ;;  %v6206_v59 = vadd.f32 %v6079_v31, %v6036_v9  ;;  %v12372_v41 = vld [vmem:[#allocation111_spill] sm:$0xff] }
 0x38f   : > { %12367 = vst [vmem:[#allocation119_spill] sm:$0xff] %v11301_v23  ;;  %v6308_v26 = vrot.slane %v11304_v33, 5  ;;  %v5361_v45 = vcombine.high %v4786_v13, %v4788_v55  ;;  %v11316_v34 = vadd.f32 %v11192_v27, %v11037_v32  ;;  %v12373_v50 = vrot.slane %v12372_v41, 4  ;;  %v5000_v55 = vpop.f32.mrf.mxu0  ;;  %v12392_v32 = vld [vmem:[#allocation116_spill] sm:$0xff] }
 0x390   : > { %12369 = vst [vmem:[#allocation102_spill] sm:$0xff] %v11308_v19  ;;  %v7041_v46 = vrot.slane %v5360_v11, 9  ;;  %v7051_v40 = vrot.slane %v5360_v11, 10  ;;  %v11321_v21 = vpop.f32.mrf.mxu1  ;;  %v11325_v35 = vadd.f32 %v6203_v6, %v11049_v0  ;;  %v6205_v13 = vadd.f32 %v6145_v15, %v6035_v52  ;;  %v12379_v15 = vld [vmem:[#allocation48_spill] sm:$0xff]  ;;  %v12385_v19 = vld [vmem:[#allocation50_spill] sm:$0xff] }
 0x391   : > { %12370 = vst [vmem:[#allocation65_spill] sm:$0xff] %v11316_v34  ;;  %v5897_v39 = vadd.f32 %v12373_v50, %v12371_v60  ;;  %v11331_v9 = vsel %vm10494_vm6, %v7074_v51, %v6308_v26  ;;  %v5944_v60 = vrot.slane %v5361_v45, 5  ;;  %v6084_v41 = vrot.slane %v5361_v45, 6 }
 0x392   : > { %12374 = vst [vmem:[#allocation67_spill] sm:$0xff] %v11325_v35  ;;  %12375 = vst [vmem:[#allocation121_spill] sm:$0xff] %v11331_v9  ;;  %v11333_v11 = vpop.f32.mrf.mxu1  ;;  %v11336_v50 = vadd.f32 %v6206_v59, %v11085_v62  ;;  %v4993_v6 = vadd.f32 %v11254_v53, %v12377_v2  ;;  %v4995_v31 = vadd.f32 %v4994_v43, %v12378_v7  ;;  %v6310_v27 = vrot.slane %v6308_v26, 4  ;;  %v5004_v7 = vpop.f32.mrf.mxu0 }
 0x393   : > { %v4794_v52 = vadd.f32 %v11156_v47, %v12379_v15  ;;  %v5945_v51 = vsel %vm10494_vm6, %v7041_v46, %v5944_v60  ;;  %v6085_v45 = vsel %vm10372_vm4, %v7051_v40, %v6084_v41  ;;  %v4792_v29 = vadd.f32 %v11147_v3, %v12380_v44  ;;  %v12382_v15 = vld [vmem:[#allocation86_spill] sm:$0xff]  ;;  %v12384_v3 = vld [vmem:[#allocation85_spill] sm:$0xff] }
 0x394   : > { %12376 = vst [vmem:[#allocation105_spill] sm:$0xff] %v11336_v50  ;;  %v11349_v59 = vpop.f32.mrf.mxu1  ;;  %v6037_v53 = vadd.f32 %v5945_v51, %v5897_v39  ;;  %v6147_v2 = vrot.slane %v6085_v45, 4  ;;  %v11352_v43 = vcombine.low %v4993_v6, %v4995_v31  ;;  %v11355_v47 = vadd.f32 %v6205_v13, %v11056_v1  ;;  %v12386_v51 = vld [vmem:[#allocation52_spill] sm:$0xff] }
 0x395   : > { %v5369_v26 = vcombine.low %v4792_v29, %v4794_v52  ;;  %v5370_v46 = vcombine.high %v4792_v29, %v4794_v52  ;;  %v5001_v62 = vadd.f32 %v5000_v55, %v12382_v15  ;;  %v4999_v44 = vadd.f32 %v4998_v58, %v12384_v3  ;;  %v5006_v58 = vpop.f32.mrf.mxu0  ;;  %v12390_v3 = vld [vmem:[#allocation8_spill] sm:$0xff] }
 0x396   : > { %12381 = vst [vmem:[#allocation36_spill] sm:$0xff] %v11355_v47  ;;  %v11358_v40 = vpop.f32.mrf.mxu1  ;;  %v11360_v50 = vadd.f32 %v6147_v2, %v6037_v53  ;;  %v4798_v39 = vadd.f32 %v11164_v54, %v12385_v19  ;;  %v4800_v45 = vadd.f32 %v11174_v20, %v12386_v51  ;;  %v5946_v23 = vrot.slane %v5944_v60, 4 }
 0x397   : > { %v6086_v9 = vrot.slane %v6084_v41, 4  ;;  %v5947_v1 = vrot.slane %v5369_v26, 5  ;;  %v6087_v13 = vrot.slane %v5369_v26, 6  ;;  %v11369_v29 = vcombine.high %v4993_v6, %v4995_v31  ;;  %v12389_v41 = vld [vmem:[#allocation113_spill] sm:$0xff] }
 0x398   : > { %12383 = vst [vmem:[#allocation117_spill] sm:$0xff] %v11360_v50  ;;  %v11367_v47 = vpop.f32.mrf.mxu1  ;;  %v11372_v52 = vcombine.low %v4999_v44, %v5001_v62  ;;  %v5378_v53 = vcombine.low %v4798_v39, %v4800_v45  ;;  %v7042_v2 = vrot.slane %v5370_v46, 9  ;;  %v11379_v31 = vcombine.high %v4999_v44, %v5001_v62  ;;  %v12391_v50 = vld [vmem:[#allocation19_spill] sm:$0xff] }
 0x399   : > { %12387 = vst [vmem:[#allocation118_spill] sm:$0xff] %v11369_v29  ;;  %v5948_v54 = vsel %vm10494_vm6, %v5946_v23, %v5947_v1  ;;  %v5949_v19 = vrot.slane %v5947_v1, 4  ;;  %v6088_v20 = vsel %vm10372_vm4, %v6086_v9, %v6087_v13  ;;  %v5379_v55 = vcombine.high %v4798_v39, %v4800_v45  ;;  %v12453_v37 = vld [vmem:[#allocation67_spill] sm:$0xff] }
 0x39a   : > { %12388 = vst [vmem:[#allocation35_spill] sm:$0xff] %v11372_v52  ;;  %v4851_v60 = vpop.f32.mrf.mxu1  ;;  %v6038_v26 = vadd.f32 %v5948_v54, %v12389_v41  ;;  %v6148_v15 = vrot.slane %v6088_v20, 4  ;;  %v6316_v6 = vrot.slane %v11372_v52, 5  ;;  %v12393_v34 = vrot.slane %v12392_v32, 4  ;;  %v5010_v20 = vpop.f32.mrf.mxu0 }
 0x39b   : > { %v6039_v51 = vadd.f32 %v5949_v19, %v12390_v3  ;;  %v5952_v1 = vrot.slane %v5378_v53, 5  ;;  %v7075_v35 = vrot.slane %v11369_v29, 9  ;;  %v7052_v9 = vrot.slane %v5370_v46, 10  ;;  %v12395_v46 = vld [vmem:[#allocation15_spill] sm:$0xff] }
 0x39c   : > { %v5901_v23 = vadd.f32 %v12393_v34, %v12391_v50  ;;  %v4852_v0 = vpop.f32.mrf.mxu1  ;;  %v11387_v60 = vadd.f32 %v6148_v15, %v6038_v26  ;;  %v6092_v54 = vrot.slane %v5378_v53, 6  ;;  %v12394_v62 = vrot.slane %v11352_v43, 5 }
 0x39d   : > { %v6209_v39 = vadd.f32 %v6087_v13, %v6039_v51  ;;  %v5953_v32 = vsel %vm10494_vm6, %v7042_v2, %v5952_v1  ;;  %v5954_v34 = vrot.slane %v5952_v1, 4  ;;  %v5955_v45 = vrot.slane %v5379_v55, 5  ;;  %v12397_v1 = vld [vmem:[#allocation87_spill] sm:$0xff]  ;;  %v12399_v0 = vld [vmem:[#allocation88_spill] sm:$0xff] }
 0x39e   : > { %v11393_v44 = vsel %vm10494_vm6, %v6310_v27, %v12394_v62  ;;  %v7296_v50 = vpop.f32.mrf.mxu1  ;;  %v6040_v19 = vadd.f32 %v5953_v32, %v12395_v46  ;;  %v6093_v53 = vsel %vm10372_vm4, %v7052_v9, %v6092_v54  ;;  %v11403_v41 = vsel %vm10494_vm6, %v7075_v35, %v6316_v6  ;;  %v12398_v46 = vld [vmem:[#allocation54_spill] sm:$0xff] }
 0x39f   : > { %12396 = vst [vmem:[#allocation69_spill] sm:$0xff] %v11403_v41  ;;  %v6318_v27 = vrot.slane %v6316_v6, 4  ;;  %v6094_v26 = vrot.slane %v6092_v54, 4  ;;  %v6095_v13 = vrot.slane %v5379_v55, 6  ;;  %v5956_v2 = vsel %vm10494_vm6, %v5954_v34, %v5955_v45  ;;  %v5012_v50 = vpop.f32.mrf.mxu0  ;;  %v12400_v55 = vld [vmem:[#allocation114_spill] sm:$0xff] }
 0x3a0   : > { %v5087_v15 = vpop.f32.mrf.mxu1  ;;  %v5957_v3 = vrot.slane %v5955_v45, 4  ;;  %v6150_v51 = vrot.slane %v6093_v53, 4  ;;  %v5005_v62 = vadd.f32 %v5004_v7, %v12397_v1  ;;  %v6041_v32 = vadd.f32 %v5956_v2, %v5901_v23  ;;  %v12401_v45 = vld [vmem:[#allocation56_spill] sm:$0xff] }
 0x3a1   : > { %v6096_v9 = vsel %vm10372_vm4, %v6094_v26, %v6095_v13  ;;  %v4804_v35 = vadd.f32 %v11194_v22, %v12398_v46  ;;  %v5007_v6 = vadd.f32 %v5006_v58, %v12399_v0  ;;  %v4806_v7 = vadd.f32 %v11209_v8, %v12401_v45  ;;  %v12405_v58 = vld [vmem:[#allocation120_spill] sm:$0xff] }
 0x3a2   : > { %v11413_v54 = vpop.f32.mrf.mxu1  ;;  %v6042_v15 = vadd.f32 %v5957_v3, %v12400_v55  ;;  %v6151_v52 = vrot.slane %v6096_v9, 4  ;;  %v11416_v34 = vadd.f32 %v6150_v51, %v6040_v19  ;;  %v12402_v23 = vrot.slane %v11379_v31, 5  ;;  %v5016_v9 = vpop.f32.mrf.mxu0  ;;  %v12407_v55 = vld [vmem:[#allocation89_spill] sm:$0xff] }
 0x3a3   : > { %v11426_v26 = vcombine.low %v5005_v62, %v5007_v6  ;;  %v11428_v22 = vcombine.high %v5005_v62, %v5007_v6  ;;  %v12406_v0 = vrot.slane %v12405_v58, 4  ;;  %v5387_v1 = vcombine.low %v4804_v35, %v4806_v7  ;;  %v12411_v6 = vld [vmem:[#allocation92_spill] sm:$0xff] }
 0x3a4   : > { %v11424_v53 = vsel %vm10494_vm6, %v6318_v27, %v12402_v23  ;;  %v5095_v3 = vpop.f32.mrf.mxu1  ;;  %v11433_v19 = vadd.f32 %v6151_v52, %v6041_v32  ;;  %v6212_v51 = vadd.f32 %v6095_v13, %v6042_v15  ;;  %v5388_v8 = vcombine.high %v4804_v35, %v4806_v7  ;;  %v12408_v23 = vld [vmem:[#allocation90_spill] sm:$0xff]  ;;  %v12410_v52 = vld [vmem:[#allocation60_spill] sm:$0xff] }
 0x3a5   : > { %12403 = vst [vmem:[#allocation37_spill] sm:$0xff] %v11424_v53  ;;  %12404 = vst [vmem:[#allocation71_spill] sm:$0xff] %v11428_v22  ;;  %v5903_v2 = vadd.f32 %v12406_v0, %v10885_v25  ;;  %v7076_v46 = vrot.slane %v11426_v26, 9  ;;  %v6324_v27 = vrot.slane %v11428_v22, 5  ;;  %v5011_v45 = vadd.f32 %v5010_v20, %v12407_v55  ;;  %v12409_v7 = vld [vmem:[#allocation58_spill] sm:$0xff]  ;;  %v5018_v3 = vpop.f32.mrf.mxu0 }
 0x3a6   : > { %v5013_v62 = vadd.f32 %v5012_v50, %v12408_v23  ;;  %v7043_v29 = vrot.slane %v5387_v1, 9  ;;  %v5960_v58 = vrot.slane %v5388_v8, 5  ;;  %v7053_v25 = vrot.slane %v5387_v1, 10 }
 0x3a7   : > { %v11443_v13 = vsel %vm10494_vm6, %v7076_v46, %v6324_v27  ;;  %v6100_v32 = vrot.slane %v5388_v8, 6  ;;  %v11448_v15 = vadd.f32 %v6209_v39, %v11154_v61  ;;  %v4810_v0 = vadd.f32 %v11217_v48, %v12409_v7  ;;  %v12412_v48 = vld [vmem:[#allocation62_spill] sm:$0xff] }
 0x3a8   : > { %v11445_v35 = vcombine.low %v5011_v45, %v5013_v62  ;;  %v5961_v50 = vsel %vm10494_vm6, %v7043_v29, %v5960_v58  ;;  %v11456_v1 = vadd.f32 %v6212_v51, %v11211_v49  ;;  %v6326_v46 = vrot.slane %v6324_v27, 4  ;;  %v12413_v51 = vld [vmem:[#allocation93_spill] sm:$0xff]  ;;  %v12414_v27 = vld [vmem:[#allocation64_spill] sm:$0xff] }
 0x3a9   : > { %v6043_v55 = vadd.f32 %v5961_v50, %v5903_v2  ;;  %v6101_v8 = vsel %vm10372_vm4, %v7053_v25, %v6100_v32  ;;  %v4812_v29 = vadd.f32 %v11227_v30, %v12410_v52  ;;  %v5017_v22 = vadd.f32 %v5016_v9, %v12411_v6 }
 0x3aa   : > { %v6153_v23 = vrot.slane %v6101_v8, 4  ;;  %v4816_v7 = vadd.f32 %v11234_v57, %v12412_v48  ;;  %v5019_v53 = vadd.f32 %v5018_v3, %v12413_v51  ;;  %v4818_v2 = vadd.f32 %v11246_v12, %v12414_v27 }
 0x3ab   : > { %v5962_v50 = vrot.slane %v5960_v58, 4  ;;  %v5396_v39 = vcombine.low %v4810_v0, %v4812_v29  ;;  %v5397_v8 = vcombine.high %v4810_v0, %v4812_v29  ;;  %v11472_v41 = vcombine.high %v5011_v45, %v5013_v62  ;;  %v12417_v0 = vld [vmem:[#allocation124_spill] sm:$0xff] }
 0x3ac   : > { %v11470_v25 = vadd.f32 %v6153_v23, %v6043_v55  ;;  %v11474_v20 = vcombine.low %v5017_v22, %v5019_v53  ;;  %v5405_v30 = vcombine.low %v4816_v7, %v4818_v2  ;;  %v5406_v52 = vcombine.high %v4816_v7, %v4818_v2 }
 0x3ad   : > { %v6102_v9 = vrot.slane %v6100_v32, 4  ;;  %v12415_v6 = vrot.slane %v11445_v35, 5  ;;  %v5963_v3 = vrot.slane %v5396_v39, 5  ;;  %v6103_v12 = vrot.slane %v5396_v39, 6 }
 0x3ae   : > { %v7044_v58 = vrot.slane %v5397_v8, 9  ;;  %v11482_v55 = vcombine.high %v5017_v22, %v5019_v53  ;;  %v12418_v45 = vrot.slane %v12417_v0, 4  ;;  %v5968_v23 = vrot.slane %v5405_v30, 5 }
 0x3af   : > { %v11480_v57 = vsel %vm10494_vm6, %v6326_v46, %v12415_v6  ;;  %v5964_v29 = vsel %vm10494_vm6, %v5962_v50, %v5963_v3  ;;  %v5965_v32 = vrot.slane %v5963_v3, 4  ;;  %v6104_v48 = vsel %vm10372_vm4, %v6102_v9, %v6103_v12 }
 0x3b0   : > { %12416 = vst [vmem:[#allocation38_spill] sm:$0xff] %v11480_v57  ;;  %v5907_v62 = vadd.f32 %v12418_v45, %v10931_v42  ;;  %v5971_v7 = vrot.slane %v5406_v52, 5  ;;  %v7077_v46 = vrot.slane %v11472_v41, 9  ;;  %v6044_v39 = vadd.f32 %v5964_v29, %v10913_v28 }
 0x3b1   : > { %v6154_v51 = vrot.slane %v6104_v48, 4  ;;  %v6332_v53 = vrot.slane %v11474_v20, 5  ;;  %v6045_v42 = vadd.f32 %v5965_v32, %v10878_v5  ;;  %v5969_v27 = vsel %vm10494_vm6, %v7044_v58, %v5968_v23 }
 0x3b2   : > { %v5970_v2 = vrot.slane %v5968_v23, 4  ;;  %v7054_v50 = vrot.slane %v5397_v8, 10  ;;  %v5973_v9 = vrot.slane %v5971_v7, 4  ;;  %v6046_v3 = vadd.f32 %v5969_v27, %v10907_v4 }
 0x3b3   : > { %v11498_v6 = vadd.f32 %v6154_v51, %v6044_v39  ;;  %v11501_v0 = vadd.f32 %v6103_v12, %v6045_v42  ;;  %v11953_v28 = vrot.slane %v11482_v55, 5  ;;  %v6108_v29 = vrot.slane %v5405_v30, 6  ;;  %v12419_v39 = vld [vmem:[#allocation66_spill] sm:$0xff]  ;;  %v12420_v12 = vld [vmem:[#allocation68_spill] sm:$0xff] }
 0x3b4   : > { %v5972_v45 = vsel %vm10494_vm6, %v5970_v2, %v5971_v7  ;;  %v6334_v48 = vrot.slane %v6332_v53, 4  ;;  %v6048_v32 = vadd.f32 %v5973_v9, %v10926_v56  ;;  %v6111_v58 = vrot.slane %v5406_v52, 6  ;;  %v12425_v9 = vld [vmem:[#allocation70_spill] sm:$0xff] }
 0x3b5   : > { %v6047_v5 = vadd.f32 %v5972_v45, %v5907_v62  ;;  %v6109_v8 = vsel %vm10372_vm4, %v7054_v50, %v6108_v29  ;;  %v6110_v23 = vrot.slane %v6108_v29, 4  ;;  %v4822_v4 = vadd.f32 %v11262_v63, %v12419_v39  ;;  %v12423_v63 = vld [vmem:[#allocation72_spill] sm:$0xff] }
 0x3b6   : > { %v4824_v51 = vadd.f32 %v11273_v17, %v12420_v12  ;;  %v11515_v42 = vsel %vm10494_vm6, %v7077_v46, %v6332_v53  ;;  %v6156_v30 = vrot.slane %v6109_v8, 4  ;;  %v11517_v7 = vadd.f32 %v6111_v58, %v6048_v32  ;;  %v12427_v12 = vld [vmem:[#allocation74_spill] sm:$0xff] }
 0x3b7   : > { %12421 = vst [vmem:[#allocation73_spill] sm:$0xff] %v11515_v42  ;;  %v12422_v56 = vrot.slane %v10701_v18, 4  ;;  %v6112_v62 = vsel %vm10372_vm4, %v6110_v23, %v6111_v58  ;;  %v4830_v50 = vadd.f32 %v11295_v14, %v12423_v63  ;;  %v11530_v17 = vsel %vm10494_vm6, %v6334_v48, %v11953_v28  ;;  %v12426_v23 = vld [vmem:[#allocation76_spill] sm:$0xff] }
 0x3b8   : > { %v5414_v27 = vcombine.low %v4822_v4, %v4824_v51  ;;  %v5415_v2 = vcombine.high %v4822_v4, %v4824_v51  ;;  %12424 = vst [vmem:[#allocation39_spill] sm:$0xff] %v11530_v17  ;;  %v6157_v46 = vrot.slane %v6112_v62, 4  ;;  %v11532_v53 = vadd.f32 %v6156_v30, %v6046_v3 }
 0x3b9   : > { %v5909_v52 = vadd.f32 %v12422_v56, %v10964_v10  ;;  %v4828_v18 = vadd.f32 %v11284_v16, %v12425_v9  ;;  %v4836_v39 = vadd.f32 %v11321_v21, %v12426_v23  ;;  %v4834_v16 = vadd.f32 %v11311_v38, %v12427_v12 }
 0x3ba   : > { %v7045_v10 = vrot.slane %v5414_v27, 9  ;;  %v5976_v45 = vrot.slane %v5415_v2, 5  ;;  %v7055_v29 = vrot.slane %v5414_v27, 10  ;;  %v6116_v32 = vrot.slane %v5415_v2, 6 }
 0x3bb   : > { %v11536_v58 = vadd.f32 %v6157_v46, %v6047_v5  ;;  %v5423_v8 = vcombine.low %v4828_v18, %v4830_v50  ;;  %v5424_v14 = vcombine.high %v4828_v18, %v4830_v50  ;;  %v5432_v63 = vcombine.low %v4834_v16, %v4836_v39 }
 0x3bc   : > { %v5977_v48 = vsel %vm10494_vm6, %v7045_v10, %v5976_v45  ;;  %v5978_v4 = vrot.slane %v5976_v45, 4  ;;  %v6117_v3 = vsel %vm10372_vm4, %v7055_v29, %v6116_v32  ;;  %v6118_v30 = vrot.slane %v6116_v32, 4  ;;  %v12429_v10 = vld [vmem:[#allocation112_spill] sm:$0xff] }
 0x3bd   : > { %v6049_v51 = vadd.f32 %v5977_v48, %v5909_v52  ;;  %v6159_v56 = vrot.slane %v6117_v3, 4  ;;  %v5979_v5 = vrot.slane %v5423_v8, 5  ;;  %v7046_v62 = vrot.slane %v5424_v14, 9  ;;  %v12428_v52 = vld [vmem:[#allocation21_spill] sm:$0xff] }
 0x3be   : > { %v6119_v27 = vrot.slane %v5423_v8, 6  ;;  %v7056_v2 = vrot.slane %v5424_v14, 10  ;;  %v5433_v9 = vcombine.high %v4834_v16, %v4836_v39  ;;  %v12430_v45 = vrot.slane %v12429_v10, 4  ;;  %v12431_v8 = vld [vmem:[#allocation4_spill] sm:$0xff]  ;;  %v12432_v16 = vld [vmem:[#allocation78_spill] sm:$0xff] }
 0x3bf   : > { %v11546_v50 = vadd.f32 %v6159_v56, %v6049_v51  ;;  %v5980_v21 = vsel %vm10494_vm6, %v5978_v4, %v5979_v5  ;;  %v5981_v46 = vrot.slane %v5979_v5, 4  ;;  %v5984_v32 = vrot.slane %v5432_v63, 5  ;;  %v12433_v5 = vld [vmem:[#allocation5_spill] sm:$0xff] }
 0x3c0   : > { %v6050_v18 = vadd.f32 %v5980_v21, %v10985_v36  ;;  %v6120_v38 = vsel %vm10372_vm4, %v6118_v30, %v6119_v27  ;;  %v5913_v29 = vadd.f32 %v12430_v45, %v12428_v52  ;;  %v5987_v48 = vrot.slane %v5433_v9, 5  ;;  %v7302_v45 = vpop.f32.mrf.mxu1 }
 0x3c1   : > { %v6051_v14 = vadd.f32 %v5981_v46, %v12431_v8  ;;  %v6160_v23 = vrot.slane %v6120_v38, 4  ;;  %v6124_v3 = vrot.slane %v5432_v63, 6  ;;  %v5985_v4 = vsel %vm10494_vm6, %v7046_v62, %v5984_v32  ;;  %v12434_v62 = vld [vmem:[#allocation80_spill] sm:$0xff] }
 0x3c2   : > { %v5986_v12 = vrot.slane %v5984_v32, 4  ;;  %v6127_v39 = vrot.slane %v5433_v9, 6  ;;  %v4840_v36 = vadd.f32 %v11333_v11, %v12432_v16  ;;  %v5989_v56 = vrot.slane %v5987_v48, 4 }
 0x3c3   : > { %v11561_v51 = vadd.f32 %v6160_v23, %v6050_v18  ;;  %v11563_v30 = vadd.f32 %v6119_v27, %v6051_v14  ;;  %v6052_v21 = vadd.f32 %v5985_v4, %v12433_v5  ;;  %v6125_v63 = vsel %vm10372_vm4, %v7056_v2, %v6124_v3  ;;  %v12435_v18 = vld [vmem:[#allocation6_spill] sm:$0xff]  ;;  %v12436_v23 = vld [vmem:[#allocation28_spill] sm:$0xff] }
 0x3c4   : > { %v5988_v46 = vsel %vm10494_vm6, %v5986_v12, %v5987_v48  ;;  %v6126_v38 = vrot.slane %v6124_v3, 4  ;;  %v4842_v9 = vadd.f32 %v11349_v59, %v12434_v62  ;;  %v6054_v10 = vadd.f32 %v5989_v56, %v12435_v18  ;;  %v12437_v48 = vld [vmem:[#allocation11_spill] sm:$0xff] }
 0x3c5   : > { %v6053_v11 = vadd.f32 %v5988_v46, %v5913_v29  ;;  %v6162_v27 = vrot.slane %v6125_v63, 4  ;;  %v5915_v4 = vadd.f32 %v12437_v48, %v12436_v23  ;;  %v12438_v63 = vld [vmem:[#allocation82_spill] sm:$0xff]  ;;  %v12442_v48 = vld [vmem:[#allocation51_spill] sm:$0xff] }
 0x3c6   : > { %v6128_v32 = vsel %vm10372_vm4, %v6126_v38, %v6127_v39  ;;  %v5439_v8 = vcombine.low %v4840_v36, %v4842_v9  ;;  %v5440_v14 = vcombine.high %v4840_v36, %v4842_v9  ;;  %v11581_v59 = vadd.f32 %v6127_v39, %v6054_v10  ;;  %v12439_v36 = vld [vmem:[#allocation84_spill] sm:$0xff]  ;;  %v12440_v9 = vld [vmem:[#allocation91_spill] sm:$0xff] }
 0x3c7   : > { %v6163_v3 = vrot.slane %v6128_v32, 4  ;;  %v11579_v12 = vadd.f32 %v6162_v27, %v6052_v21  ;;  %v4846_v38 = vadd.f32 %v11358_v40, %v12438_v63  ;;  %v4848_v62 = vadd.f32 %v11367_v47, %v12439_v36  ;;  %v5104_v32 = vpop.f32.mrf.mxu1  ;;  %v12441_v40 = vld [vmem:[#allocation18_spill] sm:$0xff] }
 0x3c8   : > { %v7047_v29 = vrot.slane %v5439_v8, 9  ;;  %v5992_v16 = vrot.slane %v5440_v14, 5  ;;  %v7057_v56 = vrot.slane %v5439_v8, 10  ;;  %v6132_v5 = vrot.slane %v5440_v14, 6  ;;  %v12443_v63 = vld [vmem:[#allocation94_spill] sm:$0xff] }
 0x3c9   : > { %v11583_v46 = vadd.f32 %v6163_v3, %v6053_v11  ;;  %v5100_v18 = vadd.f32 %v11413_v54, %v12440_v9  ;;  %v5445_v14 = vcombine.low %v4846_v38, %v4848_v62  ;;  %v6228_v3 = vadd.f32 %v12442_v48, %v12441_v40  ;;  %v12444_v54 = vld [vmem:[#allocation29_spill] sm:$0xff]  ;;  %v12445_v9 = vld [vmem:[#allocation59_spill] sm:$0xff] }
 0x3ca   : > { %v5993_v39 = vsel %vm10494_vm6, %v7047_v29, %v5992_v16  ;;  %v5994_v21 = vrot.slane %v5992_v16, 4  ;;  %v6133_v10 = vsel %vm10372_vm4, %v7057_v56, %v6132_v5  ;;  %v6134_v27 = vrot.slane %v6132_v5, 4  ;;  %v7305_v56 = vpop.f32.mrf.mxu1  ;;  %v12446_v5 = vld [vmem:[#allocation61_spill] sm:$0xff] }
 0x3cb   : > { %v6055_v11 = vadd.f32 %v5993_v39, %v5915_v4  ;;  %v6165_v8 = vrot.slane %v6133_v10, 4  ;;  %v5337_v23 = vcombine.high %v5100_v18, %v5100_v18  ;;  %v7088_v47 = vrot.slane %v5100_v18, 10  ;;  %v12450_v40 = vld [vmem:[#allocation9_spill] sm:$0xff] }
 0x3cc   : > { %v5110_v36 = vadd.f32 %v7302_v45, %v12443_v63  ;;  %v6232_v52 = vadd.f32 %v12445_v9, %v12444_v54  ;;  %v5995_v29 = vrot.slane %v5445_v14, 5  ;;  %v6135_v16 = vrot.slane %v5445_v14, 6  ;;  %v12452_v63 = vld [vmem:[#allocation27_spill] sm:$0xff]  ;;  %v5114_v42 = vpop.f32.mrf.mxu1 }
 0x3cd   : > { %v11600_v22 = vadd.f32 %v6165_v8, %v6055_v11  ;;  %v6430_v2 = vrot.slane %v5337_v23, 6  ;;  %v11604_v4 = vadd.f32 %v11501_v0, %v12446_v5  ;;  %v11608_v38 = vadd.f32 %v11536_v58, %v11304_v33  ;;  %v12447_v11 = vld [vmem:[#allocation7_spill] sm:$0xff]  ;;  %v12448_v33 = vld [vmem:[#allocation24_spill] sm:$0xff] }
 0x3ce   : > { %v11612_v45 = vadd.f32 %v11517_v7, %v11352_v43  ;;  %v5355_v62 = vcombine.high %v5110_v36, %v5110_v36  ;;  %v5996_v18 = vsel %vm10494_vm6, %v5994_v21, %v5995_v29  ;;  %v5997_v39 = vrot.slane %v5995_v29, 4  ;;  %v12454_v21 = vld [vmem:[#allocation30_spill] sm:$0xff] }
 0x3cf   : > { %v6136_v10 = vsel %vm10372_vm4, %v6134_v27, %v6135_v16  ;;  %v6431_v0 = vsel %vm10372_vm4, %v7088_v47, %v6430_v2  ;;  %v6056_v8 = vadd.f32 %v5996_v18, %v12447_v11  ;;  %v12449_v58 = vrot.slane %v12448_v33, 4 }
 0x3d0   : > { %v6166_v14 = vrot.slane %v6136_v10, 4  ;;  %v12451_v7 = vrot.slane %v12450_v40, 4  ;;  %v6057_v54 = vadd.f32 %v5997_v39, %v12452_v63  ;;  %v12455_v9 = vrot.slane %v12454_v21, 5  ;;  %v12456_v10 = vld [vmem:[#allocation95_spill] sm:$0xff] }
 0x3d1   : > { %v6398_v23 = vadd.f32 %v12449_v58, %v6228_v3  ;;  %v6438_v28 = vrot.slane %v5110_v36, 6  ;;  %v6441_v27 = vrot.slane %v5355_v62, 6  ;;  %v6432_v47 = vrot.slane %v6430_v2, 4  ;;  %v12457_v58 = vld [vmem:[#allocation20_spill] sm:$0xff]  ;;  %v12458_v36 = vld [vmem:[#allocation55_spill] sm:$0xff] }
 0x3d2   : > { %v6402_v48 = vadd.f32 %v12451_v7, %v6232_v52  ;;  %v6403_v29 = vadd.f32 %v12455_v9, %v12453_v37  ;;  %v11629_v57 = vadd.f32 %v6166_v14, %v6056_v8  ;;  %v5105_v11 = vadd.f32 %v5104_v32, %v12456_v10  ;;  %v11637_v52 = vld [vmem:[%s11881_s5] ss:$0 sm:$0xff]  ;;  %v12460_v14 = vld [vmem:[#allocation31_spill] sm:$0xff]  ;;  %v12461_v7 = vld [vmem:[#allocation13_spill] sm:$0xff]  ;;  %v7308_v37 = vpop.f32.mrf.mxu1 }
 0x3d3   : > { %v6538_v18 = vadd.f32 %v6431_v0, %v6398_v23  ;;  %v11632_v3 = vadd.f32 %v6135_v16, %v6057_v54  ;;  %v6440_v39 = vrot.slane %v6438_v28, 4  ;;  %v6443_v33 = vrot.slane %v6441_v27, 4  ;;  %v12459_v0 = vld [vmem:[#allocation115_spill] sm:$0xff]  ;;  %v12463_v9 = vld [vmem:[#allocation65_spill] sm:$0xff]  ;;  %v12464_v10 = vld [vmem:[#allocation22_spill] sm:$0xff] }
 0x3d4   : > { %v6229_v62 = vadd.f32 %v12458_v36, %v12457_v58  ;;  %v11643_v8 = vcombine.high %v11637_v52, %v11637_v52  ;;  %v5346_v2 = vcombine.high %v5105_v11, %v5105_v11  ;;  %v6231_v32 = vadd.f32 %v12460_v14, %v12459_v0  ;;  %v12466_v0 = vld [vmem:[#allocation14_spill] sm:$0xff] }
 0x3d5   : > { %v6433_v16 = vrot.slane %v5105_v11, 6  ;;  %v6442_v23 = vsel %vm10372_vm4, %v6440_v39, %v6441_v27  ;;  %v6543_v40 = vadd.f32 %v6443_v33, %v6403_v29  ;;  %v12462_v63 = vrot.slane %v12461_v7, 4 }
 0x3d6   : > { %v6542_v21 = vadd.f32 %v6442_v23, %v6402_v48  ;;  %v12465_v11 = vrot.slane %v12464_v10, 5  ;;  %v6577_v39 = vadd.f32 %v11637_v52, %v6538_v18  ;;  %v7089_v36 = vrot.slane %v5346_v2, 10  ;;  %v12468_v48 = vld [vmem:[#allocation96_spill] sm:$0xff]  ;;  %v12469_v18 = vld [vmem:[#allocation97_spill] sm:$0xff]  ;;  %v12471_v2 = vld [vmem:[#allocation102_spill] sm:$0xff]  ;;  %v5124_v10 = vpop.f32.mrf.mxu1 }
 0x3d7   : > { %v6399_v54 = vadd.f32 %v12462_v63, %v6229_v62  ;;  %v6434_v29 = vsel %vm10372_vm4, %v6432_v47, %v6433_v16  ;;  %v6435_v27 = vrot.slane %v6433_v16, 4  ;;  %v6582_v33 = vadd.f32 %v11637_v52, %v6543_v40  ;;  %v12470_v40 = vld [vmem:[#allocation25_spill] sm:$0xff] }
 0x3d8   : > { %v6400_v58 = vadd.f32 %v12465_v11, %v12463_v9  ;;  %v12467_v14 = vrot.slane %v12466_v0, 4  ;;  %v5120_v23 = vadd.f32 %v7305_v56, %v12468_v48  ;;  %v6439_v47 = vsel %vm10372_vm4, %v7089_v36, %v6438_v28  ;;  %v12473_v0 = vld [vmem:[#allocation23_spill] sm:$0xff]  ;;  %v12475_v48 = vld [vmem:[#allocation26_spill] sm:$0xff] }
 0x3d9   : > { %v6539_v62 = vadd.f32 %v6434_v29, %v6399_v54  ;;  %6652 = vst.msk [vmem:[%s11656_s16 + $0x18] sm:$0x3] %vm6649_vm7, %v6582_v33  ;;  %v5115_v9 = vadd.f32 %v5114_v42, %v12469_v18  ;;  %v6234_v54 = vadd.f32 %v12471_v2, %v12470_v40  ;;  %v12472_v33 = vld [vmem:[#allocation105_spill] sm:$0xff]  ;;  %v12474_v28 = vrot.slane %v12473_v0, 5 }
 0x3da   : > { %v6401_v7 = vadd.f32 %v12467_v14, %v6231_v32  ;;  %v6540_v63 = vadd.f32 %v6435_v27, %v6400_v58  ;;  %v6581_v32 = vadd.f32 %v11643_v8, %v6542_v21  ;;  %v6449_v58 = vrot.slane %v5120_v23, 6 }
 0x3db   : > { %v6578_v16 = vadd.f32 %v11643_v8, %v6539_v62  ;;  %v5373_v27 = vcombine.high %v5120_v23, %v5120_v23  ;;  %v6406_v36 = vadd.f32 %v12474_v28, %v12472_v33  ;;  %v5364_v62 = vcombine.high %v5115_v9, %v5115_v9  ;;  %v12478_v23 = vld [vmem:[#allocation43_spill] sm:$0xff]  ;;  %v7311_v33 = vpop.f32.mrf.mxu1  ;;  %v12481_v28 = vld [vmem:[#allocation117_spill] sm:$0xff] }
 0x3dc   : > { %v6541_v11 = vadd.f32 %v6439_v47, %v6401_v7  ;;  %v6579_v56 = vadd.f32 %v11637_v52, %v6540_v63  ;;  %v6451_v14 = vrot.slane %v6449_v58, 4  ;;  %v12476_v18 = vrot.slane %v12475_v48, 4  ;;  %v12482_v48 = vld [vmem:[#allocation41_spill] sm:$0xff] }
 0x3dd   : > { %v6627_v29 = vcombine.low %v6577_v39, %v6578_v16  ;;  %v7090_v21 = vrot.slane %v5115_v9, 10  ;;  %v6446_v7 = vrot.slane %v5364_v62, 6  ;;  %v12477_v39 = vld [vmem:[#allocation98_spill] sm:$0xff]  ;;  %v6240_v47 = vadd.f32 %v11416_v34, %v12478_v23  ;;  %v12479_v16 = vld [vmem:[#allocation99_spill] sm:$0xff] }
 0x3de   : > { %v6580_v42 = vadd.f32 %v11637_v52, %v6541_v11  ;;  %6650 = vst.msk [vmem:[%s11656_s16 + $0x8] sm:$0x3] %vm6649_vm7, %v6579_v56  ;;  %v6404_v40 = vadd.f32 %v12476_v18, %v6234_v54  ;;  %v5130_v63 = vadd.f32 %v7308_v37, %v12477_v39  ;;  %v5125_v2 = vadd.f32 %v5124_v10, %v12479_v16  ;;  %v12480_v56 = vld [vmem:[#allocation16_spill] sm:$0xff] }
 0x3df   : > { %6648 = vst.msk [vmem:[%s11656_s16] sm:$0xff] %vm6647_vm8, %v6627_v29  ;;  %v6546_v0 = vadd.f32 %v6451_v14, %v6406_v36  ;;  %v6237_v17 = vadd.f32 %v12481_v28, %v12480_v56  ;;  %v6238_v9 = vadd.f32 %v11387_v60, %v12482_v48  ;;  %v12483_v54 = vld [vmem:[#allocation36_spill] sm:$0xff]  ;;  %v12484_v29 = vld [vmem:[#allocation17_spill] sm:$0xff]  ;;  %v6447_v37 = vsel %vm10372_vm4, %v7090_v21, %v6446_v7  ;;  %v5134_v48 = vpop.f32.mrf.mxu1 }
 0x3e0   : > { %v6628_v11 = vcombine.low %v6580_v42, %v6581_v32  ;;  %v12485_v62 = vrot.slane %v12484_v29, 4  ;;  %v6448_v34 = vrot.slane %v6446_v7, 4  ;;  %v5391_v39 = vcombine.high %v5130_v63, %v5130_v63  ;;  %v12486_v60 = vld [vmem:[#allocation53_spill] sm:$0xff]  ;;  %v12488_v7 = vld [vmem:[#allocation47_spill] sm:$0xff] }
 0x3e1   : > { %v7091_v10 = vrot.slane %v5373_v27, 10  ;;  %v6585_v32 = vadd.f32 %v11637_v52, %v6546_v0  ;;  %v6544_v36 = vadd.f32 %v6447_v37, %v6404_v40  ;;  %v5382_v42 = vcombine.high %v5125_v2, %v5125_v2  ;;  %v12490_v27 = vld [vmem:[#allocation49_spill] sm:$0xff] }
 0x3e2   : > { %v6405_v18 = vadd.f32 %v12485_v62, %v12483_v54  ;;  %6651 = vst.msk [vmem:[%s11656_s16 + $0x10] sm:$0xff] %vm6647_vm8, %v6628_v11  ;;  %v6450_v14 = vsel %vm10372_vm4, %v6448_v34, %v6449_v58  ;;  %v12487_v23 = vrot.slane %v12486_v60, 4  ;;  %v7092_v56 = vrot.slane %v5130_v63, 10  ;;  %v7314_v60 = vpop.f32.mrf.mxu1 }
 0x3e3   : > { %v6462_v28 = vrot.slane %v5391_v39, 6  ;;  %6654 = vst.msk [vmem:[%s11656_s16 + $0x28] sm:$0x3] %vm6649_vm7, %v6585_v32  ;;  %v12489_v54 = vrot.slane %v12488_v7, 4  ;;  %v12491_v29 = vrot.slane %v12490_v27, 4  ;;  %v6454_v40 = vrot.slane %v5125_v2, 6 }
 0x3e4   : > { %v6410_v16 = vadd.f32 %v12487_v23, %v6240_v47  ;;  %v6545_v21 = vadd.f32 %v6450_v14, %v6405_v18  ;;  %v6583_v62 = vadd.f32 %v11637_v52, %v6544_v36  ;;  %v6457_v37 = vrot.slane %v5382_v42, 6  ;;  %v12492_v47 = vld [vmem:[#allocation100_spill] sm:$0xff] }
 0x3e5   : > { %v6407_v11 = vadd.f32 %v12489_v54, %v6237_v17  ;;  %v6408_v0 = vadd.f32 %v12491_v29, %v6238_v9  ;;  %v6463_v58 = vsel %vm10372_vm4, %v7092_v56, %v6462_v28  ;;  %v5140_v63 = vadd.f32 %v7311_v33, %v12492_v47  ;;  %v12494_v56 = vld [vmem:[#allocation32_spill] sm:$0xff]  ;;  %v12497_v29 = vld [vmem:[#allocation45_spill] sm:$0xff] }
 0x3e6   : > { %v6584_v34 = vadd.f32 %v11643_v8, %v6545_v21  ;;  %v6550_v39 = vadd.f32 %v6463_v58, %v6410_v16  ;;  %v6455_v18 = vsel %vm10372_vm4, %v7091_v10, %v6454_v40  ;;  %v6456_v17 = vrot.slane %v6454_v40, 4  ;;  %v12498_v58 = vld [vmem:[#allocation57_spill] sm:$0xff] }
 0x3e7   : > { %v12493_v9 = vrot.slane %v11154_v61, 5  ;;  %v6459_v32 = vrot.slane %v6457_v37, 4  ;;  %v6547_v36 = vadd.f32 %v6455_v18, %v6407_v11  ;;  %v5409_v14 = vcombine.high %v5140_v63, %v5140_v63 }
 0x3e8   : > { %v6629_v23 = vcombine.low %v6583_v62, %v6584_v34  ;;  %v6464_v42 = vrot.slane %v6462_v28, 4  ;;  %v6458_v33 = vsel %vm10372_vm4, %v6456_v17, %v6457_v37  ;;  %v6244_v16 = vadd.f32 %v11498_v6, %v12494_v56  ;;  %v12496_v28 = vld [vmem:[#allocation101_spill] sm:$0xff]  ;;  %v12499_v37 = vld [vmem:[#allocation119_spill] sm:$0xff] }
 0x3e9   : > { %v6409_v2 = vadd.f32 %v12493_v9, %v11448_v15  ;;  %v6589_v21 = vadd.f32 %v11637_v52, %v6550_v39  ;;  %v6548_v10 = vadd.f32 %v6458_v33, %v6408_v0  ;;  %v12495_v61 = vrot.slane %v12446_v5, 5 }
 0x3ea   : > { %6653 = vst.msk [vmem:[%s11656_s16 + $0x20] sm:$0xff] %vm6647_vm8, %v6629_v23  ;;  %v6470_v54 = vrot.slane %v5140_v63, 6  ;;  %v6473_v11 = vrot.slane %v5409_v14, 6  ;;  %v5135_v27 = vadd.f32 %v5134_v48, %v12496_v28  ;;  %v6241_v40 = vadd.f32 %v11433_v19, %v12497_v29  ;;  %v12503_v14 = vld [vmem:[#allocation63_spill] sm:$0xff] }
 0x3eb   : > { %v6549_v7 = vadd.f32 %v6459_v32, %v6409_v2  ;;  %v6415_v15 = vadd.f32 %v12495_v61, %v11604_v4  ;;  %v6586_v6 = vadd.f32 %v11637_v52, %v6547_v36  ;;  %v6587_v62 = vadd.f32 %v11643_v8, %v6548_v10  ;;  %v5144_v4 = vpop.f32.mrf.mxu1  ;;  %v12502_v2 = vld [vmem:[#allocation103_spill] sm:$0xff]  ;;  %v12505_v10 = vld [vmem:[#allocation34_spill] sm:$0xff] }
 0x3ec   : > { %v6243_v5 = vadd.f32 %v11470_v25, %v12498_v58  ;;  %v12500_v47 = vrot.slane %v12499_v37, 4  ;;  %v6472_v34 = vrot.slane %v6470_v54, 4  ;;  %v6475_v39 = vrot.slane %v6473_v11, 4  ;;  %v12508_v37 = vld [vmem:[#allocation104_spill] sm:$0xff] }
 0x3ed   : > { %v6588_v0 = vadd.f32 %v11637_v52, %v6549_v7  ;;  %v5400_v48 = vcombine.high %v5135_v27, %v5135_v27  ;;  %v6630_v18 = vcombine.low %v6586_v6, %v6587_v62  ;;  %v12501_v19 = vrot.slane %v11211_v49, 5 }
 0x3ee   : > { %v6414_v63 = vadd.f32 %v12500_v47, %v6244_v16  ;;  %v6465_v9 = vrot.slane %v5135_v27, 6  ;;  %v5150_v32 = vadd.f32 %v7314_v60, %v12502_v2  ;;  %v6474_v25 = vsel %vm10372_vm4, %v6472_v34, %v6473_v11  ;;  %v7317_v60 = vpop.f32.mrf.mxu1  ;;  %v12509_v34 = vld [vmem:[#allocation33_spill] sm:$0xff] }
 0x3ef   : > { %6656 = vst.msk [vmem:[%s11656_s16 + $0x38] sm:$0x3] %vm6649_vm7, %v6588_v0  ;;  %v6412_v17 = vadd.f32 %v12501_v19, %v11456_v1  ;;  %v6555_v36 = vadd.f32 %v6475_v39, %v6415_v15  ;;  %v12504_v23 = vrot.slane %v12503_v14, 4  ;;  %v7093_v56 = vrot.slane %v5400_v48, 10 }
 0x3f0   : > { %6655 = vst.msk [vmem:[%s11656_s16 + $0x30] sm:$0xff] %vm6647_vm8, %v6630_v18  ;;  %v6554_v16 = vadd.f32 %v6474_v25, %v6414_v63  ;;  %v12506_v7 = vrot.slane %v12505_v10, 4  ;;  %v6466_v49 = vsel %vm10372_vm4, %v6464_v42, %v6465_v9  ;;  %v6467_v1 = vrot.slane %v6465_v9, 4  ;;  %v5154_v48 = vpop.f32.mrf.mxu1  ;;  %v12514_v10 = vld [vmem:[#allocation118_spill] sm:$0xff] }
 0x3f1   : > { %v6411_v33 = vadd.f32 %v12504_v23, %v6241_v40  ;;  %v6594_v28 = vadd.f32 %v11637_v52, %v6555_v36  ;;  %v6471_v15 = vsel %vm10372_vm4, %v7093_v56, %v6470_v54  ;;  %v6481_v27 = vrot.slane %v5150_v32, 6  ;;  %v12511_v36 = vld [vmem:[#allocation107_spill] sm:$0xff] }
 0x3f2   : > { %v6413_v61 = vadd.f32 %v12506_v7, %v6243_v5  ;;  %v6552_v29 = vadd.f32 %v6467_v1, %v6412_v17  ;;  %v5427_v6 = vcombine.high %v5150_v32, %v5150_v32  ;;  %v12507_v62 = vrot.slane %v11352_v43, 5  ;;  %v12510_v43 = vld [vmem:[#allocation106_spill] sm:$0xff] }
 0x3f3   : > { %v6551_v11 = vadd.f32 %v6466_v49, %v6411_v33  ;;  %v6593_v58 = vadd.f32 %v11643_v8, %v6554_v16  ;;  %6660 = vst.msk [vmem:[%s11656_s16 + $0x58] sm:$0x3] %vm6649_vm7, %v6594_v28  ;;  %v6483_v5 = vrot.slane %v6481_v27, 4  ;;  %v5145_v54 = vadd.f32 %v5144_v4, %v12508_v37  ;;  %v12512_v33 = vld [vmem:[#allocation121_spill] sm:$0xff]  ;;  %v12515_v49 = vld [vmem:[#allocation35_spill] sm:$0xff] }
 0x3f4   : > { %v6553_v40 = vadd.f32 %v6471_v15, %v6413_v61  ;;  %v6418_v0 = vadd.f32 %v12507_v62, %v11612_v45  ;;  %v6591_v47 = vadd.f32 %v11637_v52, %v6552_v29  ;;  %v6246_v39 = vadd.f32 %v11532_v53, %v12509_v34 }
 0x3f5   : > { %v6590_v42 = vadd.f32 %v11643_v8, %v6551_v11  ;;  %v5160_v45 = vadd.f32 %v7317_v60, %v12510_v43  ;;  %v6251_v18 = vadd.f32 %v11563_v30, %v11379_v31  ;;  %v5418_v9 = vcombine.high %v5145_v54, %v5145_v54 }
 0x3f6   : > { %v6592_v63 = vadd.f32 %v11637_v52, %v6553_v40  ;;  %v6558_v17 = vadd.f32 %v6483_v5, %v6418_v0  ;;  %v11780_v4 = vadd.f32 %v11581_v59, %v11445_v35  ;;  %6658 = vst.msk [vmem:[%s11656_s16 + $0x48] sm:$0x3] %vm6649_vm7, %v6591_v47  ;;  %v7094_v32 = vrot.slane %v5145_v54, 10 }
 0x3f7   : > { %v6631_v19 = vcombine.low %v6589_v21, %v6590_v42  ;;  %v6252_v53 = vadd.f32 %v11579_v12, %v11426_v26  ;;  %v6478_v30 = vrot.slane %v5418_v9, 6  ;;  %v5443_v21 = vcombine.high %v5160_v45, %v5160_v45 }
 0x3f8   : > { %v6632_v2 = vcombine.low %v6592_v63, %v6593_v58  ;;  %v6597_v25 = vadd.f32 %v11637_v52, %v6558_v17  ;;  %v5155_v14 = vadd.f32 %v5154_v48, %v12511_v36  ;;  %v6257_v23 = vadd.f32 %v11632_v3, %v11482_v55  ;;  %v7320_v3 = vpop.f32.mrf.mxu1 }
 0x3f9   : > { %6657 = vst.msk [vmem:[%s11656_s16 + $0x40] sm:$0xff] %vm6647_vm8, %v6631_v19  ;;  %v7095_v59 = vrot.slane %v5427_v6, 10  ;;  %v12513_v56 = vrot.slane %v12512_v33, 4  ;;  %v6249_v26 = vadd.f32 %v11546_v50, %v12514_v10  ;;  %v6479_v12 = vsel %vm10372_vm4, %v7094_v32, %v6478_v30  ;;  %v12525_v33 = vld [vmem:[#allocation71_spill] sm:$0xff] }
 0x3fa   : > { %6659 = vst.msk [vmem:[%s11656_s16 + $0x50] sm:$0xff] %vm6647_vm8, %v6632_v2  ;;  %v6480_v7 = vrot.slane %v6478_v30, 4  ;;  %v5436_v61 = vcombine.high %v5155_v14, %v5155_v14  ;;  %v6250_v1 = vadd.f32 %v11561_v51, %v12515_v49  ;;  %v12516_v60 = vrot.slane %v11393_v44, 4  ;;  %v12519_v51 = vld [vmem:[#allocation69_spill] sm:$0xff]  ;;  %v12521_v44 = vld [vmem:[#allocation108_spill] sm:$0xff] }
 0x3fb   : > { %v6416_v16 = vadd.f32 %v12513_v56, %v6246_v39  ;;  %6662 = vst.msk [vmem:[%s11656_s16 + $0x68] sm:$0x3] %vm6649_vm7, %v6597_v25  ;;  %v12517_v11 = vrot.slane %v11443_v13, 4  ;;  %v7096_v50 = vrot.slane %v5160_v45, 10  ;;  %v6494_v6 = vrot.slane %v5443_v21, 6  ;;  %v12522_v13 = vld [vmem:[#allocation37_spill] sm:$0xff] }
 0x3fc   : > { %v6417_v28 = vadd.f32 %v12516_v60, %v11608_v38  ;;  %v6482_v40 = vsel %vm10372_vm4, %v6480_v7, %v6481_v27  ;;  %v12518_v62 = vrot.slane %v11379_v31, 5  ;;  %v6486_v58 = vrot.slane %v5155_v14, 6  ;;  %v12524_v14 = vld [vmem:[#allocation109_spill] sm:$0xff] }
 0x3fd   : > { %v6556_v15 = vadd.f32 %v6479_v12, %v6416_v16  ;;  %v6422_v29 = vadd.f32 %v12517_v11, %v6252_v53  ;;  %v12520_v5 = vrot.slane %v12519_v51, 4  ;;  %v6489_v54 = vrot.slane %v5436_v61, 6 }
 0x3fe   : > { %v6421_v0 = vadd.f32 %v12518_v62, %v6251_v18  ;;  %v6557_v42 = vadd.f32 %v6482_v40, %v6417_v28  ;;  %v5170_v38 = vadd.f32 %v7320_v3, %v12521_v44  ;;  %v12523_v63 = vrot.slane %v12522_v13, 4  ;;  %v5164_v18 = vpop.f32.mrf.mxu1  ;;  %v12527_v3 = vld [vmem:[#allocation39_spill] sm:$0xff] }
 0x3ff   : > { %v6419_v37 = vadd.f32 %v12520_v5, %v6249_v26  ;;  %v6595_v47 = vadd.f32 %v11637_v52, %v6556_v15  ;;  %v6487_v27 = vsel %vm10372_vm4, %v7095_v59, %v6486_v58  ;;  %v6488_v39 = vrot.slane %v6486_v58, 4 }
 0x400   : > { %v6420_v34 = vadd.f32 %v12523_v63, %v6250_v1  ;;  %v6596_v31 = vadd.f32 %v11643_v8, %v6557_v42  ;;  %v6491_v43 = vrot.slane %v6489_v54, 4  ;;  %v5451_v48 = vcombine.high %v5170_v38, %v5170_v38 }
 0x401   : > { %v6559_v45 = vadd.f32 %v6487_v27, %v6419_v37  ;;  %v6495_v19 = vsel %vm10372_vm4, %v7096_v50, %v6494_v6  ;;  %v6496_v17 = vrot.slane %v6494_v6, 4  ;;  %v6490_v9 = vsel %vm10372_vm4, %v6488_v39, %v6489_v54  ;;  %v12529_v50 = vld [vmem:[#allocation38_spill] sm:$0xff]  ;;  %v12532_v6 = vld [vmem:[#allocation73_spill] sm:$0xff] }
 0x402   : > { %v6502_v2 = vrot.slane %v5170_v38, 6  ;;  %v6633_v32 = vcombine.low %v6595_v47, %v6596_v31  ;;  %v6560_v53 = vadd.f32 %v6490_v9, %v6420_v34  ;;  %v6561_v25 = vadd.f32 %v6491_v43, %v6421_v0 }
 0x403   : > { %v6256_v30 = vadd.f32 %v11629_v57, %v11474_v20  ;;  %v6505_v36 = vrot.slane %v5451_v48, 6  ;;  %v5165_v59 = vadd.f32 %v5164_v18, %v12524_v14  ;;  %v6253_v56 = vadd.f32 %v11583_v46, %v12525_v33 }
 0x404   : > { %v6504_v21 = vrot.slane %v6502_v2, 4  ;;  %6661 = vst.msk [vmem:[%s11656_s16 + $0x60] sm:$0xff] %vm6647_vm8, %v6633_v32  ;;  %v6598_v16 = vadd.f32 %v11637_v52, %v6559_v45  ;;  %v6599_v10 = vadd.f32 %v11643_v8, %v6560_v53  ;;  %v6600_v26 = vadd.f32 %v11637_v52, %v6561_v25 }
 0x405   : > { %v6255_v20 = vadd.f32 %v11600_v22, %v11472_v41  ;;  %v12526_v57 = vrot.slane %v11482_v55, 5  ;;  %v6507_v61 = vrot.slane %v6505_v36, 4  ;;  %v5448_v46 = vcombine.high %v5165_v59, %v5165_v59 }
 0x406   : > { %v6506_v7 = vsel %vm10372_vm4, %v6504_v21, %v6505_v36  ;;  %v6562_v49 = vadd.f32 %v6495_v19, %v6422_v29  ;;  %v6634_v1 = vcombine.low %v6598_v16, %v6599_v10  ;;  %6664 = vst.msk [vmem:[%s11656_s16 + $0x78] sm:$0x3] %vm6649_vm7, %v6600_v26  ;;  %v12528_v60 = vrot.slane %v12527_v3, 4 }
 0x407   : > { %v6427_v12 = vadd.f32 %v12526_v57, %v6257_v23  ;;  %v6497_v15 = vrot.slane %v5165_v59, 6  ;;  %v12530_v41 = vrot.slane %v12529_v50, 4  ;;  %v12531_v55 = vrot.slane %v11445_v35, 5 }
 0x408   : > { %v6426_v28 = vadd.f32 %v12528_v60, %v6256_v30  ;;  %v7097_v40 = vrot.slane %v5448_v46, 10  ;;  %6663 = vst.msk [vmem:[%s11656_s16 + $0x70] sm:$0xff] %vm6647_vm8, %v6634_v1  ;;  %v12533_v62 = vrot.slane %v12532_v6, 4  ;;  %v6601_v54 = vadd.f32 %v11637_v52, %v6562_v49 }
 0x409   : > { %v6567_v11 = vadd.f32 %v6507_v61, %v6427_v12  ;;  %v6423_v22 = vadd.f32 %v12530_v41, %v6253_v56  ;;  %v6424_v23 = vadd.f32 %v12531_v55, %v11780_v4  ;;  %v6498_v58 = vsel %vm10372_vm4, %v6496_v17, %v6497_v15 }
 0x40a   : > { %v6566_v29 = vadd.f32 %v6506_v7, %v6426_v28  ;;  %v6425_v0 = vadd.f32 %v12533_v62, %v6255_v20  ;;  %v6499_v42 = vrot.slane %v6497_v15, 4  ;;  %v6503_v35 = vsel %vm10372_vm4, %v7097_v40, %v6502_v2 }
 0x40b   : > { %v6606_v51 = vadd.f32 %v11637_v52, %v6567_v11  ;;  %v6563_v4 = vadd.f32 %v6498_v58, %v6423_v22 }
 0x40c   : > { %v6564_v5 = vadd.f32 %v6499_v42, %v6424_v23  ;;  %v6565_v37 = vadd.f32 %v6503_v35, %v6425_v0  ;;  %v6605_v38 = vadd.f32 %v11643_v8, %v6566_v29 }
 0x40d   : > { %6668 = vst.msk [vmem:[%s11656_s16 + $0x98] sm:$0x3] %vm6649_vm7, %v6606_v51  ;;  %v6602_v44 = vadd.f32 %v11643_v8, %v6563_v4 }
 0x40e   : > { %v6603_v47 = vadd.f32 %v11637_v52, %v6564_v5  ;;  %v6604_v13 = vadd.f32 %v11637_v52, %v6565_v37 }
 0x40f   : > { %v6635_v63 = vcombine.low %v6601_v54, %v6602_v44 }
 0x410   : > { %v6636_v34 = vcombine.low %v6604_v13, %v6605_v38  ;;  %6666 = vst.msk [vmem:[%s11656_s16 + $0x88] sm:$0x3] %vm6649_vm7, %v6603_v47 }
 0x411   : > { %6665 = vst.msk [vmem:[%s11656_s16 + $0x80] sm:$0xff] %vm6647_vm8, %v6635_v63 }
 0x412   : > { %6667 = vst.msk [vmem:[%s11656_s16 + $0x90] sm:$0xff] %vm6647_vm8, %v6636_v34 }
 0x413 PF: > { %s16_s21 = sadd.s32 1, %s7389_s21  }
 0x414   : > { %p13_p4 = scmp.ge.s32.totalorder %s16_s21, 4  }
 0x416   :  { %15 = sbr.rel (!%p13_p4) target bundleno = 1 (0x1), region = 77 }

</bundles_post_ra>
